<compile_context>
chip_gen: v6e
topology: v6e:2x2x1
jax: 0.10.0
libtpu: 0.0.40
codegen_flags: <defaults>
</compile_context>

<pallas_src>
import functools
import math

import jax
import jax.numpy as jnp
from jax import lax
from jax.experimental import pallas as pl
from jax.experimental.pallas import tpu as pltpu

LANES = 128


def _round_up(x, m):
    return (x + m - 1) // m * m


# ----------------------------- Pallas kernel --------------------------------
def _make_conv_bn_kernel(K, stride, TH, Wout, relu, res_mode):
    """Fused conv(KxK, stride) + folded-BN (+shortcut) (+ReLU) over one row tile."""
    M = TH * Wout

    def kernel(*refs):
        if res_mode == "proj":
            x_ref, w_ref, b_ref, xs_ref, ws_ref, bs_ref, o_ref = refs
        elif res_mode == "identity":
            x_ref, w_ref, b_ref, r_ref, o_ref = refs
        else:
            x_ref, w_ref, b_ref, o_ref = refs

        cp = o_ref.shape[-1]
        cin = x_ref.shape[-1]
        acc = jnp.zeros((M, cp), jnp.float32)

        # In-kernel im2col: one MXU matmul per (kh, kw) tap, f32 accumulation.
        # x_ref holds the stride-phase decomposition of the padded input tile, so
        # every slice below is unit-stride.
        loaded = {}
        for kh in range(K):
            for kw in range(K):
                t = kh * K + kw
                p = (kh % stride) * stride + (kw % stride)   # phase plane
                qh, qw = kh // stride, kw // stride           # offset inside phase
                if p not in loaded:
                    loaded[p] = x_ref[p]                      # (Hq, Wph, Cin) bf16
                xt = loaded[p][qh:qh + TH, qw:qw + Wout, :].reshape(M, cin)
                acc += jnp.dot(xt, w_ref[t], preferred_element_type=jnp.float32)

        out = acc + b_ref[...]                                # folded BN bias

        if res_mode == "proj":                                # fused 1x1-conv + BN shortcut
            xs = xs_ref[...].reshape(M, xs_ref.shape[-1])
            out = out + jnp.dot(xs, ws_ref[...], preferred_element_type=jnp.float32)
            out = out + bs_ref[...]
        elif res_mode == "identity":                          # identity shortcut
            out = out + r_ref[...].reshape(M, cp).astype(jnp.float32)

        if relu:
            out = jnp.maximum(out, 0.0)
        o_ref[...] = out.reshape(TH, Wout, cp).astype(o_ref.dtype)

    return kernel


# ------------------------------- glue (JAX) ---------------------------------
def _phase_row_tiles(x_nhwc, K, stride, pad, TH):
    """Space-to-depth by `stride`, then stack haloed output-row tiles.

    Returns a bf16 array of shape (N, T, stride*stride, TH+qmax, Wout+qmax, Cin)
    where tile t, phase (a, b), entry [i, j] == x_pad[(t*TH+i)*stride+a, j*stride+b].
    Only qmax halo rows per tile are duplicated; no 9x im2col expansion in HBM.
    """
    n, h, w, c = x_nhwc.shape
    hout = (h + 2 * pad - K) // stride + 1
    wout = (w + 2 * pad - K) // stride + 1
    qmax = (K - 1) // stride
    hph, wph = hout + qmax, wout + qmax
    hp, wp = hph * stride, wph * stride

    xp = jnp.pad(x_nhwc, ((0, 0),
                          (pad, max(hp - h - pad, 0)),
                          (pad, max(wp - w - pad, 0)),
                          (0, 0)))[:, :hp, :wp, :]
    xp = xp.reshape(n, hph, stride, wph, stride, c)
    phases = xp.transpose(0, 2, 4, 1, 3, 5).reshape(n, stride * stride, hph, wph, c)

    T = hout // TH
    hq = TH + qmax
    tiles = jnp.stack([phases[:, :, t * TH: t * TH + hq] for t in range(T)], axis=1)
    return tiles.astype(jnp.bfloat16), hout, wout, T


def conv_bn_pallas(x_nhwc, w_oihw, bn_scale, bn_bias, *, stride, relu,
                   out_dtype, shortcut=None):
    """Conv2d(bias=False, pad=(K-1)//2) + BN (+shortcut) (+ReLU) in one kernel.

    Returns NHWC output with channels padded to a multiple of 128 (lane-dense);
    the padded channels are exactly zero.
    """
    n, h, w, cin = x_nhwc.shape
    cout, cin_w, K, _ = w_oihw.shape
    pad = (K - 1) // 2
    cp = _round_up(cout, LANES)

    hout = (h + 2 * pad - K) // stride + 1
    wout = (w + 2 * pad - K) // stride + 1
    TH = next(th for th in range(min(8, hout), 0, -1) if hout % th == 0)

    tiles, hout, wout, T = _phase_row_tiles(x_nhwc, K, stride, pad, TH)
    P, hq, wph = tiles.shape[2], tiles.shape[3], tiles.shape[4]

    # (Cout, Cin, kh, kw) -> (K*K, Cin, Cout); fold BN scale into the weights;
    # pad Cin (to match a channel-padded input) and Cout (lane-dense output).
    w_taps = jnp.transpose(w_oihw, (2, 3, 1, 0)).reshape(K * K, cin_w, cout)
    w_taps = w_taps * bn_scale.reshape(1, 1, cout)
    w_taps = jnp.pad(w_taps, ((0, 0), (0, cin - cin_w), (0, cp - cout)))
    w_taps = w_taps.astype(jnp.bfloat16)
    b_row = jnp.pad(bn_bias, (0, cp - cout)).reshape(1, cp).astype(jnp.float32)

    in_specs = [
        pl.BlockSpec((None, None, P, hq, wph, cin), lambda b, t: (b, t, 0, 0, 0, 0)),
        pl.BlockSpec((K * K, cin, cp), lambda b, t: (0, 0, 0)),   # weights resident
        pl.BlockSpec((1, cp), lambda b, t: (0, 0)),               # folded BN bias
    ]
    args = [tiles, w_taps, b_row]
    flops = 2 * n * hout * wout * K * K * cin * cp

    res_mode = None
    if shortcut is not None:
        res_mode = shortcut[0]
        if res_mode == "proj":
            xs, ws_oihw, s_s, b_s = shortcut[1:]
            cin_s = xs.shape[-1]
            ws = jnp.transpose(ws_oihw, (2, 3, 1, 0)).reshape(cin_s, cout)
            ws = ws * s_s.reshape(1, cout)
            ws = jnp.pad(ws, ((0, 0), (0, cp - cout))).astype(jnp.bfloat16)
            bs_row = jnp.pad(b_s, (0, cp - cout)).reshape(1, cp).astype(jnp.float32)
            in_specs += [
                pl.BlockSpec((None, TH, wout, cin_s), lambda b, t: (b, t, 0, 0)),
                pl.BlockSpec((cin_s, cp), lambda b, t: (0, 0)),
                pl.BlockSpec((1, cp), lambda b, t: (0, 0)),
            ]
            args += [xs.astype(jnp.bfloat16), ws, bs_row]
            flops += 2 * n * hout * wout * cin_s * cp
        else:  # identity shortcut: residual padded to cp zero channels
            res = shortcut[1]
            res = jnp.pad(res, ((0, 0), (0, 0), (0, 0), (0, cp - res.shape[-1])))
            in_specs.append(pl.BlockSpec((None, TH, wout, cp), lambda b, t: (b, t, 0, 0)))
            args.append(res.astype(jnp.bfloat16))

    out_shape = jax.ShapeDtypeStruct((n, hout, wout, cp), out_dtype)
    bytes_accessed = int(sum(math.prod(a.shape) * a.dtype.itemsize for a in args)
                         + math.prod(out_shape.shape) * jnp.dtype(out_dtype).itemsize)

    # Explicit VMEM budget (double-buffered blocks + headroom), capped for v7x.
    block_bytes = (P * hq * wph * cin * 2 + K * K * cin * cp * 2 + 2 * cp * 4
                   + TH * wout * cp * 4 + TH * wout * cin * 2 + cin * cp * 2)
    vmem_limit = int(min(64 * 2 ** 20, max(16 * 2 ** 20, 4 * block_bytes)))

    return pl.pallas_call(
        _make_conv_bn_kernel(K, stride, TH, wout, relu, res_mode),
        out_shape=out_shape,
        grid_spec=pltpu.PrefetchScalarGridSpec(
            num_scalar_prefetch=0,
            grid=(n, T),
            in_specs=in_specs,
            out_specs=pl.BlockSpec((None, TH, wout, cp), lambda b, t: (b, t, 0, 0)),
        ),
        compiler_params=pltpu.CompilerParams(
            dimension_semantics=("parallel", "parallel"),
            vmem_limit_bytes=vmem_limit,
        ),
        cost_estimate=pl.CostEstimate(flops=flops, transcendentals=0,
                                      bytes_accessed=bytes_accessed),
    )(*args)


def fold_bn(gamma, beta, mean, var, eps=1e-5):
    scale = gamma / jnp.sqrt(var + eps)
    return scale, beta - mean * scale


# ---------------------------- BasicBlock module ------------------------------
def init_basic_block_params(key, in_planes, planes, stride):
    ks = jax.random.split(key, 16)
    def bn_params(k0, k1, k2, k3, c):
        return (1.0 + 0.1 * jax.random.normal(ks[k0], (c,), jnp.float32),   # gamma
                0.1 * jax.random.normal(ks[k1], (c,), jnp.float32),          # beta
                0.1 * jax.random.normal(ks[k2], (c,), jnp.float32),          # running_mean
                0.5 + jax.random.uniform(ks[k3], (c,), jnp.float32))         # running_var
    p = {
        "w1": 0.1 * jax.random.normal(ks[0], (planes, in_planes, 3, 3), jnp.float32),
        "bn1": bn_params(1, 2, 3, 4, planes),
        "w2": 0.1 * jax.random.normal(ks[5], (planes, planes, 3, 3), jnp.float32),
        "bn2": bn_params(6, 7, 8, 9, planes),
    }
    if stride != 1 or in_planes != planes:                  # expansion == 1
        p["ws"] = 0.1 * jax.random.normal(ks[10], (planes, in_planes, 1, 1), jnp.float32)
        p["bns"] = bn_params(11, 12, 13, 14, planes)
    return p


@functools.partial(jax.jit, static_argnames=("stride",))
def basic_block_forward(params, x_nchw, stride):
    x = jnp.transpose(x_nchw, (0, 2, 3, 1))                 # NCHW -> NHWC
    planes = params["w1"].shape[0]

    s1, b1 = fold_bn(*params["bn1"])
    out1 = conv_bn_pallas(x, params["w1"], s1, b1, stride=stride, relu=True,
                          out_dtype=jnp.bfloat16)           # (N,H1,W1,Cp), padded chans = 0

    if "ws" in params:                                      # 1x1 conv + BN shortcut (fused)
        ss, bs = fold_bn(*params["bns"])
        xs = x[:, ::stride, ::stride, :]                    # 1x1 conv, stride s, no pad
        shortcut = ("proj", xs, params["ws"], ss, bs)
    else:                                                   # identity shortcut
        shortcut = ("identity", x)

    s2, b2 = fold_bn(*params["bn2"])
    out = conv_bn_pallas(out1, params["w2"], s2, b2, stride=1, relu=True,
                         out_dtype=jnp.float32, shortcut=shortcut)
    out = out[..., :planes]                                 # drop lane-padding channels
    return jnp.transpose(out, (0, 3, 1, 2))                 # NHWC -> NCHW


# --------------------------- pure-JAX reference ------------------------------
def _conv_bn_ref(x_nhwc, w_oihw, scale, bias, stride, pad, relu, residual=None):
    w_hwio = jnp.transpose(w_oihw, (2, 3, 1, 0))
    out = lax.conv_general_dilated(x_nhwc, w_hwio, (stride, stride),
                                   [(pad, pad), (pad, pad)],
                                   dimension_numbers=("NHWC", "HWIO", "NHWC"))
    out = out * scale + bias
    if residual is not None:
        out = out + residual
    if relu:
        out = jnp.maximum(out, 0.0)
    return out


def basic_block_ref(params, x_nchw, stride):
    x = jnp.transpose(x_nchw, (0, 2, 3, 1))
    s1, b1 = fold_bn(*params["bn1"])
    out1 = _conv_bn_ref(x, params["w1"], s1, b1, stride, 1, True)
    if "ws" in params:
        ss, bs = fold_bn(*params["bns"])
        res = _conv_bn_ref(x, params["ws"], ss, bs, stride, 0, False)
    else:
        res = x
    s2, b2 = fold_bn(*params["bn2"])
    out = _conv_bn_ref(out1, params["w2"], s2, b2, 1, 1, True, residual=res)
    return jnp.transpose(out, (0, 3, 1, 2))


# ----------------------------------- main ------------------------------------
if __name__ == "__main__":
    key = jax.random.PRNGKey(0)
    kx, kp1, kp2 = jax.random.split(key, 3)
    x = jax.random.normal(kx, (2, 4, 16, 16), jnp.float32)   # NCHW, like PyTorch

    # bf16 matmul operands (f32 accumulation) => looser tolerance vs f32 reference.
    TOL = dict(atol=5e-2, rtol=5e-2)

    # Config A: identity shortcut (stride=1, in_planes == planes)
    params_a = init_basic_block_params(kp1, in_planes=4, planes=4, stride=1)
    out_a = jax.block_until_ready(basic_block_forward(params_a, x, stride=1))
    ref_a = jax.block_until_ready(basic_block_ref(params_a, x, stride=1))
    assert out_a.shape == (2, 4, 16, 16)
    assert jnp.allclose(out_a, ref_a, **TOL), float(jnp.max(jnp.abs(out_a - ref_a)))

    # Config B: projection shortcut (stride=2, in_planes != planes)
    params_b = init_basic_block_params(kp2, in_planes=4, planes=8, stride=2)
    out_b = jax.block_until_ready(basic_block_forward(params_b, x, stride=2))
    ref_b = jax.block_until_ready(basic_block_ref(params_b, x, stride=2))
    assert out_b.shape == (2, 8, 8, 8)
    assert jnp.allclose(out_b, ref_b, **TOL), float(jnp.max(jnp.abs(out_b - ref_b)))

    print("KERNEL_OK")
</pallas_src>

<mosaic_0001>
module attributes {stable_mosaic.version = 11 : i64} {
  func.func @kernel(%arg0: i32, %arg1: i32, %arg2: memref<1x1x1x10x18x4xbf16, #tpu.memory_space<vmem>>, %arg3: memref<9x4x128xbf16, #tpu.memory_space<vmem>>, %arg4: memref<1x128xf32, #tpu.memory_space<vmem>>, %arg5: memref<1x8x16x128xbf16, #tpu.memory_space<vmem>>) attributes {dimension_semantics = [#tpu.dimension_semantics<parallel>, #tpu.dimension_semantics<parallel>], iteration_bounds = array<i64: 2, 2>, scalar_prefetch = 0 : i64, scratch_operands = 0 : i64, tpu.core_type = #tpu.core_type<tc>, window_params = [{transform_indices = @transform_0, window_bounds = array<i64: 1, 1, 1, 10, 18, 4>}, {pipeline_mode = #tpu.pipeline_mode<synchronous>, transform_indices = @transform_1, window_bounds = array<i64: 9, 4, 128>}, {pipeline_mode = #tpu.pipeline_mode<synchronous>, transform_indices = @transform_2, window_bounds = array<i64: 1, 128>}, {transform_indices = @transform_3, window_bounds = array<i64: 1, 8, 16, 128>}]} {
    %cst = arith.constant 0.000000e+00 : f32
    %0 = vector.broadcast %cst : f32 to vector<128x128xf32>
    %c0 = arith.constant 0 : index
    %c0_0 = arith.constant 0 : index
    %c0_1 = arith.constant 0 : index
    %c0_2 = arith.constant 0 : index
    %c0_3 = arith.constant 0 : index
    %c0_4 = arith.constant 0 : index
    %1 = vector.load %arg2[%c0, %c0_0, %c0_1, %c0_2, %c0_3, %c0_4] : memref<1x1x1x10x18x4xbf16, #tpu.memory_space<vmem>>, vector<1x1x1x10x18x4xbf16>
    %2 = vector.shape_cast %1 : vector<1x1x1x10x18x4xbf16> to vector<10x18x4xbf16>
    %3 = vector.extract_strided_slice %2 {offsets = [0, 0, 0], sizes = [8, 16, 4], strides = [1, 1, 1]} : vector<10x18x4xbf16> to vector<8x16x4xbf16>
    %4 = vector.shape_cast %3 : vector<8x16x4xbf16> to vector<128x4xbf16>
    %c0_5 = arith.constant 0 : index
    %c0_6 = arith.constant 0 : index
    %c0_7 = arith.constant 0 : index
    %5 = vector.load %arg3[%c0_5, %c0_6, %c0_7] : memref<9x4x128xbf16, #tpu.memory_space<vmem>>, vector<1x4x128xbf16>
    %6 = vector.shape_cast %5 : vector<1x4x128xbf16> to vector<4x128xbf16>
    %cst_8 = arith.constant dense<0.000000e+00> : vector<128x128xf32>
    %7 = tpu.matmul %4, %6, %cst_8 {dimension_numbers = #tpu.dot_dimension_numbers<[1], [0], [0], [1], [0, 0, 1, 1], [], []>} : vector<128x4xbf16>, vector<4x128xbf16>, vector<128x128xf32> -> vector<128x128xf32>
    %8 = arith.addf %0, %7 : vector<128x128xf32>
    %9 = vector.extract_strided_slice %2 {offsets = [0, 1, 0], sizes = [8, 16, 4], strides = [1, 1, 1]} : vector<10x18x4xbf16> to vector<8x16x4xbf16>
    %10 = vector.shape_cast %9 : vector<8x16x4xbf16> to vector<128x4xbf16>
    %c1 = arith.constant 1 : index
    %c0_9 = arith.constant 0 : index
    %c0_10 = arith.constant 0 : index
    %11 = vector.load %arg3[%c1, %c0_9, %c0_10] : memref<9x4x128xbf16, #tpu.memory_space<vmem>>, vector<1x4x128xbf16>
    %12 = vector.shape_cast %11 : vector<1x4x128xbf16> to vector<4x128xbf16>
    %cst_11 = arith.constant dense<0.000000e+00> : vector<128x128xf32>
    %13 = tpu.matmul %10, %12, %cst_11 {dimension_numbers = #tpu.dot_dimension_numbers<[1], [0], [0], [1], [0, 0, 1, 1], [], []>} : vector<128x4xbf16>, vector<4x128xbf16>, vector<128x128xf32> -> vector<128x128xf32>
    %14 = arith.addf %8, %13 : vector<128x128xf32>
    %15 = vector.extract_strided_slice %2 {offsets = [0, 2, 0], sizes = [8, 16, 4], strides = [1, 1, 1]} : vector<10x18x4xbf16> to vector<8x16x4xbf16>
    %16 = vector.shape_cast %15 : vector<8x16x4xbf16> to vector<128x4xbf16>
    %c2 = arith.constant 2 : index
    %c0_12 = arith.constant 0 : index
    %c0_13 = arith.constant 0 : index
    %17 = vector.load %arg3[%c2, %c0_12, %c0_13] : memref<9x4x128xbf16, #tpu.memory_space<vmem>>, vector<1x4x128xbf16>
    %18 = vector.shape_cast %17 : vector<1x4x128xbf16> to vector<4x128xbf16>
    %cst_14 = arith.constant dense<0.000000e+00> : vector<128x128xf32>
    %19 = tpu.matmul %16, %18, %cst_14 {dimension_numbers = #tpu.dot_dimension_numbers<[1], [0], [0], [1], [0, 0, 1, 1], [], []>} : vector<128x4xbf16>, vector<4x128xbf16>, vector<128x128xf32> -> vector<128x128xf32>
    %20 = arith.addf %14, %19 : vector<128x128xf32>
    %21 = vector.extract_strided_slice %2 {offsets = [1, 0, 0], sizes = [8, 16, 4], strides = [1, 1, 1]} : vector<10x18x4xbf16> to vector<8x16x4xbf16>
    %22 = vector.shape_cast %21 : vector<8x16x4xbf16> to vector<128x4xbf16>
    %c3 = arith.constant 3 : index
    %c0_15 = arith.constant 0 : index
    %c0_16 = arith.constant 0 : index
    %23 = vector.load %arg3[%c3, %c0_15, %c0_16] : memref<9x4x128xbf16, #tpu.memory_space<vmem>>, vector<1x4x128xbf16>
    %24 = vector.shape_cast %23 : vector<1x4x128xbf16> to vector<4x128xbf16>
    %cst_17 = arith.constant dense<0.000000e+00> : vector<128x128xf32>
    %25 = tpu.matmul %22, %24, %cst_17 {dimension_numbers = #tpu.dot_dimension_numbers<[1], [0], [0], [1], [0, 0, 1, 1], [], []>} : vector<128x4xbf16>, vector<4x128xbf16>, vector<128x128xf32> -> vector<128x128xf32>
    %26 = arith.addf %20, %25 : vector<128x128xf32>
    %27 = vector.extract_strided_slice %2 {offsets = [1, 1, 0], sizes = [8, 16, 4], strides = [1, 1, 1]} : vector<10x18x4xbf16> to vector<8x16x4xbf16>
    %28 = vector.shape_cast %27 : vector<8x16x4xbf16> to vector<128x4xbf16>
    %c4 = arith.constant 4 : index
    %c0_18 = arith.constant 0 : index
    %c0_19 = arith.constant 0 : index
    %29 = vector.load %arg3[%c4, %c0_18, %c0_19] : memref<9x4x128xbf16, #tpu.memory_space<vmem>>, vector<1x4x128xbf16>
    %30 = vector.shape_cast %29 : vector<1x4x128xbf16> to vector<4x128xbf16>
    %cst_20 = arith.constant dense<0.000000e+00> : vector<128x128xf32>
    %31 = tpu.matmul %28, %30, %cst_20 {dimension_numbers = #tpu.dot_dimension_numbers<[1], [0], [0], [1], [0, 0, 1, 1], [], []>} : vector<128x4xbf16>, vector<4x128xbf16>, vector<128x128xf32> -> vector<128x128xf32>
    %32 = arith.addf %26, %31 : vector<128x128xf32>
    %33 = vector.extract_strided_slice %2 {offsets = [1, 2, 0], sizes = [8, 16, 4], strides = [1, 1, 1]} : vector<10x18x4xbf16> to vector<8x16x4xbf16>
    %34 = vector.shape_cast %33 : vector<8x16x4xbf16> to vector<128x4xbf16>
    %c5 = arith.constant 5 : index
    %c0_21 = arith.constant 0 : index
    %c0_22 = arith.constant 0 : index
    %35 = vector.load %arg3[%c5, %c0_21, %c0_22] : memref<9x4x128xbf16, #tpu.memory_space<vmem>>, vector<1x4x128xbf16>
    %36 = vector.shape_cast %35 : vector<1x4x128xbf16> to vector<4x128xbf16>
    %cst_23 = arith.constant dense<0.000000e+00> : vector<128x128xf32>
    %37 = tpu.matmul %34, %36, %cst_23 {dimension_numbers = #tpu.dot_dimension_numbers<[1], [0], [0], [1], [0, 0, 1, 1], [], []>} : vector<128x4xbf16>, vector<4x128xbf16>, vector<128x128xf32> -> vector<128x128xf32>
    %38 = arith.addf %32, %37 : vector<128x128xf32>
    %39 = vector.extract_strided_slice %2 {offsets = [2, 0, 0], sizes = [8, 16, 4], strides = [1, 1, 1]} : vector<10x18x4xbf16> to vector<8x16x4xbf16>
    %40 = vector.shape_cast %39 : vector<8x16x4xbf16> to vector<128x4xbf16>
    %c6 = arith.constant 6 : index
    %c0_24 = arith.constant 0 : index
    %c0_25 = arith.constant 0 : index
    %41 = vector.load %arg3[%c6, %c0_24, %c0_25] : memref<9x4x128xbf16, #tpu.memory_space<vmem>>, vector<1x4x128xbf16>
    %42 = vector.shape_cast %41 : vector<1x4x128xbf16> to vector<4x128xbf16>
    %cst_26 = arith.constant dense<0.000000e+00> : vector<128x128xf32>
    %43 = tpu.matmul %40, %42, %cst_26 {dimension_numbers = #tpu.dot_dimension_numbers<[1], [0], [0], [1], [0, 0, 1, 1], [], []>} : vector<128x4xbf16>, vector<4x128xbf16>, vector<128x128xf32> -> vector<128x128xf32>
    %44 = arith.addf %38, %43 : vector<128x128xf32>
    %45 = vector.extract_strided_slice %2 {offsets = [2, 1, 0], sizes = [8, 16, 4], strides = [1, 1, 1]} : vector<10x18x4xbf16> to vector<8x16x4xbf16>
    %46 = vector.shape_cast %45 : vector<8x16x4xbf16> to vector<128x4xbf16>
    %c7 = arith.constant 7 : index
    %c0_27 = arith.constant 0 : index
    %c0_28 = arith.constant 0 : index
    %47 = vector.load %arg3[%c7, %c0_27, %c0_28] : memref<9x4x128xbf16, #tpu.memory_space<vmem>>, vector<1x4x128xbf16>
    %48 = vector.shape_cast %47 : vector<1x4x128xbf16> to vector<4x128xbf16>
    %cst_29 = arith.constant dense<0.000000e+00> : vector<128x128xf32>
    %49 = tpu.matmul %46, %48, %cst_29 {dimension_numbers = #tpu.dot_dimension_numbers<[1], [0], [0], [1], [0, 0, 1, 1], [], []>} : vector<128x4xbf16>, vector<4x128xbf16>, vector<128x128xf32> -> vector<128x128xf32>
    %50 = arith.addf %44, %49 : vector<128x128xf32>
    %51 = vector.extract_strided_slice %2 {offsets = [2, 2, 0], sizes = [8, 16, 4], strides = [1, 1, 1]} : vector<10x18x4xbf16> to vector<8x16x4xbf16>
    %52 = vector.shape_cast %51 : vector<8x16x4xbf16> to vector<128x4xbf16>
    %c8 = arith.constant 8 : index
    %c0_30 = arith.constant 0 : index
    %c0_31 = arith.constant 0 : index
    %53 = vector.load %arg3[%c8, %c0_30, %c0_31] : memref<9x4x128xbf16, #tpu.memory_space<vmem>>, vector<1x4x128xbf16>
    %54 = vector.shape_cast %53 : vector<1x4x128xbf16> to vector<4x128xbf16>
    %cst_32 = arith.constant dense<0.000000e+00> : vector<128x128xf32>
    %55 = tpu.matmul %52, %54, %cst_32 {dimension_numbers = #tpu.dot_dimension_numbers<[1], [0], [0], [1], [0, 0, 1, 1], [], []>} : vector<128x4xbf16>, vector<4x128xbf16>, vector<128x128xf32> -> vector<128x128xf32>
    %56 = arith.addf %50, %55 : vector<128x128xf32>
    %c0_33 = arith.constant 0 : index
    %c0_34 = arith.constant 0 : index
    %57 = vector.load %arg4[%c0_33, %c0_34] : memref<1x128xf32, #tpu.memory_space<vmem>>, vector<1x128xf32>
    %58 = vector.broadcast %57 : vector<1x128xf32> to vector<128x128xf32>
    %59 = arith.addf %56, %58 : vector<128x128xf32>
    %cst_35 = arith.constant 0.000000e+00 : f32
    %60 = vector.broadcast %cst_35 : f32 to vector<128x128xf32>
    %61 = arith.maximumf %59, %60 : vector<128x128xf32>
    %62 = vector.shape_cast %61 : vector<128x128xf32> to vector<8x16x128xf32>
    %63 = arith.truncf %62 : vector<8x16x128xf32> to vector<8x16x128xbf16>
    %c0_36 = arith.constant 0 : index
    %c0_37 = arith.constant 0 : index
    %c0_38 = arith.constant 0 : index
    %c0_39 = arith.constant 0 : index
    %64 = vector.load %arg5[%c0_36, %c0_37, %c0_38, %c0_39] : memref<1x8x16x128xbf16, #tpu.memory_space<vmem>>, vector<1x8x16x128xbf16>
    %65 = vector.shape_cast %64 : vector<1x8x16x128xbf16> to vector<8x16x128xbf16>
    %66 = vector.shape_cast %63 : vector<8x16x128xbf16> to vector<1x8x16x128xbf16>
    tpu.vector_store %arg5[%c0_36, %c0_37, %c0_38, %c0_39], %66 {strides = array<i32>} : memref<1x8x16x128xbf16, #tpu.memory_space<vmem>>, vector<1x8x16x128xbf16>,
    return
  }
  func.func @transform_0(%arg0: i32, %arg1: i32) -> (i32, i32, i32, i32, i32, i32) {
    %c0_i32 = arith.constant 0 : i32
    %c0_i32_0 = arith.constant 0 : i32
    %c0_i32_1 = arith.constant 0 : i32
    %c0_i32_2 = arith.constant 0 : i32
    %c0_i32_3 = arith.constant 0 : i32
    return %arg0, %arg1, %c0_i32, %c0_i32_0, %c0_i32_1, %c0_i32_2 : i32, i32, i32, i32, i32, i32
  }
  func.func @transform_1(%arg0: i32, %arg1: i32) -> (i32, i32, i32) {
    %c0_i32 = arith.constant 0 : i32
    %c0_i32_0 = arith.constant 0 : i32
    %c0_i32_1 = arith.constant 0 : i32
    %c0_i32_2 = arith.constant 0 : i32
    return %c0_i32, %c0_i32_0, %c0_i32_1 : i32, i32, i32
  }
  func.func @transform_2(%arg0: i32, %arg1: i32) -> (i32, i32) {
    %c0_i32 = arith.constant 0 : i32
    %c0_i32_0 = arith.constant 0 : i32
    %c0_i32_1 = arith.constant 0 : i32
    return %c0_i32, %c0_i32_0 : i32, i32
  }
  func.func @transform_3(%arg0: i32, %arg1: i32) -> (i32, i32, i32, i32) {
    %c0_i32 = arith.constant 0 : i32
    %c0_i32_0 = arith.constant 0 : i32
    %c0_i32_1 = arith.constant 0 : i32
    return %arg0, %arg1, %c0_i32, %c0_i32_0 : i32, i32, i32, i32
  }
}

module attributes {stable_mosaic.version = 11 : i64} {
  func.func @kernel(%arg0: i32, %arg1: i32, %arg2: memref<1x1x1x10x18x128xbf16, #tpu.memory_space<vmem>>, %arg3: memref<9x128x128xbf16, #tpu.memory_space<vmem>>, %arg4: memref<1x128xf32, #tpu.memory_space<vmem>>, %arg5: memref<1x8x16x128xbf16, #tpu.memory_space<vmem>>, %arg6: memref<1x8x16x128xf32, #tpu.memory_space<vmem>>) attributes {dimension_semantics = [#tpu.dimension_semantics<parallel>, #tpu.dimension_semantics<parallel>], iteration_bounds = array<i64: 2, 2>, scalar_prefetch = 0 : i64, scratch_operands = 0 : i64, tpu.core_type = #tpu.core_type<tc>, window_params = [{transform_indices = @transform_0, window_bounds = array<i64: 1, 1, 1, 10, 18, 128>}, {pipeline_mode = #tpu.pipeline_mode<synchronous>, transform_indices = @transform_1, window_bounds = array<i64: 9, 128, 128>}, {pipeline_mode = #tpu.pipeline_mode<synchronous>, transform_indices = @transform_2, window_bounds = array<i64: 1, 128>}, {transform_indices = @transform_3, window_bounds = array<i64: 1, 8, 16, 128>}, {transform_indices = @transform_4, window_bounds = array<i64: 1, 8, 16, 128>}]} {
    %cst = arith.constant 0.000000e+00 : f32
    %0 = vector.broadcast %cst : f32 to vector<128x128xf32>
    %c0 = arith.constant 0 : index
    %c0_0 = arith.constant 0 : index
    %c0_1 = arith.constant 0 : index
    %c0_2 = arith.constant 0 : index
    %c0_3 = arith.constant 0 : index
    %c0_4 = arith.constant 0 : index
    %1 = vector.load %arg2[%c0, %c0_0, %c0_1, %c0_2, %c0_3, %c0_4] : memref<1x1x1x10x18x128xbf16, #tpu.memory_space<vmem>>, vector<1x1x1x10x18x128xbf16>
    %2 = vector.shape_cast %1 : vector<1x1x1x10x18x128xbf16> to vector<10x18x128xbf16>
    %3 = vector.extract_strided_slice %2 {offsets = [0, 0, 0], sizes = [8, 16, 128], strides = [1, 1, 1]} : vector<10x18x128xbf16> to vector<8x16x128xbf16>
    %4 = vector.shape_cast %3 : vector<8x16x128xbf16> to vector<128x128xbf16>
    %c0_5 = arith.constant 0 : index
    %c0_6 = arith.constant 0 : index
    %c0_7 = arith.constant 0 : index
    %5 = vector.load %arg3[%c0_5, %c0_6, %c0_7] : memref<9x128x128xbf16, #tpu.memory_space<vmem>>, vector<1x128x128xbf16>
    %6 = vector.shape_cast %5 : vector<1x128x128xbf16> to vector<128x128xbf16>
    %cst_8 = arith.constant dense<0.000000e+00> : vector<128x128xf32>
    %7 = tpu.matmul %4, %6, %cst_8 {dimension_numbers = #tpu.dot_dimension_numbers<[1], [0], [0], [1], [0, 0, 1, 1], [], []>} : vector<128x128xbf16>, vector<128x128xbf16>, vector<128x128xf32> -> vector<128x128xf32>
    %8 = arith.addf %0, %7 : vector<128x128xf32>
    %9 = vector.extract_strided_slice %2 {offsets = [0, 1, 0], sizes = [8, 16, 128], strides = [1, 1, 1]} : vector<10x18x128xbf16> to vector<8x16x128xbf16>
    %10 = vector.shape_cast %9 : vector<8x16x128xbf16> to vector<128x128xbf16>
    %c1 = arith.constant 1 : index
    %c0_9 = arith.constant 0 : index
    %c0_10 = arith.constant 0 : index
    %11 = vector.load %arg3[%c1, %c0_9, %c0_10] : memref<9x128x128xbf16, #tpu.memory_space<vmem>>, vector<1x128x128xbf16>
    %12 = vector.shape_cast %11 : vector<1x128x128xbf16> to vector<128x128xbf16>
    %cst_11 = arith.constant dense<0.000000e+00> : vector<128x128xf32>
    %13 = tpu.matmul %10, %12, %cst_11 {dimension_numbers = #tpu.dot_dimension_numbers<[1], [0], [0], [1], [0, 0, 1, 1], [], []>} : vector<128x128xbf16>, vector<128x128xbf16>, vector<128x128xf32> -> vector<128x128xf32>
    %14 = arith.addf %8, %13 : vector<128x128xf32>
    %15 = vector.extract_strided_slice %2 {offsets = [0, 2, 0], sizes = [8, 16, 128], strides = [1, 1, 1]} : vector<10x18x128xbf16> to vector<8x16x128xbf16>
    %16 = vector.shape_cast %15 : vector<8x16x128xbf16> to vector<128x128xbf16>
    %c2 = arith.constant 2 : index
    %c0_12 = arith.constant 0 : index
    %c0_13 = arith.constant 0 : index
    %17 = vector.load %arg3[%c2, %c0_12, %c0_13] : memref<9x128x128xbf16, #tpu.memory_space<vmem>>, vector<1x128x128xbf16>
    %18 = vector.shape_cast %17 : vector<1x128x128xbf16> to vector<128x128xbf16>
    %cst_14 = arith.constant dense<0.000000e+00> : vector<128x128xf32>
    %19 = tpu.matmul %16, %18, %cst_14 {dimension_numbers = #tpu.dot_dimension_numbers<[1], [0], [0], [1], [0, 0, 1, 1], [], []>} : vector<128x128xbf16>, vector<128x128xbf16>, vector<128x128xf32> -> vector<128x128xf32>
    %20 = arith.addf %14, %19 : vector<128x128xf32>
    %21 = vector.extract_strided_slice %2 {offsets = [1, 0, 0], sizes = [8, 16, 128], strides = [1, 1, 1]} : vector<10x18x128xbf16> to vector<8x16x128xbf16>
    %22 = vector.shape_cast %21 : vector<8x16x128xbf16> to vector<128x128xbf16>
    %c3 = arith.constant 3 : index
    %c0_15 = arith.constant 0 : index
    %c0_16 = arith.constant 0 : index
    %23 = vector.load %arg3[%c3, %c0_15, %c0_16] : memref<9x128x128xbf16, #tpu.memory_space<vmem>>, vector<1x128x128xbf16>
    %24 = vector.shape_cast %23 : vector<1x128x128xbf16> to vector<128x128xbf16>
    %cst_17 = arith.constant dense<0.000000e+00> : vector<128x128xf32>
    %25 = tpu.matmul %22, %24, %cst_17 {dimension_numbers = #tpu.dot_dimension_numbers<[1], [0], [0], [1], [0, 0, 1, 1], [], []>} : vector<128x128xbf16>, vector<128x128xbf16>, vector<128x128xf32> -> vector<128x128xf32>
    %26 = arith.addf %20, %25 : vector<128x128xf32>
    %27 = vector.extract_strided_slice %2 {offsets = [1, 1, 0], sizes = [8, 16, 128], strides = [1, 1, 1]} : vector<10x18x128xbf16> to vector<8x16x128xbf16>
    %28 = vector.shape_cast %27 : vector<8x16x128xbf16> to vector<128x128xbf16>
    %c4 = arith.constant 4 : index
    %c0_18 = arith.constant 0 : index
    %c0_19 = arith.constant 0 : index
    %29 = vector.load %arg3[%c4, %c0_18, %c0_19] : memref<9x128x128xbf16, #tpu.memory_space<vmem>>, vector<1x128x128xbf16>
    %30 = vector.shape_cast %29 : vector<1x128x128xbf16> to vector<128x128xbf16>
    %cst_20 = arith.constant dense<0.000000e+00> : vector<128x128xf32>
    %31 = tpu.matmul %28, %30, %cst_20 {dimension_numbers = #tpu.dot_dimension_numbers<[1], [0], [0], [1], [0, 0, 1, 1], [], []>} : vector<128x128xbf16>, vector<128x128xbf16>, vector<128x128xf32> -> vector<128x128xf32>
    %32 = arith.addf %26, %31 : vector<128x128xf32>
    %33 = vector.extract_strided_slice %2 {offsets = [1, 2, 0], sizes = [8, 16, 128], strides = [1, 1, 1]} : vector<10x18x128xbf16> to vector<8x16x128xbf16>
    %34 = vector.shape_cast %33 : vector<8x16x128xbf16> to vector<128x128xbf16>
    %c5 = arith.constant 5 : index
    %c0_21 = arith.constant 0 : index
    %c0_22 = arith.constant 0 : index
    %35 = vector.load %arg3[%c5, %c0_21, %c0_22] : memref<9x128x128xbf16, #tpu.memory_space<vmem>>, vector<1x128x128xbf16>
    %36 = vector.shape_cast %35 : vector<1x128x128xbf16> to vector<128x128xbf16>
    %cst_23 = arith.constant dense<0.000000e+00> : vector<128x128xf32>
    %37 = tpu.matmul %34, %36, %cst_23 {dimension_numbers = #tpu.dot_dimension_numbers<[1], [0], [0], [1], [0, 0, 1, 1], [], []>} : vector<128x128xbf16>, vector<128x128xbf16>, vector<128x128xf32> -> vector<128x128xf32>
    %38 = arith.addf %32, %37 : vector<128x128xf32>
    %39 = vector.extract_strided_slice %2 {offsets = [2, 0, 0], sizes = [8, 16, 128], strides = [1, 1, 1]} : vector<10x18x128xbf16> to vector<8x16x128xbf16>
    %40 = vector.shape_cast %39 : vector<8x16x128xbf16> to vector<128x128xbf16>
    %c6 = arith.constant 6 : index
    %c0_24 = arith.constant 0 : index
    %c0_25 = arith.constant 0 : index
    %41 = vector.load %arg3[%c6, %c0_24, %c0_25] : memref<9x128x128xbf16, #tpu.memory_space<vmem>>, vector<1x128x128xbf16>
    %42 = vector.shape_cast %41 : vector<1x128x128xbf16> to vector<128x128xbf16>
    %cst_26 = arith.constant dense<0.000000e+00> : vector<128x128xf32>
    %43 = tpu.matmul %40, %42, %cst_26 {dimension_numbers = #tpu.dot_dimension_numbers<[1], [0], [0], [1], [0, 0, 1, 1], [], []>} : vector<128x128xbf16>, vector<128x128xbf16>, vector<128x128xf32> -> vector<128x128xf32>
    %44 = arith.addf %38, %43 : vector<128x128xf32>
    %45 = vector.extract_strided_slice %2 {offsets = [2, 1, 0], sizes = [8, 16, 128], strides = [1, 1, 1]} : vector<10x18x128xbf16> to vector<8x16x128xbf16>
    %46 = vector.shape_cast %45 : vector<8x16x128xbf16> to vector<128x128xbf16>
    %c7 = arith.constant 7 : index
    %c0_27 = arith.constant 0 : index
    %c0_28 = arith.constant 0 : index
    %47 = vector.load %arg3[%c7, %c0_27, %c0_28] : memref<9x128x128xbf16, #tpu.memory_space<vmem>>, vector<1x128x128xbf16>
    %48 = vector.shape_cast %47 : vector<1x128x128xbf16> to vector<128x128xbf16>
    %cst_29 = arith.constant dense<0.000000e+00> : vector<128x128xf32>
    %49 = tpu.matmul %46, %48, %cst_29 {dimension_numbers = #tpu.dot_dimension_numbers<[1], [0], [0], [1], [0, 0, 1, 1], [], []>} : vector<128x128xbf16>, vector<128x128xbf16>, vector<128x128xf32> -> vector<128x128xf32>
    %50 = arith.addf %44, %49 : vector<128x128xf32>
    %51 = vector.extract_strided_slice %2 {offsets = [2, 2, 0], sizes = [8, 16, 128], strides = [1, 1, 1]} : vector<10x18x128xbf16> to vector<8x16x128xbf16>
    %52 = vector.shape_cast %51 : vector<8x16x128xbf16> to vector<128x128xbf16>
    %c8 = arith.constant 8 : index
    %c0_30 = arith.constant 0 : index
    %c0_31 = arith.constant 0 : index
    %53 = vector.load %arg3[%c8, %c0_30, %c0_31] : memref<9x128x128xbf16, #tpu.memory_space<vmem>>, vector<1x128x128xbf16>
    %54 = vector.shape_cast %53 : vector<1x128x128xbf16> to vector<128x128xbf16>
    %cst_32 = arith.constant dense<0.000000e+00> : vector<128x128xf32>
    %55 = tpu.matmul %52, %54, %cst_32 {dimension_numbers = #tpu.dot_dimension_numbers<[1], [0], [0], [1], [0, 0, 1, 1], [], []>} : vector<128x128xbf16>, vector<128x128xbf16>, vector<128x128xf32> -> vector<128x128xf32>
    %56 = arith.addf %50, %55 : vector<128x128xf32>
    %c0_33 = arith.constant 0 : index
    %c0_34 = arith.constant 0 : index
    %57 = vector.load %arg4[%c0_33, %c0_34] : memref<1x128xf32, #tpu.memory_space<vmem>>, vector<1x128xf32>
    %58 = vector.broadcast %57 : vector<1x128xf32> to vector<128x128xf32>
    %59 = arith.addf %56, %58 : vector<128x128xf32>
    %c0_35 = arith.constant 0 : index
    %c0_36 = arith.constant 0 : index
    %c0_37 = arith.constant 0 : index
    %c0_38 = arith.constant 0 : index
    %60 = vector.load %arg5[%c0_35, %c0_36, %c0_37, %c0_38] : memref<1x8x16x128xbf16, #tpu.memory_space<vmem>>, vector<1x8x16x128xbf16>
    %61 = vector.shape_cast %60 : vector<1x8x16x128xbf16> to vector<8x16x128xbf16>
    %62 = vector.shape_cast %61 : vector<8x16x128xbf16> to vector<128x128xbf16>
    %63 = arith.extf %62 : vector<128x128xbf16> to vector<128x128xf32>
    %64 = arith.addf %59, %63 : vector<128x128xf32>
    %cst_39 = arith.constant 0.000000e+00 : f32
    %65 = vector.broadcast %cst_39 : f32 to vector<128x128xf32>
    %66 = arith.maximumf %64, %65 : vector<128x128xf32>
    %67 = vector.shape_cast %66 : vector<128x128xf32> to vector<8x16x128xf32>
    %c0_40 = arith.constant 0 : index
    %c0_41 = arith.constant 0 : index
    %c0_42 = arith.constant 0 : index
    %c0_43 = arith.constant 0 : index
    %68 = vector.load %arg6[%c0_40, %c0_41, %c0_42, %c0_43] : memref<1x8x16x128xf32, #tpu.memory_space<vmem>>, vector<1x8x16x128xf32>
    %69 = vector.shape_cast %68 : vector<1x8x16x128xf32> to vector<8x16x128xf32>
    %70 = vector.shape_cast %67 : vector<8x16x128xf32> to vector<1x8x16x128xf32>
    tpu.vector_store %arg6[%c0_40, %c0_41, %c0_42, %c0_43], %70 {strides = array<i32>} : memref<1x8x16x128xf32, #tpu.memory_space<vmem>>, vector<1x8x16x128xf32>,
    return
  }
  func.func @transform_0(%arg0: i32, %arg1: i32) -> (i32, i32, i32, i32, i32, i32) {
    %c0_i32 = arith.constant 0 : i32
    %c0_i32_0 = arith.constant 0 : i32
    %c0_i32_1 = arith.constant 0 : i32
    %c0_i32_2 = arith.constant 0 : i32
    %c0_i32_3 = arith.constant 0 : i32
    return %arg0, %arg1, %c0_i32, %c0_i32_0, %c0_i32_1, %c0_i32_2 : i32, i32, i32, i32, i32, i32
  }
  func.func @transform_1(%arg0: i32, %arg1: i32) -> (i32, i32, i32) {
    %c0_i32 = arith.constant 0 : i32
    %c0_i32_0 = arith.constant 0 : i32
    %c0_i32_1 = arith.constant 0 : i32
    %c0_i32_2 = arith.constant 0 : i32
    return %c0_i32, %c0_i32_0, %c0_i32_1 : i32, i32, i32
  }
  func.func @transform_2(%arg0: i32, %arg1: i32) -> (i32, i32) {
    %c0_i32 = arith.constant 0 : i32
    %c0_i32_0 = arith.constant 0 : i32
    %c0_i32_1 = arith.constant 0 : i32
    return %c0_i32, %c0_i32_0 : i32, i32
  }
  func.func @transform_3(%arg0: i32, %arg1: i32) -> (i32, i32, i32, i32) {
    %c0_i32 = arith.constant 0 : i32
    %c0_i32_0 = arith.constant 0 : i32
    %c0_i32_1 = arith.constant 0 : i32
    return %arg0, %arg1, %c0_i32, %c0_i32_0 : i32, i32, i32, i32
  }
  func.func @transform_4(%arg0: i32, %arg1: i32) -> (i32, i32, i32, i32) {
    %c0_i32 = arith.constant 0 : i32
    %c0_i32_0 = arith.constant 0 : i32
    %c0_i32_1 = arith.constant 0 : i32
    return %arg0, %arg1, %c0_i32, %c0_i32_0 : i32, i32, i32, i32
  }
}

</mosaic_0001>

<bundles_post_ra>
// kernel: basic_block_forward.2
= control target key start
LH: loop header
LB: loop body
LE: loop exit
PB: predicated region body
PF: predicated region fallthrough
CT: control target
= control target key end

     0   :  { %s2595_s12 = smov 0   ;;  %s2597_s13 = smov 0   ;;  %s3426_s0 = inlined_call_operand.vmem [shape: bf16[2,2,1,10,18,4], index: 0, kind: input, shape index: {}]   ;;  %s3427_s1 = inlined_call_operand.vmem [shape: bf16[9,4,128], index: 1, kind: input, shape index: {}]   ;;  %s3428_s2 = inlined_call_operand.vmem [shape: f32[1,128], index: 2, kind: input, shape index: {}]   ;;  %s3429_s3 = inlined_call_operand.vmem [shape: bf16[2,16,16,128], index: 3, kind: output, shape index: {}]  }
   0x1   :  { %s2599_s14 = smov 0   ;;  %s2601_s15 = smov 0  }
   0x2   :  { %s2603_s16 = smov 0  }
   0x3 LB: > { %s22_s17 = sadd.s32 1, %s2565_s14  ;;  %s25_s18 = sadd.s32 1, %s2569_s15  ;;  %s2573_s16 = sphi %s2603_s16, %s13_s16   ;;  %s2569_s15 = sphi %s2601_s15, %s3479_s15   ;;  %s2565_s14 = sphi %s2599_s14, %s3478_s14   ;;  %s2561_s13 = sphi %s2597_s13, %s3477_s13   ;;  %s2557_s12 = sphi %s2595_s12, %s3476_s12  }
   0x4   : > { %p23_p0 = scmp.ge.s32.totalorder %s22_s17, 2  ;;  %p2020_p1 = scmp.ge.s32.totalorder %s2573_s16, 1 }
   0x5   : > { %p157_p2 = scmp.lt.s32.totalorder %s2573_s16, 5 }
   0x6   : > { %s3481_s17 = smov (%p23_p0, %s22_s17), 0  ;;  %s3483_s18 = smov (!%p23_p0, %s25_s18), %s2569_s15 }
   0x7   : > { %p158_p3 = pnand %p2020_p1, %p157_p2  ;;  %p27_p4 = scmp.ge.s32.totalorder %s3483_s18, 2 }
   0x9   : > { %s3485_s18 = smov (%p27_p4, %s3483_s18), 0  ;;  %161 = sbr.rel (%p158_p3) target bundleno = 403 (0x193), region = 32 }
   0xe   : > { %v2026_v0 = vld [vmem:[%s3427_s1 + $0x2] sm:$0x3]  ;;  %vm488_vm0 = vcmask 1041408   ;;  %p190_p5 = scmp.lt.s32.totalorder %s2561_s13, 1  ;;  %p192_p6 = scmp.lt.s32.totalorder %s2557_s12, 1  ;;  %vm463_vm3 = vcmask 31744  }
   0xf   : > { %2474 = vmatprep.subr.msk.bf16.mxu1 %vm488_vm0, %v2026_v0  ;;  %2473 = vmatprep.subr.msk.bf16.mxu0 %vm488_vm0, %v2026_v0  ;;  %v490_v1 = vsel %vm488_vm0, %v2026_v0, 0  ;;  %v241_v2 = vld [vmem:[%s3427_s1] sm:$0x3]  ;;  %v2067_v3 = vld [vmem:[%s3427_s1 + $0x4] sm:$0x3]  ;;  %vm761_vm5 = vcmask 1042432  }
  0x10   : > { %2472 = vmatpush3.bf16.msra.mxu1 %v490_v1  ;;  %2310 = vmatpush3.bf16.msra.mxu0 %v490_v1  ;;  %s3487_s13 = smov (!%p190_p5, %s2561_s13), 1  ;;  %vm242_vm1 = vsmask.f32 3328  ;;  %vm243_vm2 = vsmask.f32 7440  ;;  %v2675_v15 = vsel %vm488_vm0, %v241_v2, 0 }
  0x11   : > { %s193_s25 = scalar_select %p192_p6, %s2557_s12, 1  ;;  %2475 = vmatprep.subr.msk.bf16.mxu1 %vm488_vm0, %v241_v2  ;;  %2476 = vmatprep.subr.msk.bf16.mxu0 %vm488_vm0, %v2067_v3  ;;  %vm2690_vm4 = vmor %vm242_vm1, %vm243_vm2  ;;  %v2695_v34 = vsel %vm488_vm0, %v2067_v3, 0  ;;  %vm762_vm6 = vcmask 1046532  }
  0x12   : > { %s2484_s26 = smul.u32 60, %s3487_s13  ;;  %vm2838_vm7 = vmor %vm761_vm5, %vm762_vm6 }
  0x13   : > { %s2483_s27 = smul.u32 30, %s193_s25  ;;  %s2022_s25 = sshll.u32 %s2557_s12, 3 }
  0x14   : > { %p202_p7 = scmp.lt.s32.totalorder %s2022_s25, 15 }
  0x15   : > { %s196_s28 = sadd.s32 %s2484_s26, %s2483_s27  ;;  %s2024_s26 = sshll.u32 %s3487_s13, 5 }
  0x16   : > { %s2021_s29 = sshll.u32 %s196_s28, 2  ;;  %s3489_s25 = smov (!%p202_p7, %s2022_s25), 15 }
  0x17   : > { %s2649_s5 = scalar_lea.vmem %s3426_s0, %s2021_s29  ;;  %s2023_s12 = sshll.u32 %s3489_s25, 1 }
  0x18   : > { %v2652_v4 = vld [vmem:[%s2649_s5] sm:$0xf]  ;;  %v2655_v5 = vld [vmem:[%s2649_s5 + $0x4] sm:$0xf]  ;;  %v2658_v6 = vld [vmem:[%s2649_s5 + $0x8] sm:$0x1]  ;;  %s3340_s13 = sadd.s32 %s2024_s26, %s2023_s12 }
  0x19   : > { %v246_v7 = vshrl.u32 %v2652_v4, 16  ;;  %v249_v8 = vshll.u32 %v2652_v4, 16  ;;  %v255_v9 = vshll.u32 %v2655_v5, 16  ;;  %v259_v10 = vshrl.u32 %v2655_v5, 16  ;;  %v2665_v11 = vld [vmem:[%s2649_s5 + $0x30] sm:$0xf] }
  0x1a   : > { %v265_v12 = vshll.u32 %v2658_v6, 16  ;;  %v2669_v13 = vld [vmem:[%s2649_s5 + $0x34] sm:$0xf]  ;;  %v2672_v14 = vld [vmem:[%s2649_s5 + $0x38] sm:$0x1]  ;;  %v342_v21 = vshrl.u32 %v2665_v11, 16 }
  0x1b   : > { %v248_v16 = vrot.slane %v246_v7, 4  ;;  %v251_v17 = vrot.slane %v249_v8, 5  ;;  %v257_v18 = vrot.slane %v255_v9, 5  ;;  %v261_v19 = vrot.slane %v259_v10, 4  ;;  %v2683_v28 = vld [vmem:[%s2649_s5 + $0xc] sm:$0xf] }
  0x1c   : > { %v267_v20 = vrot.slane %v265_v12, 5  ;;  %v345_v22 = vshll.u32 %v2665_v11, 16  ;;  %v351_v23 = vshll.u32 %v2669_v13, 16  ;;  %v355_v26 = vshrl.u32 %v2669_v13, 16  ;;  %v2686_v29 = vld [vmem:[%s2649_s5 + $0x10] sm:$0xf] }
  0x1d   : > { %v252_v24 = vor.u32 %v251_v17, %v248_v16  ;;  %v262_v25 = vor.u32 %v261_v19, %v257_v18  ;;  %v361_v27 = vshll.u32 %v2672_v14, 16  ;;  %v344_v31 = vrot.slane %v342_v21, 4  ;;  %v2698_v40 = vld [vmem:[%s2649_s5 + $0x14] sm:$0x1]  ;;  %v2709_v52 = vld [vmem:[%s2649_s5 + $0x3c] sm:$0xf] }
  0x1e   : > { %v347_v32 = vrot.slane %v345_v22, 5  ;;  %v353_v33 = vrot.slane %v351_v23, 5  ;;  %v357_v37 = vrot.slane %v355_v26, 4  ;;  %v270_v41 = vshrl.u32 %v2683_v28, 16  ;;  %v2713_v57 = vld [vmem:[%s2649_s5 + $0x40] sm:$0xf] }
  0x1f   : > { %v253_v35 = vrot.slane %v252_v24, 4  ;;  %v263_v36 = vrot.slane %v262_v25, 4  ;;  %v363_v38 = vrot.slane %v361_v27, 5  ;;  %v273_v42 = vshll.u32 %v2683_v28, 16  ;;  %v2721_v62 = vld [vmem:[%s2649_s5 + $0x44] sm:$0x1] }
  0x20   : > { %v348_v39 = vor.u32 %v347_v32, %v344_v31  ;;  %v279_v43 = vshll.u32 %v2686_v29, 16  ;;  %v358_v46 = vor.u32 %v357_v37, %v353_v33  ;;  %v283_v47 = vshrl.u32 %v2686_v29, 16  ;;  %v2727_v3 = vld [vmem:[%s2649_s5 + $0x18] sm:$0xf]  ;;  %v2736_v19 = vld [vmem:[%s2649_s5 + $0x1c] sm:$0xf] }
  0x21   : > { %v258_v44 = vsel %vm2690_vm4, %v253_v35, %v257_v18  ;;  %v268_v45 = vsel %vm2690_vm4, %v263_v36, %v267_v20  ;;  %v272_v50 = vrot.slane %v270_v41, 4  ;;  %v275_v51 = vrot.slane %v273_v42, 5  ;;  %v2743_v23 = vld [vmem:[%s2649_s5 + $0x20] sm:$0x1]  ;;  %v2750_v32 = vld [vmem:[%s2649_s5 + $0x48] sm:$0xf] }
  0x22   : > { %v2027_v48 = vcombine.low %v258_v44, %v268_v45  ;;  %v349_v49 = vrot.slane %v348_v39, 4  ;;  %v359_v53 = vrot.slane %v358_v46, 4  ;;  %v281_v54 = vrot.slane %v279_v43, 5  ;;  %v2763_v44 = vld [vmem:[%s2649_s5 + $0x4c] sm:$0xf]  ;;  %s2025_s29 = sshll.u32 %s3340_s13, 2 }
  0x23   : > { %v285_v55 = vrot.slane %v283_v47, 4  ;;  %v289_v56 = vshll.u32 %v2698_v40, 16  ;;  %v769_v58 = vrot.slane %v2658_v6, 5  ;;  %v276_v60 = vor.u32 %v275_v51, %v272_v50 }
  0x24   : > { %2311 = vmatprep.mubr.msk.bf16.mxu0 %vm463_vm3, %v2027_v48  ;;  %v354_v59 = vsel %vm2690_vm4, %v349_v49, %v353_v33  ;;  %v773_v61 = vrot.slane %v2686_v29, 5  ;;  %v364_v63 = vsel %vm2690_vm4, %v359_v53, %v363_v38  ;;  %v366_v2 = vshrl.u32 %v2709_v52, 16  ;;  %v2758_v38 = vld [vmem:[%s3427_s1 + $0x8] sm:$0x3] }
  0x25   : > { %v286_v0 = vor.u32 %v285_v55, %v281_v54  ;;  %v291_v1 = vrot.slane %v289_v56, 5  ;;  %v2729_v7 = vcombine.low %v354_v59, %v364_v63  ;;  %v277_v8 = vrot.slane %v276_v60, 4  ;;  %v2777_v63 = vld [vmem:[%s2649_s5 + $0x24] sm:$0xf] }
  0x26   : > { %v369_v9 = vshll.u32 %v2709_v52, 16  ;;  %v375_v10 = vshll.u32 %v2713_v57, 16  ;;  %v368_v16 = vrot.slane %v366_v2, 4  ;;  %v379_v17 = vshrl.u32 %v2713_v57, 16 }
  0x27   : > { %v287_v12 = vrot.slane %v286_v0, 4  ;;  %v385_v18 = vshll.u32 %v2721_v62, 16  ;;  %2319 = vmatprep.mubr.msk.bf16.mxu1 %vm463_vm3, %v2729_v7  ;;  %v282_v20 = vsel %vm2690_vm4, %v277_v8, %v281_v54  ;;  %v294_v24 = vshrl.u32 %v2727_v3, 16  ;;  %v2771_v54 = vld [vmem:[%s2649_s5 + $0x50] sm:$0x1] }
  0x28   : > { %v371_v21 = vrot.slane %v369_v9, 5  ;;  %v377_v22 = vrot.slane %v375_v10, 5  ;;  %v381_v26 = vrot.slane %v379_v17, 4  ;;  %v297_v31 = vshll.u32 %v2727_v3, 16  ;;  %v2785_v8 = vld [vmem:[%s2649_s5 + $0x28] sm:$0xf] }
  0x29   : > { %v292_v25 = vsel %vm2690_vm4, %v287_v12, %v291_v1  ;;  %v387_v27 = vrot.slane %v385_v18, 5  ;;  %v296_v36 = vrot.slane %v294_v24, 4  ;;  %v303_v37 = vshll.u32 %v2736_v19, 16  ;;  %v2793_v17 = vld [vmem:[%s3427_s1 + $0x6] sm:$0x3] }
  0x2a   : > { %v2752_v33 = vcombine.low %v282_v20, %v292_v25  ;;  %v372_v35 = vor.u32 %v371_v21, %v368_v16  ;;  %v382_v39 = vor.u32 %v381_v26, %v377_v22  ;;  %v299_v41 = vrot.slane %v297_v31, 5 }
  0x2b   : > { %v307_v42 = vshrl.u32 %v2736_v19, 16  ;;  %v313_v43 = vshll.u32 %v2743_v23, 16  ;;  %v305_v46 = vrot.slane %v303_v37, 5  ;;  %v390_v47 = vshrl.u32 %v2750_v32, 16 }
  0x2c   : > { %2312 = vmatmul.mubr.msk.bf16.vlgmr.msra.gmra.mxu0 %vm463_vm3, %v2752_v33  ;;  %v373_v45 = vrot.slane %v372_v35, 4  ;;  %v393_v48 = vshll.u32 %v2750_v32, 16  ;;  %v383_v49 = vrot.slane %v382_v39, 4  ;;  %v300_v50 = vor.u32 %v299_v41, %v296_v36  ;;  %v2806_v35 = vld [vmem:[%s2649_s5 + $0x54] sm:$0xf] }
  0x2d   : > { %2346 = vmatpush3.bf16.msra.mxu0 %v2695_v34  ;;  %v309_v51 = vrot.slane %v307_v42, 4  ;;  %v315_v53 = vrot.slane %v313_v43, 5  ;;  %v392_v56 = vrot.slane %v390_v47, 4  ;;  %v399_v60 = vshll.u32 %v2763_v44, 16  ;;  %v2813_v42 = vld [vmem:[%s2649_s5 + $0x58] sm:$0xf] }
  0x2e   : > { %v378_v55 = vsel %vm2690_vm4, %v373_v45, %v377_v22  ;;  %v395_v59 = vrot.slane %v393_v48, 5  ;;  %2478 = vmatprep.subr.msk.bf16.mxu0 %vm488_vm0, %v2758_v38  ;;  %v388_v34 = vsel %vm2690_vm4, %v383_v49, %v387_v27  ;;  %v301_v0 = vrot.slane %v300_v50, 4  ;;  %v2798_v22 = vld [vmem:[%s2649_s5 + $0x2c] sm:$0x1] }
  0x2f   : > { %v310_v1 = vor.u32 %v309_v51, %v305_v46  ;;  %v403_v2 = vshrl.u32 %v2763_v44, 16  ;;  %v2787_v9 = vcombine.low %v378_v55, %v388_v34  ;;  %v401_v12 = vrot.slane %v399_v60, 5 }
  0x30   : > { %v396_v10 = vor.u32 %v395_v59, %v392_v56  ;;  %v409_v16 = vshll.u32 %v2771_v54, 16  ;;  %v306_v18 = vsel %vm2690_vm4, %v301_v0, %v305_v46  ;;  %v318_v24 = vshrl.u32 %v2777_v63, 16 }
  0x31   : > { %v311_v20 = vrot.slane %v310_v1, 4  ;;  %v405_v21 = vrot.slane %v403_v2, 4  ;;  %2320 = vmatmul.mubr.msk.bf16.vlgmr.msra.gmra.mxu1 %vm463_vm3, %v2787_v9  ;;  %v321_v27 = vshll.u32 %v2777_v63, 16  ;;  %v327_v31 = vshll.u32 %v2785_v8, 16 }
  0x32   : > { %v397_v25 = vrot.slane %v396_v10, 4  ;;  %v411_v26 = vrot.slane %v409_v16, 5  ;;  %2328 = vmatpush3.bf16.msra.mxu1 %v2675_v15  ;;  %v320_v39 = vrot.slane %v318_v24, 4  ;;  %v331_v41 = vshrl.u32 %v2785_v8, 16  ;;  %v2136_v24 = vld [vmem:[%s3427_s1 + $0x10] sm:$0x3] }
  0x33   : > { %v316_v36 = vsel %vm2690_vm4, %v311_v20, %v315_v53  ;;  %v406_v37 = vor.u32 %v405_v21, %v401_v12  ;;  %v323_v46 = vrot.slane %v321_v27, 5  ;;  %v329_v47 = vrot.slane %v327_v31, 5  ;;  %2477 = vmatprep.subr.msk.bf16.mxu1 %vm488_vm0, %v2793_v17  ;;  %v2826_v53 = vld [vmem:[%s2649_s5 + $0x5c] sm:$0x1] }
  0x34   : > { %v2815_v43 = vcombine.low %v306_v18, %v316_v36  ;;  %v402_v45 = vsel %vm2690_vm4, %v397_v25, %v401_v12  ;;  %v333_v48 = vrot.slane %v331_v41, 4  ;;  %v337_v49 = vshll.u32 %v2798_v22, 16 }
  0x35   : > { %v407_v15 = vrot.slane %v406_v37, 4  ;;  %v414_v50 = vshrl.u32 %v2806_v35, 16  ;;  %v324_v51 = vor.u32 %v323_v46, %v320_v39  ;;  %v417_v55 = vshll.u32 %v2806_v35, 16 }
  0x36   : > { %2315 = vmatprep.mubr.msk.bf16.mxu0 %vm463_vm3, %v2815_v43  ;;  %v423_v56 = vshll.u32 %v2813_v42, 16  ;;  %v427_v59 = vshrl.u32 %v2813_v42, 16  ;;  %v334_v34 = vor.u32 %v333_v48, %v329_v47  ;;  %v339_v0 = vrot.slane %v337_v49, 5 }
  0x37   : > { %v412_v60 = vsel %vm2690_vm4, %v407_v15, %v411_v26  ;;  %v416_v1 = vrot.slane %v414_v50, 4  ;;  %v325_v10 = vrot.slane %v324_v51, 4  ;;  %v419_v12 = vrot.slane %v417_v55, 5 }
  0x38   : > { %v2833_v2 = vcombine.low %v402_v45, %v412_v60  ;;  %v425_v16 = vrot.slane %v423_v56, 5  ;;  %v335_v18 = vrot.slane %v334_v34, 4  ;;  %v429_v20 = vrot.slane %v427_v59, 4 }
  0x39   : > { %v433_v21 = vshll.u32 %v2826_v53, 16  ;;  %v2059_v25 = vrot.slane %v2652_v4, 9  ;;  %v776_v26 = vrot.slane %v2698_v40, 5  ;;  %v330_v27 = vsel %vm2690_vm4, %v325_v10, %v329_v47 }
  0x3a   : > { %2323 = vmatprep.mubr.msk.bf16.mxu1 %vm463_vm3, %v2833_v2  ;;  %v420_v31 = vor.u32 %v419_v12, %v416_v1  ;;  %v766_v36 = vrot.slane %v2655_v5, 5  ;;  %v340_v37 = vsel %vm2690_vm4, %v335_v18, %v339_v0  ;;  %v430_v39 = vor.u32 %v429_v20, %v425_v16 }
  0x3b   : > { %v435_v41 = vrot.slane %v433_v21, 5  ;;  %v2060_v45 = vrot.slane %v2683_v28, 9  ;;  %v2852_v46 = vcombine.low %v330_v27, %v340_v37  ;;  %v2043_v47 = vcombine.low %v2652_v4, %v2655_v5 }
  0x3c   : > { %v421_v15 = vrot.slane %v420_v31, 4  ;;  %v767_v40 = vsel %vm2838_vm7, %v2059_v25, %v766_v36  ;;  %v768_v48 = vrot.slane %v766_v36, 4  ;;  %v431_v49 = vrot.slane %v430_v39, 4 }
  0x3d   : > { %v774_v50 = vsel %vm2838_vm7, %v2060_v45, %v773_v61  ;;  %v775_v51 = vrot.slane %v773_v61, 4  ;;  %2316 = vmatmul.mubr.msk.bf16.gmra.mxu0 %vm463_vm3, %v2852_v46  ;;  %v2061_v4 = vrot.slane %v2727_v3, 9  ;;  %v780_v5 = vrot.slane %v2736_v19, 5 }
  0x3e   : > { %v426_v55 = vsel %vm2690_vm4, %v421_v15, %v425_v16  ;;  %v770_v56 = vsel %vm2838_vm7, %v768_v48, %v769_v58  ;;  %v436_v59 = vsel %vm2690_vm4, %v431_v49, %v435_v41  ;;  %v783_v34 = vrot.slane %v2743_v23, 5 }
  0x3f   : > { %v2068_v60 = vcombine.low %v767_v40, %v770_v56  ;;  %v777_v61 = vsel %vm2838_vm7, %v775_v51, %v776_v26  ;;  %v2879_v0 = vcombine.low %v426_v55, %v436_v59  ;;  %v781_v6 = vsel %vm2838_vm7, %v2061_v4, %v780_v5 }
  0x40   : > { %v782_v1 = vrot.slane %v780_v5, 4  ;;  %v797_v58 = vrot.slane %v2672_v14, 5  ;;  %v2062_v10 = vrot.slane %v2777_v63, 9  ;;  %v787_v12 = vrot.slane %v2785_v8, 5 }
  0x41   : > { %2347 = vmatprep.mubr.msk.bf16.mxu0 %vm463_vm3, %v2068_v60  ;;  %v790_v16 = vrot.slane %v2798_v22, 5  ;;  %2324 = vmatmul.mubr.msk.bf16.gmra.mxu1 %vm463_vm3, %v2879_v0  ;;  %v2890_v23 = vcombine.low %v774_v50, %v777_v61  ;;  %v2063_v20 = vrot.slane %v2665_v11, 9  ;;  %v794_v14 = vrot.slane %v2669_v13, 5 }
  0x42   : > { %v784_v18 = vsel %vm2838_vm7, %v782_v1, %v783_v34  ;;  %2329 = vmatprep.mubr.msk.bf16.mxu1 %vm463_vm3, %v2043_v47  ;;  %v789_v25 = vrot.slane %v787_v12, 4  ;;  %v1145_v22 = vsel %vm488_vm0, %v2758_v38, 0  ;;  %v2064_v27 = vrot.slane %v2709_v52, 9  ;;  %v2915_v38 = vld [vmem:[%s3427_s1 + $0xc] sm:$0x3] }
  0x43   : > { %v2897_v21 = vcombine.low %v781_v6, %v784_v18  ;;  %v796_v26 = vrot.slane %v794_v14, 4  ;;  %v801_v31 = vrot.slane %v2713_v57, 5  ;;  %v2905_v36 = vcombine.low %v2683_v28, %v2686_v29  ;;  %v2935_v47 = vld [vmem:[%s2649_s5 + $0x60] sm:$0xf] }
  0x44   : > { %v788_v37 = vsel %vm2838_vm7, %v2062_v10, %v787_v12  ;;  %v791_v39 = vsel %vm2838_vm7, %v789_v25, %v790_v16  ;;  %v804_v41 = vrot.slane %v2721_v62, 5  ;;  %v795_v28 = vsel %vm2838_vm7, %v2063_v20, %v794_v14  ;;  %v2988_v25 = vld [vmem:[%s2649_s5 + $0x6c] sm:$0xf] }
  0x45   : > { %2348 = vmatmul.mubr.msk.bf16.vlgmr.msra.gmra.mxu0 %vm463_vm3, %v2890_v23  ;;  %v798_v29 = vsel %vm2838_vm7, %v796_v26, %v797_v58  ;;  %v803_v45 = vrot.slane %v801_v31, 4  ;;  %v2065_v15 = vrot.slane %v2750_v32, 9  ;;  %v997_v62 = vsel %vm488_vm0, %v2793_v17, 0 }
  0x46   : > { %2382 = vmatpush3.bf16.msra.mxu0 %v1145_v22  ;;  %v2928_v40 = vcombine.low %v2727_v3, %v2736_v19  ;;  %2351 = vmatprep.mubr.msk.bf16.mxu0 %vm463_vm3, %v2897_v21  ;;  %v808_v48 = vrot.slane %v2763_v44, 5  ;;  %v811_v49 = vrot.slane %v2771_v54, 5  ;;  %v2939_v50 = vcombine.low %v2777_v63, %v2785_v8  ;;  %v2952_v19 = vld [vmem:[%s2649_s5 + $0x64] sm:$0xf]  ;;  %v237_v54 = vld [vmem:[%s2649_s5 + $0x68] sm:$0x1] }
  0x47   : > { %v2941_v51 = vcombine.low %v788_v37, %v791_v39  ;;  %v2945_v17 = vcombine.low %v2665_v11, %v2669_v13  ;;  %v802_v3 = vsel %vm2838_vm7, %v2064_v27, %v801_v31  ;;  %2480 = vmatprep.subr.msk.bf16.mxu0 %vm488_vm0, %v2915_v38  ;;  %v2955_v55 = vcombine.low %v795_v28, %v798_v29  ;;  %v2963_v11 = vld [vmem:[%s3427_s1 + $0xa] sm:$0x3]  ;;  %v2995_v31 = vld [vmem:[%s2649_s5 + $0x70] sm:$0xf]  ;;  %v240_v29 = vld [vmem:[%s2649_s5 + $0x74] sm:$0x1]  ;;  %s3364_s5 = scalar_lea.vmem %s3429_s3, %s2025_s29 }
  0x48   : > { %v805_v63 = vsel %vm2838_vm7, %v803_v45, %v804_v41  ;;  %v810_v8 = vrot.slane %v808_v48, 4  ;;  %v815_v56 = vrot.slane %v2813_v42, 5  ;;  %v809_v13 = vsel %vm2838_vm7, %v2065_v15, %v808_v48 }
  0x49   : > { %2330 = vmatmul.mubr.msk.bf16.vlgmr.msra.gmra.mxu1 %vm463_vm3, %v2905_v36  ;;  %v2066_v4 = vrot.slane %v2806_v35, 9  ;;  %v1113_v5 = vshrl.u32 %v2935_v47, 16  ;;  %v1116_v59 = vshll.u32 %v2935_v47, 16  ;;  %v1126_v61 = vshrl.u32 %v2952_v19, 16 }
  0x4a   : > { %2364 = vmatpush3.bf16.msra.mxu1 %v997_v62  ;;  %2333 = vmatprep.mubr.msk.bf16.mxu1 %vm463_vm3, %v2928_v40  ;;  %v812_v60 = vsel %vm2838_vm7, %v810_v8, %v811_v49  ;;  %v1122_v34 = vshll.u32 %v2952_v19, 16  ;;  %v1132_v6 = vshll.u32 %v237_v54, 16  ;;  %v2978_v1 = vcombine.low %v802_v3, %v805_v63 }
  0x4b   : > { %v818_v58 = vrot.slane %v2826_v53, 5  ;;  %2479 = vmatprep.subr.msk.bf16.mxu1 %vm488_vm0, %v2963_v11  ;;  %v1115_v10 = vrot.slane %v1113_v5, 4  ;;  %v1118_v12 = vrot.slane %v1116_v59, 5  ;;  %v2983_v16 = vcombine.low %v809_v13, %v812_v60 }
  0x4c   : > { %v817_v18 = vrot.slane %v815_v56, 4  ;;  %v1124_v20 = vrot.slane %v1122_v34, 5  ;;  %v1128_v14 = vrot.slane %v1126_v61, 4  ;;  %v2104_v53 = vrot.slane %v2935_v47, 9 }
  0x4d   : > { %2352 = vmatmul.mubr.msk.bf16.gmra.mxu0 %vm463_vm3, %v2941_v51  ;;  %v1119_v22 = vor.u32 %v1118_v12, %v1115_v10  ;;  %v1263_v26 = vrot.slane %v2952_v19, 5  ;;  %v1266_v27 = vrot.slane %v237_v54, 5  ;;  %v1134_v39 = vrot.slane %v1132_v6, 5 }
  0x4e   : > { %2355 = vmatprep.mubr.msk.bf16.mxu0 %vm463_vm3, %v2955_v55  ;;  %v1129_v37 = vor.u32 %v1128_v14, %v1124_v20  ;;  %v1519_v41 = vshrl.u32 %v2988_v25, 16  ;;  %v1522_v28 = vshll.u32 %v2988_v25, 16  ;;  %v1532_v48 = vshrl.u32 %v2995_v31, 16 }
  0x4f   : > { %v1120_v45 = vrot.slane %v1119_v22, 4  ;;  %v1264_v15 = vsel %vm2838_vm7, %v2104_v53, %v1263_v26  ;;  %v1265_v62 = vrot.slane %v1263_v26, 4  ;;  %v1528_v63 = vshll.u32 %v2995_v31, 16 }
  0x50   : > { %v1130_v49 = vrot.slane %v1129_v37, 4  ;;  %v1521_v3 = vrot.slane %v1519_v41, 4  ;;  %v1524_v54 = vrot.slane %v1522_v28, 5  ;;  %v1534_v5 = vrot.slane %v1532_v48, 4 }
  0x51   : > { %2334 = vmatmul.mubr.msk.bf16.gmra.mxu1 %vm463_vm3, %v2939_v50  ;;  %v1125_v8 = vsel %vm2690_vm4, %v1120_v45, %v1124_v20  ;;  %v1267_v13 = vsel %vm2838_vm7, %v1265_v62, %v1266_v27  ;;  %v1538_v59 = vshll.u32 %v240_v29, 16  ;;  %v1530_v6 = vrot.slane %v1528_v63, 5 }
  0x52   : > { %2337 = vmatprep.mubr.msk.bf16.mxu1 %vm463_vm3, %v2945_v17  ;;  %v1135_v60 = vsel %vm2690_vm4, %v1130_v49, %v1134_v39  ;;  %v3016_v61 = vcombine.low %v1264_v15, %v1267_v13  ;;  %v1525_v34 = vor.u32 %v1524_v54, %v1521_v3  ;;  %v2135_v12 = vrot.slane %v2988_v25, 9 }
  0x53   : > { %v3018_v10 = vcombine.low %v1125_v8, %v1135_v60  ;;  %v1669_v20 = vrot.slane %v2995_v31, 5  ;;  %v1535_v22 = vor.u32 %v1534_v5, %v1530_v6  ;;  %v1540_v53 = vrot.slane %v1538_v59, 5 }
  0x54   : > { %v1526_v14 = vrot.slane %v1525_v34, 4  ;;  %v1672_v26 = vrot.slane %v240_v29, 5  ;;  %v2048_v27 = vcombine.low %v2709_v52, %v2713_v57  ;;  %v2049_v37 = vcombine.low %v2750_v32, %v2763_v44 }
  0x55   : > { %2356 = vmatmul.mubr.msk.bf16.gmra.mxu0 %vm463_vm3, %v2978_v1  ;;  %v3030_v39 = vsel %vm2838_vm7, %v2135_v12, %v1669_v20  ;;  %v1671_v41 = vrot.slane %v1669_v20, 4  ;;  %v816_v52 = vsel %vm2838_vm7, %v2066_v4, %v815_v56  ;;  %v819_v57 = vsel %vm2838_vm7, %v817_v18, %v818_v58 }
  0x56   : > { %2359 = vmatprep.mubr.msk.bf16.mxu0 %vm463_vm3, %v2983_v16  ;;  %v1531_v32 = vsel %vm2690_vm4, %v1526_v14, %v1530_v6  ;;  %v1536_v44 = vrot.slane %v1535_v22, 4  ;;  %v2075_v56 = vcombine.low %v816_v52, %v819_v57  ;;  %v2050_v58 = vcombine.low %v2806_v35, %v2813_v42  ;;  %v2125_v35 = vld [vmem:[%s3427_s1 + $0xe] sm:$0x3] }
  0x57   : > { %v3046_v28 = vsel %vm2838_vm7, %v1671_v41, %v1672_v26  ;;  %v1403_v30 = vsel %vm488_vm0, %v2915_v38, 0  ;;  %v2085_v42 = vcombine.low %v2935_v47, %v2952_v19  ;;  %v1551_v38 = vsel %vm488_vm0, %v2125_v35, 0 }
  0x58   : > { %v1541_v29 = vsel %vm2690_vm4, %v1536_v44, %v1540_v53  ;;  %v2137_v45 = vcombine.low %v3030_v39, %v3046_v28 }
  0x59   : > { %2338 = vmatmul.mubr.msk.bf16.gmra.mxu1 %vm463_vm3, %v2048_v27  ;;  %v3053_v4 = vcombine.low %v1531_v32, %v1541_v29 }
  0x5a   : > { %2341 = vmatprep.mubr.msk.bf16.mxu1 %vm463_vm3, %v2049_v37 }
  0x5d   : > { %2360 = vmatmul.mubr.msk.bf16.gmra.mxu0 %vm463_vm3, %v2075_v56 }
  0x5e   : > { %2383 = vmatprep.mubr.msk.bf16.mxu0 %vm463_vm3, %v2752_v33  ;;  %v1277_v33 = vsel %vm488_vm0, %v2963_v11, 0 }
  0x61   : > { %2342 = vmatmul.mubr.msk.bf16.gmra.mxu1 %vm463_vm3, %v2050_v58 }
  0x62   : > { %2365 = vmatprep.mubr.msk.bf16.mxu1 %vm463_vm3, %v2905_v36  ;;  %v1683_v36 = vsel %vm488_vm0, %v2136_v24, 0 }
  0x65   : > { %2384 = vmatmul.mubr.msk.bf16.vlgmr.msra.gmra.mxu0 %vm463_vm3, %v2815_v43 }
  0x66   : > { %2418 = vmatpush3.bf16.msra.mxu0 %v1403_v30  ;;  %2387 = vmatprep.mubr.msk.bf16.mxu0 %vm463_vm3, %v2852_v46 }
  0x67   : > { %2482 = vmatprep.subr.msk.bf16.mxu0 %vm488_vm0, %v2136_v24 }
  0x69   : > { %2366 = vmatmul.mubr.msk.bf16.vlgmr.msra.gmra.mxu1 %vm463_vm3, %v2928_v40 }
  0x6a   : > { %2400 = vmatpush3.bf16.msra.mxu1 %v1277_v33  ;;  %2369 = vmatprep.mubr.msk.bf16.mxu1 %vm463_vm3, %v2939_v50 }
  0x6b   : > { %2481 = vmatprep.subr.msk.bf16.mxu1 %vm488_vm0, %v2125_v35 }
  0x6d   : > { %2388 = vmatmul.mubr.msk.bf16.gmra.mxu0 %vm463_vm3, %v2729_v7 }
  0x6e   : > { %2391 = vmatprep.mubr.msk.bf16.mxu0 %vm463_vm3, %v2787_v9 }
  0x71   : > { %2370 = vmatmul.mubr.msk.bf16.gmra.mxu1 %vm463_vm3, %v2945_v17 }
  0x72   : > { %2373 = vmatprep.mubr.msk.bf16.mxu1 %vm463_vm3, %v2048_v27 }
  0x75   : > { %2392 = vmatmul.mubr.msk.bf16.gmra.mxu0 %vm463_vm3, %v2833_v2 }
  0x76   : > { %2395 = vmatprep.mubr.msk.bf16.mxu0 %vm463_vm3, %v2879_v0 }
  0x79   : > { %2374 = vmatmul.mubr.msk.bf16.gmra.mxu1 %vm463_vm3, %v2049_v37 }
  0x7a   : > { %2377 = vmatprep.mubr.msk.bf16.mxu1 %vm463_vm3, %v2050_v58 }
  0x7d   : > { %2396 = vmatmul.mubr.msk.bf16.gmra.mxu0 %vm463_vm3, %v3018_v10 }
  0x7e   : > { %2419 = vmatprep.mubr.msk.bf16.mxu0 %vm463_vm3, %v2928_v40 }
  0x81   : > { %2378 = vmatmul.mubr.msk.bf16.gmra.mxu1 %vm463_vm3, %v2085_v42 }
  0x82   : > { %2401 = vmatprep.mubr.msk.bf16.mxu1 %vm463_vm3, %v2890_v23  ;;  %v2116_v23 = vcombine.low %v2988_v25, %v2995_v31 }
  0x85   : > { %2420 = vmatmul.mubr.msk.bf16.vlgmr.msra.gmra.mxu0 %vm463_vm3, %v2939_v50 }
  0x86   : > { %2454 = vmatpush3.bf16.msra.mxu0 %v1683_v36  ;;  %2423 = vmatprep.mubr.msk.bf16.mxu0 %vm463_vm3, %v2945_v17 }
  0x89   : > { %2402 = vmatmul.mubr.msk.bf16.vlgmr.msra.gmra.mxu1 %vm463_vm3, %v2897_v21 }
  0x8a   : > { %2436 = vmatpush3.bf16.msra.mxu1 %v1551_v38  ;;  %2405 = vmatprep.mubr.msk.bf16.mxu1 %vm463_vm3, %v2941_v51 }
  0x8d   : > { %2424 = vmatmul.mubr.msk.bf16.gmra.mxu0 %vm463_vm3, %v2048_v27 }
  0x8e   : > { %2427 = vmatprep.mubr.msk.bf16.mxu0 %vm463_vm3, %v2049_v37 }
  0x91   : > { %2406 = vmatmul.mubr.msk.bf16.gmra.mxu1 %vm463_vm3, %v2955_v55 }
  0x92   : > { %2409 = vmatprep.mubr.msk.bf16.mxu1 %vm463_vm3, %v2978_v1 }
  0x95   : > { %2428 = vmatmul.mubr.msk.bf16.gmra.mxu0 %vm463_vm3, %v2050_v58 }
  0x96   : > { %2431 = vmatprep.mubr.msk.bf16.mxu0 %vm463_vm3, %v2085_v42 }
  0x99   : > { %2410 = vmatmul.mubr.msk.bf16.gmra.mxu1 %vm463_vm3, %v2983_v16 }
  0x9a   : > { %2413 = vmatprep.mubr.msk.bf16.mxu1 %vm463_vm3, %v2075_v56 }
  0x9d   : > { %2432 = vmatmul.mubr.msk.bf16.gmra.mxu0 %vm463_vm3, %v2116_v23 }
  0x9e   : > { %2455 = vmatprep.mubr.msk.bf16.mxu0 %vm463_vm3, %v2897_v21 }
  0xa1   : > { %2414 = vmatmul.mubr.msk.bf16.gmra.mxu1 %vm463_vm3, %v3016_v61 }
  0xa2   : > { %2437 = vmatprep.mubr.msk.bf16.mxu1 %vm463_vm3, %v2815_v43 }
  0xa5   : > { %2456 = vmatmul.mubr.msk.bf16.vlgmr.msra.gmra.mxu0 %vm463_vm3, %v2941_v51 }
  0xa6   : > { %2459 = vmatprep.mubr.msk.bf16.mxu0 %vm463_vm3, %v2955_v55 }
  0xa9   : > { %2438 = vmatmul.mubr.msk.bf16.vlgmr.msra.gmra.mxu1 %vm463_vm3, %v2852_v46 }
  0xaa   : > { %2441 = vmatprep.mubr.msk.bf16.mxu1 %vm463_vm3, %v2729_v7 }
  0xad   : > { %2460 = vmatmul.mubr.msk.bf16.gmra.mxu0 %vm463_vm3, %v2978_v1 }
  0xae   : > { %2463 = vmatprep.mubr.msk.bf16.mxu0 %vm463_vm3, %v2983_v16 }
  0xb1   : > { %2442 = vmatmul.mubr.msk.bf16.gmra.mxu1 %vm463_vm3, %v2787_v9 }
  0xb2   : > { %2445 = vmatprep.mubr.msk.bf16.mxu1 %vm463_vm3, %v2833_v2 }
  0xb5   : > { %2464 = vmatmul.mubr.msk.bf16.gmra.mxu0 %vm463_vm3, %v2075_v56 }
  0xb6   : > { %2467 = vmatprep.mubr.msk.bf16.mxu0 %vm463_vm3, %v3016_v61 }
  0xb9   : > { %2446 = vmatmul.mubr.msk.bf16.gmra.mxu1 %vm463_vm3, %v2879_v0 }
  0xba   : > { %2449 = vmatprep.mubr.msk.bf16.mxu1 %vm463_vm3, %v3018_v10 }
  0xbd   : > { %2468 = vmatmul.mubr.msk.bf16.gmra.mxu0 %vm463_vm3, %v2137_v45 }
  0xc1   : > { %2450 = vmatmul.mubr.msk.bf16.gmra.mxu1 %vm463_vm3, %v3053_v4 }
  0xec   : > { %v2313_v7 = vpop.f32.mrf.mxu0 }
  0xee   : > { %v526_v43 = vpop.f32.mrf.mxu0 }
  0xf0   : > { %v2314_v46 = vpop.f32.mrf.mxu0 }
  0xf1   : > { %v2321_v9 = vpop.f32.mrf.mxu1 }
  0xf2   : > { %v529_v40 = vpop.f32.mrf.mxu0 }
  0xf3   : > { %v558_v2 = vpop.f32.mrf.mxu1 }
  0xf5   : > { %v2322_v21 = vpop.f32.mrf.mxu1 }
  0xf7   : > { %v561_v47 = vpop.f32.mrf.mxu1 }
  0xfd   : > { %v2317_v0 = vpop.f32.mrf.mxu0 }
  0xff   : > { %v542_v50 = vpop.f32.mrf.mxu0 }
 0x101   : > { %v2325_v51 = vpop.f32.mrf.mxu1  ;;  %v2318_v17 = vpop.f32.mrf.mxu0 }
 0x103   : > { %v574_v19 = vpop.f32.mrf.mxu1  ;;  %v545_v55 = vpop.f32.mrf.mxu0 }
 0x105   : > { %v2326_v11 = vpop.f32.mrf.mxu1  ;;  %v2349_v1 = vpop.f32.mrf.mxu0 }
 0x107   : > { %v3165_v16 = vpop.f32.mrf.mxu1  ;;  %v907_v18 = vpop.f32.mrf.mxu0 }
 0x109   : > { %v2331_v25 = vpop.f32.mrf.mxu1  ;;  %v2350_v31 = vpop.f32.mrf.mxu0 }
 0x10a   : > { %v699_v15 = vadd.f32 %v2331_v25, %v2313_v7 }
 0x10b   : > { %v690_v62 = vpop.f32.mrf.mxu1  ;;  %v910_v48 = vpop.f32.mrf.mxu0 }
 0x10c   : > { %v3167_v49 = vadd.f32 %v2349_v1, %v699_v15  ;;  %v691_v3 = vadd.f32 %v690_v62, %v526_v43 }
 0x10d   : > { %v2332_v54 = vpop.f32.mrf.mxu1  ;;  %v2353_v63 = vpop.f32.mrf.mxu0 }
 0x10e   : > { %v3169_v8 = vadd.f32 %v907_v18, %v691_v3  ;;  %v702_v13 = vadd.f32 %v2332_v54, %v2314_v46 }
 0x10f   : > { %v693_v5 = vpop.f32.mrf.mxu1  ;;  %v923_v59 = vpop.f32.mrf.mxu0 }
 0x110   : > { %v3171_v60 = vadd.f32 %v2350_v31, %v702_v13  ;;  %v694_v61 = vadd.f32 %v693_v5, %v529_v40 }
 0x111   : > { %v2335_v34 = vpop.f32.mrf.mxu1  ;;  %v2354_v6 = vpop.f32.mrf.mxu0 }
 0x112   : > { %v3173_v10 = vadd.f32 %v910_v48, %v694_v61  ;;  %v715_v12 = vadd.f32 %v2335_v34, %v2317_v0 }
 0x113   : > { %v706_v20 = vpop.f32.mrf.mxu1  ;;  %v926_v14 = vpop.f32.mrf.mxu0 }
 0x114   : > { %v3175_v22 = vadd.f32 %v2353_v63, %v715_v12  ;;  %v707_v53 = vadd.f32 %v706_v20, %v542_v50 }
 0x115   : > { %v2336_v26 = vpop.f32.mrf.mxu1  ;;  %v2357_v27 = vpop.f32.mrf.mxu0 }
 0x116   : > { %v3177_v37 = vadd.f32 %v923_v59, %v707_v53  ;;  %v718_v39 = vadd.f32 %v2336_v26, %v2318_v17 }
 0x117   : > { %v709_v41 = vpop.f32.mrf.mxu1  ;;  %v939_v52 = vpop.f32.mrf.mxu0 }
 0x118   : > { %v3179_v57 = vadd.f32 %v2354_v6, %v718_v39  ;;  %v710_v32 = vadd.f32 %v709_v41, %v545_v55 }
 0x119   : > { %v2339_v44 = vpop.f32.mrf.mxu1  ;;  %v2358_v28 = vpop.f32.mrf.mxu0 }
 0x11a   : > { %v3181_v29 = vadd.f32 %v926_v14, %v710_v32  ;;  %v731_v45 = vadd.f32 %v2339_v44, %v2321_v9 }
 0x11b   : > { %v722_v56 = vpop.f32.mrf.mxu1  ;;  %v942_v4 = vpop.f32.mrf.mxu0 }
 0x11c   : > { %v3183_v58 = vadd.f32 %v2357_v27, %v731_v45  ;;  %v723_v30 = vadd.f32 %v722_v56, %v558_v2 }
 0x11d   : > { %v2340_v24 = vpop.f32.mrf.mxu1  ;;  %v2361_v33 = vpop.f32.mrf.mxu0 }
 0x11e   : > { %v3185_v35 = vadd.f32 %v939_v52, %v723_v30  ;;  %v734_v42 = vadd.f32 %v2340_v24, %v2322_v21 }
 0x11f   : > { %v725_v36 = vpop.f32.mrf.mxu1  ;;  %v955_v38 = vpop.f32.mrf.mxu0 }
 0x120   : > { %v3187_v23 = vadd.f32 %v2358_v28, %v734_v42  ;;  %v726_v7 = vadd.f32 %v725_v36, %v561_v47 }
 0x121   : > { %v2343_v43 = vpop.f32.mrf.mxu1  ;;  %v2362_v46 = vpop.f32.mrf.mxu0 }
 0x122   : > { %v3189_v40 = vadd.f32 %v942_v4, %v726_v7  ;;  %v747_v9 = vadd.f32 %v2343_v43, %v2325_v51 }
 0x123   : > { %v738_v0 = vpop.f32.mrf.mxu1  ;;  %v958_v50 = vpop.f32.mrf.mxu0 }
 0x124   : > { %v3191_v17 = vadd.f32 %v2361_v33, %v747_v9  ;;  %v739_v2 = vadd.f32 %v738_v0, %v574_v19 }
 0x125   : > { %v2344_v55 = vpop.f32.mrf.mxu1  ;;  %v3193_v1 = vpop.f32.mrf.mxu0 }
 0x126   : > { %v3195_v18 = vadd.f32 %v955_v38, %v739_v2  ;;  %v750_v21 = vadd.f32 %v2344_v55, %v2326_v11 }
 0x127   : > { %v741_v25 = vpop.f32.mrf.mxu1  ;;  %v3197_v31 = vpop.f32.mrf.mxu0 }
 0x128   : > { %3434 = vst [vmem:[#allocation2_spill] sm:$0xff] %v3195_v18  ;;  %v3199_v47 = vadd.f32 %v2362_v46, %v750_v21  ;;  %v742_v15 = vadd.f32 %v741_v25, %v3165_v16 }
 0x129   : > { %v2367_v62 = vpop.f32.mrf.mxu1  ;;  %v3202_v51 = vpop.f32.mrf.mxu0 }
 0x12a   : > { %3435 = vst [vmem:[#allocation3_spill] sm:$0xff] %v3199_v47  ;;  %v3204_v48 = vadd.f32 %v958_v50, %v742_v15 }
 0x12b   : > { %v1033_v3 = vpop.f32.mrf.mxu1  ;;  %v3206_v19 = vpop.f32.mrf.mxu0 }
 0x12c   : > { %3436 = vst [vmem:[#allocation4_spill] sm:$0xff] %v3204_v48 }
 0x12d   : > { %v2368_v54 = vpop.f32.mrf.mxu1  ;;  %v3208_v63 = vpop.f32.mrf.mxu0 }
 0x12f   : > { %v1036_v13 = vpop.f32.mrf.mxu1  ;;  %v3210_v11 = vpop.f32.mrf.mxu0 }
 0x131   : > { %v3212_v5 = vpop.f32.mrf.mxu1  ;;  %v3214_v59 = vpop.f32.mrf.mxu0 }
 0x133   : > { %v3216_v61 = vpop.f32.mrf.mxu1  ;;  %v3218_v16 = vpop.f32.mrf.mxu0 }
 0x135   : > { %v3220_v34 = vpop.f32.mrf.mxu1  ;;  %v3222_v6 = vpop.f32.mrf.mxu0 }
 0x137   : > { %v3224_v12 = vpop.f32.mrf.mxu1  ;;  %v3226_v20 = vpop.f32.mrf.mxu0 }
 0x139   : > { %v3228_v14 = vpop.f32.mrf.mxu1  ;;  %v3230_v53 = vpop.f32.mrf.mxu0 }
 0x13b   : > { %v3232_v26 = vpop.f32.mrf.mxu1  ;;  %v3234_v27 = vpop.f32.mrf.mxu0 }
 0x13c   : > { %3437 = vst [vmem:[#allocation5_spill] sm:$0xff] %v3234_v27 }
 0x13d   : > { %v3236_v39 = vpop.f32.mrf.mxu1  ;;  %v3238_v41 = vpop.f32.mrf.mxu0 }
 0x13e   : > { %3438 = vst [vmem:[#allocation6_spill] sm:$0xff] %v3238_v41 }
 0x13f   : > { %v3240_v52 = vpop.f32.mrf.mxu1  ;;  %v3242_v32 = vpop.f32.mrf.mxu0 }
 0x140   : > { %3439 = vst [vmem:[#allocation7_spill] sm:$0xff] %v3242_v32 }
 0x141   : > { %v3244_v44 = vpop.f32.mrf.mxu1  ;;  %v3246_v28 = vpop.f32.mrf.mxu0 }
 0x142   : > { %3440 = vst [vmem:[#allocation8_spill] sm:$0xff] %v3246_v28 }
 0x143   : > { %v3248_v45 = vpop.f32.mrf.mxu1  ;;  %v3250_v56 = vpop.f32.mrf.mxu0 }
 0x144   : > { %3441 = vst [vmem:[#allocation9_spill] sm:$0xff] %v3248_v45  ;;  %3442 = vst [vmem:[#allocation10_spill] sm:$0xff] %v3250_v56  ;;  %v1098_v45 = vadd.f32 %v2367_v62, %v3167_v49  ;;  %v1097_v62 = vadd.f32 %v1036_v13, %v3173_v10 }
 0x145   : > { %v3252_v4 = vpop.f32.mrf.mxu1  ;;  %v2421_v30 = vpop.f32.mrf.mxu0 }
 0x146   : > { %3443 = vst [vmem:[#allocation11_spill] sm:$0xff] %v3252_v4 }
 0x147   : > { %v3254_v24 = vpop.f32.mrf.mxu1  ;;  %v1439_v33 = vpop.f32.mrf.mxu0 }
 0x148   : > { %3444 = vst [vmem:[#allocation12_spill] sm:$0xff] %v3254_v24 }
 0x149   : > { %v2403_v42 = vpop.f32.mrf.mxu1  ;;  %v2422_v36 = vpop.f32.mrf.mxu0 }
 0x14b   : > { %v1313_v38 = vpop.f32.mrf.mxu1  ;;  %v3256_v7 = vpop.f32.mrf.mxu0 }
 0x14d   : > { %v2404_v43 = vpop.f32.mrf.mxu1  ;;  %v3258_v46 = vpop.f32.mrf.mxu0 }
 0x14f   : > { %v1316_v9 = vpop.f32.mrf.mxu1  ;;  %v3260_v0 = vpop.f32.mrf.mxu0 }
 0x151   : > { %v2407_v50 = vpop.f32.mrf.mxu1  ;;  %v3262_v2 = vpop.f32.mrf.mxu0 }
 0x153   : > { %v1329_v55 = vpop.f32.mrf.mxu1  ;;  %v3264_v21 = vpop.f32.mrf.mxu0 }
 0x154   : > { %3445 = vst [vmem:[#allocation13_spill] sm:$0xff] %v3264_v21 }
 0x155   : > { %v3266_v25 = vpop.f32.mrf.mxu1  ;;  %v3268_v15 = vpop.f32.mrf.mxu0 }
 0x156   : > { %3446 = vst [vmem:[#allocation14_spill] sm:$0xff] %v3268_v15 }
 0x157   : > { %v3270_v56 = vpop.f32.mrf.mxu1  ;;  %v3272_v28 = vpop.f32.mrf.mxu0 }
 0x158   : > { %3447 = vst [vmem:[#allocation15_spill] sm:$0xff] %v3272_v28  ;;  %v1096_v28 = vadd.f32 %v1033_v3, %v3169_v8 }
 0x159   : > { %v3274_v32 = vpop.f32.mrf.mxu1  ;;  %v3276_v24 = vpop.f32.mrf.mxu0 }
 0x15a   : > { %3448 = vst [vmem:[#allocation16_spill] sm:$0xff] %v3276_v24  ;;  %v1246_v24 = vadd.f32 %v3193_v1, %v1098_v45  ;;  %v1244_v49 = vadd.f32 %v3197_v31, %v1096_v28  ;;  %v1102_v1 = vadd.f32 %v3212_v5, %v3175_v22  ;;  %v1245_v31 = vadd.f32 %v3206_v19, %v1097_v62 }
 0x15b   : > { %v3278_v48 = vpop.f32.mrf.mxu1  ;;  %v3280_v4 = vpop.f32.mrf.mxu0  ;;  %v1101_v19 = vadd.f32 %v3224_v12, %v3181_v29 }
 0x15c   : > { %3449 = vst [vmem:[#allocation17_spill] sm:$0xff] %v3280_v4  ;;  %v1099_v4 = vadd.f32 %v2368_v54, %v3171_v60  ;;  %v1376_v45 = vadd.f32 %v1313_v38, %v1244_v49  ;;  %v1100_v60 = vadd.f32 %v3216_v61, %v3177_v37  ;;  %v1377_v5 = vadd.f32 %v1316_v9, %v1245_v31 }
 0x15d   : > { %v3282_v47 = vpop.f32.mrf.mxu1  ;;  %v3284_v41 = vpop.f32.mrf.mxu0  ;;  %v1103_v61 = vadd.f32 %v3220_v34, %v3179_v57  ;;  %v3332_v57 = vld [vmem:[%s3428_s2] ss:$0 sm:$0xff]  ;;  %v1249_v9 = vadd.f32 %v3218_v16, %v1101_v19  ;;  %v3456_v19 = vld [vmem:[#allocation5_spill] sm:$0xff] }
 0x15e   : > { %3450 = vst [vmem:[#allocation18_spill] sm:$0xff] %v3282_v47  ;;  %3451 = vst [vmem:[#allocation19_spill] sm:$0xff] %v3284_v41  ;;  %v1502_v22 = vadd.f32 %v1439_v33, %v1376_v45  ;;  %v1248_v37 = vadd.f32 %v3210_v11, %v1100_v60  ;;  %v1104_v11 = vadd.f32 %v3232_v26, %v3185_v35 }
 0x15f   : > { %v3287_v18 = vpop.f32.mrf.mxu1  ;;  %v3289_v15 = vpop.f32.mrf.mxu0  ;;  %v1107_v35 = vadd.f32 %v3236_v39, %v3187_v23 }
 0x160   : > { %3452 = vst [vmem:[#allocation20_spill] sm:$0xff] %v3289_v15  ;;  %v1378_v15 = vadd.f32 %v2403_v42, %v1246_v24  ;;  %v1380_v33 = vadd.f32 %v1329_v55, %v1248_v37 }
 0x161   : > { %v3292_v27 = vpop.f32.mrf.mxu1  ;;  %v3294_v21 = vpop.f32.mrf.mxu0  ;;  %v1255_v31 = vadd.f32 %v3230_v53, %v1107_v35  ;;  %v3465_v35 = vld [vmem:[#allocation12_spill] sm:$0xff] }
 0x162   : > { %3453 = vst [vmem:[#allocation21_spill] sm:$0xff] %v3294_v21  ;;  %v1247_v21 = vadd.f32 %v3202_v51, %v1099_v4  ;;  %v1504_v10 = vadd.f32 %v2421_v30, %v1378_v15  ;;  %v1250_v51 = vadd.f32 %v3208_v63, %v1102_v1  ;;  %v1106_v30 = vadd.f32 %v3228_v14, %v3183_v58 }
 0x163   : > { %v3299_v47 = vpop.f32.mrf.mxu1  ;;  %v3301_v41 = vpop.f32.mrf.mxu0  ;;  %v1503_v58 = vadd.f32 %v3256_v7, %v1377_v5  ;;  %v1506_v16 = vadd.f32 %v3260_v0, %v1380_v33  ;;  %v1110_v0 = vadd.f32 %v3244_v44, %v3191_v17  ;;  %v3455_v5 = vld [vmem:[#allocation13_spill] sm:$0xff] }
 0x164   : > { %3454 = vst [vmem:[#allocation22_spill] sm:$0xff] %v3301_v41  ;;  %v1379_v13 = vadd.f32 %v2404_v43, %v1247_v21  ;;  %v1382_v21 = vadd.f32 %v2407_v50, %v1250_v51  ;;  %v1254_v50 = vadd.f32 %v3222_v6, %v1106_v30 }
 0x165   : > { %v3305_v8 = vpop.f32.mrf.mxu1  ;;  %v2457_v3 = vpop.f32.mrf.mxu0 }
 0x166   : > { %v1505_v43 = vadd.f32 %v2422_v36, %v1379_v13  ;;  %v1251_v36 = vadd.f32 %v3214_v59, %v1103_v61  ;;  %v1508_v49 = vadd.f32 %v3258_v46, %v1382_v21  ;;  %v1252_v59 = vadd.f32 %v3226_v20, %v1104_v11  ;;  %v3460_v11 = vld [vmem:[#allocation6_spill] sm:$0xff] }
 0x167   : > { %v3312_v54 = vpop.f32.mrf.mxu1  ;;  %v1719_v41 = vpop.f32.mrf.mxu0  ;;  %v1105_v20 = vadd.f32 %v3240_v52, %v3189_v40  ;;  %v1258_v33 = vadd.f32 %v3460_v11, %v1110_v0 }
 0x168   : > { %v1383_v6 = vadd.f32 %v3266_v25, %v1251_v36  ;;  %v1386_v25 = vadd.f32 %v3274_v32, %v1254_v50  ;;  %v1384_v53 = vadd.f32 %v3278_v48, %v1252_v59  ;;  %v3463_v36 = vld [vmem:[#allocation11_spill] sm:$0xff]  ;;  %v3464_v50 = vld [vmem:[#allocation4_spill] sm:$0xff] }
 0x169   : > { %v2439_v28 = vpop.f32.mrf.mxu1  ;;  %v2458_v24 = vpop.f32.mrf.mxu0  ;;  %v1253_v30 = vadd.f32 %v3456_v19, %v1105_v20 }
 0x16a   : > { %v1652_v4 = vadd.f32 %v2439_v28, %v1504_v10 }
 0x16b   : > { %v1587_v42 = vpop.f32.mrf.mxu1  ;;  %v1722_v38 = vpop.f32.mrf.mxu0 }
 0x16c   : > { %v1784_v15 = vadd.f32 %v2457_v3, %v1652_v4  ;;  %v1650_v63 = vadd.f32 %v1587_v42, %v1502_v22  ;;  %v1381_v3 = vadd.f32 %v3270_v56, %v1249_v9  ;;  %v1509_v22 = vadd.f32 %v3262_v2, %v1383_v6  ;;  %v3457_v2 = vld [vmem:[#allocation2_spill] sm:$0xff]  ;;  %v3458_v42 = vld [vmem:[#allocation9_spill] sm:$0xff] }
 0x16d   : > { %v2440_v29 = vpop.f32.mrf.mxu1  ;;  %v2461_v34 = vpop.f32.mrf.mxu0 }
 0x16e   : > { %v1782_v12 = vadd.f32 %v1719_v41, %v1650_v63  ;;  %v1653_v14 = vadd.f32 %v2440_v29, %v1505_v43  ;;  %v1807_v7 = vadd.f32 %v3332_v57, %v1784_v15  ;;  %v1507_v4 = vadd.f32 %v3455_v5, %v1381_v3  ;;  %v3459_v43 = vld [vmem:[#allocation18_spill] sm:$0xff] }
 0x16f   : > { %v1590_v26 = vpop.f32.mrf.mxu1  ;;  %v1735_v55 = vpop.f32.mrf.mxu0  ;;  %v1387_v48 = vadd.f32 %v3459_v43, %v1255_v31  ;;  %v3461_v29 = vld [vmem:[#allocation14_spill] sm:$0xff] }
 0x170   : > { %v1785_v41 = vadd.f32 %v2458_v24, %v1653_v14  ;;  %v1651_v62 = vadd.f32 %v1590_v26, %v1503_v58  ;;  %v1805_v1 = vadd.f32 %v3332_v57, %v1782_v12  ;;  %v1823_v13 = vmax.f32 %v1807_v7, 0.0  ;;  %v3462_v14 = vld [vmem:[#allocation3_spill] sm:$0xff] }
 0x171   : > { %v2443_v23 = vpop.f32.mrf.mxu1  ;;  %v2462_v39 = vpop.f32.mrf.mxu0  ;;  %v1111_v9 = vadd.f32 %v3463_v36, %v3462_v14  ;;  %v1109_v26 = vadd.f32 %v3465_v35, %v3464_v50 }
 0x172   : > { %v1808_v45 = vadd.f32 %v3332_v57, %v1785_v41  ;;  %v1783_v46 = vadd.f32 %v1722_v38, %v1651_v62  ;;  %v1656_v60 = vadd.f32 %v2443_v23, %v1508_v49  ;;  %v1821_v32 = vmax.f32 %v1805_v1, 0.0  ;;  %v3466_v62 = vld [vmem:[#allocation15_spill] sm:$0xff] }
 0x173   : > { %v1603_v56 = vpop.f32.mrf.mxu1  ;;  %v1738_v10 = vpop.f32.mrf.mxu0  ;;  %v1108_v38 = vadd.f32 %v3458_v42, %v3457_v2  ;;  %v1510_v59 = vadd.f32 %v3466_v62, %v1384_v53  ;;  %v3467_v23 = vld [vmem:[#allocation7_spill] sm:$0xff] }
 0x174   : > { %v1824_v28 = vmax.f32 %v1808_v45, 0.0  ;;  %v1806_v24 = vadd.f32 %v3332_v57, %v1783_v46  ;;  %v1654_v51 = vadd.f32 %v1603_v56, %v1506_v16  ;;  %v1788_v40 = vadd.f32 %v2461_v34, %v1656_v60  ;;  %v3468_v45 = vld [vmem:[#allocation16_spill] sm:$0xff] }
 0x175   : > { %v2444_v17 = vpop.f32.mrf.mxu1  ;;  %v2465_v52 = vpop.f32.mrf.mxu0  ;;  %v1512_v34 = vadd.f32 %v3461_v29, %v1386_v25  ;;  %v1256_v1 = vadd.f32 %v3467_v23, %v1108_v38  ;;  %v1513_v46 = vadd.f32 %v3468_v45, %v1387_v48  ;;  %v1385_v60 = vadd.f32 %v3287_v18, %v1253_v30  ;;  %v3472_v30 = vld [vmem:[#allocation19_spill] sm:$0xff] }
 0x176   : > { %v2189_v44 = vpack.c.bf16 %v1824_v28, %v1823_v13  ;;  %v1822_v37 = vmax.f32 %v1806_v24, 0.0  ;;  %v1786_v61 = vadd.f32 %v1735_v55, %v1654_v51  ;;  %v1657_v21 = vadd.f32 %v2444_v17, %v1509_v22  ;;  %v3469_v28 = vld [vmem:[#allocation8_spill] sm:$0xff] }
 0x177   : > { %v1606_v15 = vpop.f32.mrf.mxu1  ;;  %v1751_v63 = vpop.f32.mrf.mxu0  ;;  %v1811_v55 = vadd.f32 %v3332_v57, %v1788_v40  ;;  %v1259_v24 = vadd.f32 %v3469_v28, %v1111_v9  ;;  %v1388_v18 = vadd.f32 %v3299_v47, %v1256_v1 }
 0x178   : > { %2221 = vst [vmem:[%s3364_s5 + $0x8] sm:$0xff] %v2189_v44   ;;  %v2184_v58 = vpack.c.bf16 %v1822_v37, %v1821_v32  ;;  %v1655_v12 = vadd.f32 %v1606_v15, %v1507_v4  ;;  %v1789_v49 = vadd.f32 %v2462_v39, %v1657_v21  ;;  %v1809_v16 = vadd.f32 %v3332_v57, %v1786_v61  ;;  %v3471_v44 = vld [vmem:[#allocation17_spill] sm:$0xff]  ;;  %v3473_v15 = vld [vmem:[#allocation20_spill] sm:$0xff] }
 0x179   : > { %v2447_v7 = vpop.f32.mrf.mxu1  ;;  %v2466_v41 = vpop.f32.mrf.mxu0  ;;  %v1390_v39 = vadd.f32 %v3292_v27, %v1258_v33  ;;  %v1827_v22 = vmax.f32 %v1811_v55, 0.0  ;;  %v1511_v27 = vadd.f32 %v3471_v44, %v1385_v60  ;;  %v1514_v11 = vadd.f32 %v3473_v15, %v1388_v18 }
 0x17a   : > { %2185 = vst [vmem:[%s3364_s5] sm:$0xff] %v2184_v58   ;;  %v1787_v6 = vadd.f32 %v1738_v10, %v1655_v12  ;;  %v1660_v3 = vadd.f32 %v2447_v7, %v1512_v34  ;;  %v1812_v31 = vadd.f32 %v3332_v57, %v1789_v49  ;;  %v3470_v10 = vld [vmem:[#allocation10_spill] sm:$0xff]  ;;  %v1825_v40 = vmax.f32 %v1809_v16, 0.0 }
 0x17b   : > { %v1619_v20 = vpop.f32.mrf.mxu1  ;;  %v1754_v0 = vpop.f32.mrf.mxu0  ;;  %v1257_v51 = vadd.f32 %v3470_v10, %v1109_v26  ;;  %v1516_v2 = vadd.f32 %v3472_v30, %v1390_v39 }
 0x17c   : > { %v1810_v25 = vadd.f32 %v3332_v57, %v1787_v6  ;;  %v1792_v56 = vadd.f32 %v2465_v52, %v1660_v3  ;;  %v1658_v13 = vadd.f32 %v1619_v20, %v1510_v59  ;;  %v1828_v5 = vmax.f32 %v1812_v31, 0.0 }
 0x17d   : > { %v2448_v4 = vpop.f32.mrf.mxu1  ;;  %v2469_v53 = vpop.f32.mrf.mxu0  ;;  %v1391_v52 = vadd.f32 %v3305_v8, %v1259_v24  ;;  %v1389_v33 = vadd.f32 %v3312_v54, %v1257_v51  ;;  %v3475_v54 = vld [vmem:[#allocation22_spill] sm:$0xff] }
 0x17e   : > { %v1826_v17 = vmax.f32 %v1810_v25, 0.0  ;;  %v1661_v32 = vadd.f32 %v2448_v4, %v1513_v46  ;;  %v2199_v37 = vpack.c.bf16 %v1828_v5, %v1827_v22  ;;  %v1790_v61 = vadd.f32 %v1751_v63, %v1658_v13  ;;  %v3474_v63 = vld [vmem:[#allocation21_spill] sm:$0xff] }
 0x17f   : > { %v1622_v19 = vpop.f32.mrf.mxu1  ;;  %v1815_v38 = vadd.f32 %v3332_v57, %v1792_v56  ;;  %v1767_v21 = vpop.f32.mrf.mxu0  ;;  %v1517_v34 = vadd.f32 %v3474_v63, %v1391_v52  ;;  %v1515_v7 = vadd.f32 %v3475_v54, %v1389_v33 }
 0x180   : > { %v2194_v42 = vpack.c.bf16 %v1826_v17, %v1825_v40  ;;  %v1793_v43 = vadd.f32 %v2466_v41, %v1661_v32  ;;  %2223 = vst [vmem:[%s3364_s5 + $0x18] sm:$0xff] %v2199_v37   ;;  %v1659_v48 = vadd.f32 %v1622_v19, %v1511_v27  ;;  %v1813_v58 = vadd.f32 %v3332_v57, %v1790_v61 }
 0x181   : > { %v2451_v47 = vpop.f32.mrf.mxu1  ;;  %v1831_v36 = vmax.f32 %v1815_v38, 0.0  ;;  %v2470_v49 = vpop.f32.mrf.mxu0 }
 0x182   : > { %2222 = vst [vmem:[%s3364_s5 + $0x10] sm:$0xff] %v2194_v42   ;;  %v1816_v8 = vadd.f32 %v3332_v57, %v1793_v43  ;;  %v1664_v29 = vadd.f32 %v2451_v47, %v1516_v2  ;;  %v1791_v12 = vadd.f32 %v1754_v0, %v1659_v48  ;;  %v1829_v16 = vmax.f32 %v1813_v58, 0.0 }
 0x183   : > { %v1635_v14 = vpop.f32.mrf.mxu1  ;;  %v1770_v60 = vpop.f32.mrf.mxu0 }
 0x184   : > { %v1832_v9 = vmax.f32 %v1816_v8, 0.0  ;;  %v1796_v50 = vadd.f32 %v2469_v53, %v1664_v29  ;;  %v1662_v35 = vadd.f32 %v1635_v14, %v1514_v11  ;;  %v1814_v26 = vadd.f32 %v3332_v57, %v1791_v12 }
 0x185   : > { %v2452_v55 = vpop.f32.mrf.mxu1 }
 0x186   : > { %v2209_v41 = vpack.c.bf16 %v1832_v9, %v1831_v36  ;;  %v1794_v62 = vadd.f32 %v1767_v21, %v1662_v35  ;;  %v1665_v59 = vadd.f32 %v2452_v55, %v1517_v34  ;;  %v1830_v6 = vmax.f32 %v1814_v26, 0.0 }
 0x187   : > { %v1638_v3 = vpop.f32.mrf.mxu1  ;;  %v1819_v23 = vadd.f32 %v3332_v57, %v1796_v50 }
 0x188   : > { %2225 = vst [vmem:[%s3364_s5 + $0x28] sm:$0xff] %v2209_v41   ;;  %v1797_v1 = vadd.f32 %v2470_v49, %v1665_v59  ;;  %v1663_v45 = vadd.f32 %v1638_v3, %v1515_v7  ;;  %v2204_v46 = vpack.c.bf16 %v1830_v6, %v1829_v16  ;;  %v1817_v31 = vadd.f32 %v3332_v57, %v1794_v62 }
 0x189   : > { %v1835_v39 = vmax.f32 %v1819_v23, 0.0 }
 0x18a   : > { %v1820_v20 = vadd.f32 %v3332_v57, %v1797_v1  ;;  %v1795_v0 = vadd.f32 %v1770_v60, %v1663_v45  ;;  %2224 = vst [vmem:[%s3364_s5 + $0x20] sm:$0xff] %v2204_v46   ;;  %v1833_v13 = vmax.f32 %v1817_v31, 0.0 }
 0x18c   : > { %v1836_v25 = vmax.f32 %v1820_v20, 0.0  ;;  %v1818_v56 = vadd.f32 %v3332_v57, %v1795_v0 }
 0x18e   : > { %v2219_v28 = vpack.c.bf16 %v1836_v25, %v1835_v39  ;;  %v1834_v24 = vmax.f32 %v1818_v56, 0.0 }
 0x190   : > { %2227 = vst [vmem:[%s3364_s5 + $0x38] sm:$0xff] %v2219_v28   ;;  %v2214_v10 = vpack.c.bf16 %v1834_v24, %v1833_v13 }
 0x192   : > { %2226 = vst [vmem:[%s3364_s5 + $0x30] sm:$0xff] %v2214_v10  }
 0x193 PF: > { %s13_s16 = sadd.s32 1, %s2573_s16   ;;  %s3476_s12 = smov %s2565_s14 }
 0x194   : > { %p10_p8 = scmp.ge.s32.totalorder %s13_s16, 6   ;;  %s3477_s13 = smov %s2569_s15 }
 0x195   : > { %s3478_s14 = smov %s3481_s17  ;;  %s3479_s15 = smov %s3485_s18 }
 0x196   :  { %12 = sbr.rel (!%p10_p8) target bundleno = 3 (0x3), region = 70 }

// kernel: basic_block_forward.3
= control target key start
LH: loop header
LB: loop body
LE: loop exit
PB: predicated region body
PF: predicated region fallthrough
CT: control target
= control target key end

     0   :  { %s3498_s15 = smov 0   ;;  %s3500_s16 = smov 0   ;;  %s4497_s0 = inlined_call_operand.vmem [shape: bf16[2,2,1,10,18,128], index: 0, kind: input, shape index: {}]   ;;  %s4498_s1 = inlined_call_operand.vmem [shape: bf16[9,128,128], index: 1, kind: input, shape index: {}]   ;;  %s4499_s2 = inlined_call_operand.vmem [shape: f32[1,128], index: 2, kind: input, shape index: {}]   ;;  %s4500_s3 = inlined_call_operand.vmem [shape: bf16[2,16,16,128], index: 3, kind: input, shape index: {}]   ;;  %s4501_s4 = inlined_call_operand.vmem [shape: f32[2,16,16,128], index: 4, kind: output, shape index: {}]  }
   0x1   :  { %s3502_s17 = smov 0   ;;  %s3504_s18 = smov 0  }
   0x2   :  { %s3506_s19 = smov 0  }
   0x3 LB: > { %s23_s20 = sadd.s32 1, %s3463_s17  ;;  %s26_s21 = sadd.s32 1, %s3467_s18  ;;  %s3471_s19 = sphi %s3506_s19, %s14_s19   ;;  %s3467_s18 = sphi %s3504_s18, %s4562_s18   ;;  %s3463_s17 = sphi %s3502_s17, %s4561_s17   ;;  %s3459_s16 = sphi %s3500_s16, %s4560_s16   ;;  %s3455_s15 = sphi %s3498_s15, %s4559_s15  }
   0x4   : > { %p24_p0 = scmp.ge.s32.totalorder %s23_s20, 2  ;;  %p2569_p1 = scmp.ge.s32.totalorder %s3471_s19, 1 }
   0x5   : > { %p200_p2 = scmp.lt.s32.totalorder %s3471_s19, 5 }
   0x6   : > { %s4564_s20 = smov (%p24_p0, %s23_s20), 0  ;;  %s4566_s21 = smov (!%p24_p0, %s26_s21), %s3467_s18 }
   0x7   : > { %p201_p3 = pnand %p2569_p1, %p200_p2  ;;  %p28_p4 = scmp.ge.s32.totalorder %s4566_s21, 2 }
   0x9   : > { %s4568_s21 = smov (%p28_p4, %s4566_s21), 0  ;;  %204 = sbr.rel (%p201_p3) target bundleno = 395 (0x18b), region = 36 }
   0xe   : > { %v3351_v0 = vld [vmem:[%s4498_s1 + $0x78] sm:$0xff]   ;;  %p245_p5 = scmp.lt.s32.totalorder %s3459_s16, 1  ;;  %p247_p6 = scmp.lt.s32.totalorder %s3455_s15, 1  ;;  %v3353_v2 = vld [vmem:[%s4498_s1 + $0x70] sm:$0xff]   ;;  %v3355_v4 = vld [vmem:[%s4498_s1 + $0x68] sm:$0xff]   ;;  %vm913_vm3 = vcmask 1042432  }
   0xf   : > { %v3352_v1 = vld [vmem:[%s4498_s1 + $0x38] sm:$0xff]   ;;  %3005 = vmatprep.subr.bf16.mxu0 %v3351_v0  ;;  %v3354_v3 = vld [vmem:[%s4498_s1 + $0x30] sm:$0xff]   ;;  %v3356_v5 = vld [vmem:[%s4498_s1 + $0x28] sm:$0xff]   ;;  %vm323_vm0 = vsmask.f32 3328  ;;  %vm914_vm4 = vcmask 1046532  }
  0x10   : > { %s4570_s16 = smov (!%p245_p5, %s3459_s16), 1  ;;  %3037 = vmatprep.subr.bf16.mxu1 %v3352_v1  ;;  %3006 = vmatpush3.bf16.msra.mxu0 %v3351_v0  ;;  %v3357_v6 = vld [vmem:[%s4498_s1 + $0x60] sm:$0xff]   ;;  %v3359_v8 = vld [vmem:[%s4498_s1 + $0x58] sm:$0xff]   ;;  %v3361_v10 = vld [vmem:[%s4498_s1 + $0x50] sm:$0xff]   ;;  %vm324_vm1 = vsmask.f32 7440 }
  0x11   : > { %s248_s30 = scalar_select %p247_p6, %s3455_s15, 1  ;;  %3038 = vmatpush3.bf16.msra.mxu1 %v3352_v1  ;;  %3007 = vmatprep.subr.bf16.mxu0 %v3353_v2  ;;  %v3358_v7 = vld [vmem:[%s4498_s1 + $0x20] sm:$0xff]   ;;  %v3360_v9 = vld [vmem:[%s4498_s1 + $0x18] sm:$0xff]   ;;  %v3362_v11 = vld [vmem:[%s4498_s1 + $0x10] sm:$0xff]  }
  0x12   : > { %s3310_s7 = smul.u32 60, %s4570_s16  ;;  %3039 = vmatprep.subr.bf16.mxu1 %v3354_v3  ;;  %v3363_v26 = vld [vmem:[%s4498_s1 + $0x48] sm:$0xff]   ;;  %vm3613_vm2 = vmor %vm323_vm0, %vm324_vm1  ;;  %v3365_v44 = vld [vmem:[%s4498_s1 + $0x40] sm:$0xff]   ;;  %s2571_s27 = sshll.u32 %s3455_s15, 3 }
  0x13   : > { %s3309_s10 = smul.u32 30, %s248_s30  ;;  %v3364_v30 = vld [vmem:[%s4498_s1 + $0x8] sm:$0xff]   ;;  %v3366_v46 = vld [vmem:[%s4498_s1] sm:$0xff]   ;;  %v3369_v54 = vld [vmem:[%s4498_s1 + $0xb8] sm:$0xff]   ;;  %p257_p7 = scmp.lt.s32.totalorder %s2571_s27, 15 }
  0x14   : > { %3008 = vmatpush3.bf16.msra.mxu0 %v3353_v2  ;;  %v3370_v60 = vld [vmem:[%s4498_s1 + $0xf8] sm:$0xff]   ;;  %vm3834_vm5 = vmor %vm913_vm3, %vm914_vm4  ;;  %v3432_v35 = vld [vmem:[%s4498_s1 + $0x200] sm:$0xff]   ;;  %s2573_s28 = sshll.u32 %s4570_s16, 5 }
  0x15   : > { %s251_s11 = sadd.s32 %s3310_s7, %s3309_s10  ;;  %3040 = vmatpush3.bf16.msra.mxu1 %v3354_v3  ;;  %3009 = vmatprep.subr.bf16.mxu0 %v3355_v4  ;;  %s4572_s27 = smov (!%p257_p7, %s2571_s27), 15 }
  0x16   : > { %3041 = vmatprep.subr.bf16.mxu1 %v3356_v5  ;;  %s2570_s23 = sshll.u32 %s251_s11, 2  ;;  %s2572_s15 = sshll.u32 %s4572_s27, 1 }
  0x17   : > { %s3568_s30 = scalar_lea.vmem %s4497_s0, %s2570_s23  ;;  %s4261_s29 = sadd.s32 %s2573_s28, %s2572_s15 }
  0x18   : > { %3010 = vmatpush3.bf16.msra.mxu0 %v3355_v4  ;;  %v3577_v12 = vld [vmem:[%s3568_s30] sm:$0xf]  ;;  %v3580_v13 = vld [vmem:[%s3568_s30 + $0x4] sm:$0xf]  ;;  %v3583_v14 = vld [vmem:[%s3568_s30 + $0x8] sm:$0x1] }
  0x19   : > { %3042 = vmatpush3.bf16.msra.mxu1 %v3356_v5  ;;  %3011 = vmatprep.subr.bf16.mxu0 %v3357_v6  ;;  %v327_v15 = vshrl.u32 %v3577_v12, 16  ;;  %v330_v16 = vshll.u32 %v3577_v12, 16  ;;  %v336_v17 = vshll.u32 %v3580_v13, 16  ;;  %v340_v18 = vshrl.u32 %v3580_v13, 16  ;;  %v3591_v20 = vld [vmem:[%s3568_s30 + $0xc] sm:$0xf] }
  0x1a   : > { %3043 = vmatprep.subr.bf16.mxu1 %v3358_v7  ;;  %v346_v19 = vshll.u32 %v3583_v14, 16  ;;  %v2611_v23 = vcombine.low %v3577_v12, %v3580_v13  ;;  %v3596_v24 = vld [vmem:[%s3568_s30 + $0x10] sm:$0xf]  ;;  %v3599_v25 = vld [vmem:[%s3568_s30 + $0x14] sm:$0x1]  ;;  %v351_v29 = vshrl.u32 %v3591_v20, 16 }
  0x1b   : > { %v329_v21 = vrot.slane %v327_v15, 4  ;;  %v332_v22 = vrot.slane %v330_v16, 5  ;;  %v338_v27 = vrot.slane %v336_v17, 5  ;;  %v342_v28 = vrot.slane %v340_v18, 4  ;;  %v3637_v55 = vld [vmem:[%s3568_s30 + $0x18] sm:$0xf] }
  0x1c   : > { %3012 = vmatpush3.bf16.msra.mxu0 %v3357_v6  ;;  %3053 = vmatprep.mubr.bf16.mxu1 %v2611_v23  ;;  %v354_v32 = vshll.u32 %v3591_v20, 16  ;;  %v360_v33 = vshll.u32 %v3596_v24, 16  ;;  %v364_v34 = vshrl.u32 %v3596_v24, 16  ;;  %v348_v37 = vrot.slane %v346_v19, 5  ;;  %v3640_v56 = vld [vmem:[%s3568_s30 + $0x1c] sm:$0xf] }
  0x1d   : > { %3044 = vmatpush3.bf16.msra.mxu1 %v3358_v7  ;;  %3013 = vmatprep.subr.bf16.mxu0 %v3359_v8  ;;  %v333_v31 = vor.u32 %v332_v22, %v329_v21  ;;  %v343_v36 = vor.u32 %v342_v28, %v338_v27  ;;  %v353_v38 = vrot.slane %v351_v29, 4  ;;  %v370_v39 = vshll.u32 %v3599_v25, 16  ;;  %v3646_v61 = vld [vmem:[%s3568_s30 + $0x20] sm:$0x1]  ;;  %v3654_v3 = vld [vmem:[%s3568_s30 + $0x24] sm:$0xf] }
  0x1e   : > { %3045 = vmatprep.subr.bf16.mxu1 %v3360_v9  ;;  %v356_v41 = vrot.slane %v354_v32, 5  ;;  %v362_v42 = vrot.slane %v360_v33, 5  ;;  %v366_v43 = vrot.slane %v364_v34, 4  ;;  %v921_v52 = vrot.slane %v3583_v14, 5  ;;  %v3661_v7 = vld [vmem:[%s3568_s30 + $0x28] sm:$0xf] }
  0x1f   : > { %v334_v40 = vrot.slane %v333_v31, 4  ;;  %v344_v45 = vrot.slane %v343_v36, 4  ;;  %v372_v50 = vrot.slane %v370_v39, 5  ;;  %v3631_v53 = vcombine.low %v3591_v20, %v3596_v24  ;;  %v3372_v29 = vld [vmem:[%s4498_s1 + $0xf0] sm:$0xff]   ;;  %s2574_s5 = sshll.u32 %s4261_s29, 2  ;;  %s2578_s10 = sshll.u32 %s4261_s29, 3 }
  0x20   : > { %3014 = vmatpush3.bf16.msra.mxu0 %v3359_v8  ;;  %v357_v48 = vor.u32 %v356_v41, %v353_v38  ;;  %v367_v49 = vor.u32 %v366_v43, %v362_v42  ;;  %v375_v62 = vshrl.u32 %v3637_v55, 16  ;;  %v378_v63 = vshll.u32 %v3637_v55, 16  ;;  %v3664_v8 = vld [vmem:[%s3568_s30 + $0x2c] sm:$0x1]  ;;  %v3691_v41 = vld [vmem:[%s3568_s30 + $0x30] sm:$0xf]  ;;  %s263_s7 = scalar_lea.vmem %s4500_s3, %s2574_s5  ;;  %s4417_s13 = scalar_lea.vmem %s4501_s4, %s2578_s10 }
  0x21   : > { %3046 = vmatpush3.bf16.msra.mxu1 %v3360_v9  ;;  %3015 = vmatprep.subr.bf16.mxu0 %v3361_v10  ;;  %v339_v47 = vsel %vm3613_vm2, %v334_v40, %v338_v27  ;;  %v349_v51 = vsel %vm3613_vm2, %v344_v45, %v348_v37  ;;  %v384_v0 = vshll.u32 %v3640_v56, 16  ;;  %v388_v1 = vshrl.u32 %v3640_v56, 16  ;;  %v3375_v45 = vld [vmem:[%s4498_s1 + $0xa8] sm:$0xff]  }
  0x22   : > { %3047 = vmatprep.subr.bf16.mxu1 %v3362_v11  ;;  %v2595_v57 = vcombine.low %v339_v47, %v349_v51  ;;  %v358_v58 = vrot.slane %v357_v48, 4  ;;  %v368_v59 = vrot.slane %v367_v49, 4  ;;  %v394_v2 = vshll.u32 %v3646_v61, 16  ;;  %v3704_v47 = vld [vmem:[%s3568_s30 + $0x38] sm:$0x1]  ;;  %v3376_v51 = vld [vmem:[%s4498_s1 + $0xe8] sm:$0xff]  }
  0x23   : > { %v377_v6 = vrot.slane %v375_v62, 4  ;;  %v918_v9 = vrot.slane %v3580_v13, 5  ;;  %v380_v15 = vrot.slane %v378_v63, 5  ;;  %v386_v16 = vrot.slane %v384_v0, 5  ;;  %v3721_v0 = vld [vmem:[%s3568_s30 + $0x40] sm:$0xf] }
  0x24   : > { %3016 = vmatpush3.bf16.msra.mxu0 %v3361_v10  ;;  %3021 = vmatprep.mubr.bf16.mxu0 %v2595_v57  ;;  %v363_v4 = vsel %vm3613_vm2, %v358_v58, %v362_v42  ;;  %v373_v5 = vsel %vm3613_vm2, %v368_v59, %v372_v50  ;;  %v390_v17 = vrot.slane %v388_v1, 4  ;;  %v396_v18 = vrot.slane %v394_v2, 5  ;;  %v3716_v58 = vld [vmem:[%s3568_s30 + $0x3c] sm:$0xf]  ;;  %v3377_v2 = vld [vmem:[%s4498_s1 + $0xa0] sm:$0xff]  }
  0x25   : > { %3048 = vmatpush3.bf16.msra.mxu1 %v3362_v11  ;;  %3017 = vmatprep.subr.bf16.mxu0 %v3363_v26  ;;  %v3667_v10 = vcombine.low %v363_v4, %v373_v5  ;;  %v3371_v11 = vld [vmem:[%s4498_s1 + $0xb0] sm:$0xff]   ;;  %v399_v19 = vshrl.u32 %v3654_v3, 16  ;;  %v402_v21 = vshll.u32 %v3654_v3, 16  ;;  %v408_v22 = vshll.u32 %v3661_v7, 16 }
  0x26   : > { %3049 = vmatprep.subr.bf16.mxu1 %v3364_v30  ;;  %v381_v23 = vor.u32 %v380_v15, %v377_v6  ;;  %v412_v27 = vshrl.u32 %v3661_v7, 16  ;;  %v418_v28 = vshll.u32 %v3664_v8, 16  ;;  %v3688_v40 = vcombine.low %v3654_v3, %v3661_v7  ;;  %v3734_v15 = vld [vmem:[%s3568_s30 + $0x44] sm:$0x1] }
  0x27   : > { %v401_v31 = vrot.slane %v399_v19, 4  ;;  %v404_v32 = vrot.slane %v402_v21, 5  ;;  %v410_v33 = vrot.slane %v408_v22, 5  ;;  %v423_v48 = vshrl.u32 %v3691_v41, 16 }
  0x28   : > { %3018 = vmatpush3.bf16.msra.mxu0 %v3363_v26  ;;  %v391_v26 = vor.u32 %v390_v17, %v386_v16  ;;  %v382_v34 = vrot.slane %v381_v23, 4  ;;  %v414_v37 = vrot.slane %v412_v27, 4  ;;  %v420_v38 = vrot.slane %v418_v28, 5 }
  0x29   : > { %3050 = vmatpush3.bf16.msra.mxu1 %v3364_v30  ;;  %3019 = vmatprep.subr.bf16.mxu0 %v3365_v44  ;;  %v3682_v30 = vcombine.low %v3637_v55, %v3640_v56  ;;  %v405_v39 = vor.u32 %v404_v32, %v401_v31  ;;  %v442_v63 = vshll.u32 %v3704_v47, 16  ;;  %v447_v19 = vshrl.u32 %v3716_v58, 16 }
  0x2a   : > { %3051 = vmatprep.subr.bf16.mxu1 %v3366_v46  ;;  %v392_v36 = vrot.slane %v391_v26, 4  ;;  %v387_v42 = vsel %vm3613_vm2, %v382_v34, %v386_v16  ;;  %v3378_v16 = vld [vmem:[%s4498_s1 + $0xe0] sm:$0xff]   ;;  %v450_v23 = vshll.u32 %v3716_v58, 16  ;;  %v456_v26 = vshll.u32 %v3721_v0, 16 }
  0x2b   : > { %v406_v50 = vrot.slane %v405_v39, 4  ;;  %v449_v28 = vrot.slane %v447_v19, 4  ;;  %v466_v31 = vshll.u32 %v3734_v15, 16  ;;  %v3384_v19 = vld [vmem:[%s4498_s1 + $0xd0] sm:$0xff]  }
  0x2c   : > { %3020 = vmatpush3.bf16.msra.mxu0 %v3365_v44  ;;  %v397_v43 = vsel %vm3613_vm2, %v392_v36, %v396_v18  ;;  %v415_v44 = vor.u32 %v414_v37, %v410_v33  ;;  %v444_v18 = vrot.slane %v442_v63, 5  ;;  %v458_v34 = vrot.slane %v456_v26, 5  ;;  %v3381_v36 = vld [vmem:[%s4498_s1 + $0x98] sm:$0xff]  }
  0x2d   : > { %3052 = vmatpush3.bf16.msra.mxu1 %v3366_v46  ;;  %3069 = vmatprep.subr.bf16.mxu0 %v3369_v54  ;;  %v3701_v46 = vld [vmem:[%s3568_s30 + $0x34] sm:$0xf]  ;;  %v3707_v49 = vcombine.low %v387_v42, %v397_v43  ;;  %v411_v1 = vsel %vm3613_vm2, %v406_v50, %v410_v33  ;;  %v452_v33 = vrot.slane %v450_v23, 5  ;;  %v468_v39 = vrot.slane %v466_v31, 5  ;;  %v3382_v42 = vld [vmem:[%s4498_s1 + $0xd8] sm:$0xff]  }
  0x2e   : > { %3101 = vmatprep.subr.bf16.mxu1 %v3370_v60  ;;  %v432_v57 = vshll.u32 %v3701_v46, 16  ;;  %v416_v59 = vrot.slane %v415_v44, 4  ;;  %v436_v62 = vshrl.u32 %v3701_v46, 16  ;;  %v3731_v6 = vcombine.low %v3691_v41, %v3701_v46  ;;  %v3766_v50 = vld [vmem:[%s3568_s30 + $0x4c] sm:$0xf] }
  0x2f   : > { %3022 = vmatmul.mubr.bf16.vlgmr.msra.gmra.mxu0 %v3667_v10  ;;  %v453_v44 = vor.u32 %v452_v33, %v449_v28 }
  0x30   : > { %3054 = vmatmul.mubr.bf16.vlgmr.msra.gmra.mxu1 %v3631_v53  ;;  %3070 = vmatpush3.bf16.msra.mxu0 %v3369_v54  ;;  %v426_v54 = vshll.u32 %v3691_v41, 16  ;;  %v434_v5 = vrot.slane %v432_v57, 5  ;;  %v438_v17 = vrot.slane %v436_v62, 4  ;;  %v3772_v57 = vld [vmem:[%s3568_s30 + $0x50] sm:$0x1] }
  0x31   : > { %3102 = vmatpush3.bf16.msra.mxu1 %v3370_v60  ;;  %3071 = vmatprep.subr.bf16.mxu0 %v3371_v11  ;;  %v425_v60 = vrot.slane %v423_v48, 4  ;;  %v3763_v48 = vld [vmem:[%s3568_s30 + $0x48] sm:$0xf]  ;;  %v3777_v62 = vld [vmem:[%s3568_s30 + $0x54] sm:$0xf]  ;;  %v490_v26 = vshll.u32 %v3772_v57, 16 }
  0x32   : > { %3103 = vmatprep.subr.bf16.mxu1 %v3372_v29  ;;  %3057 = vmatprep.mubr.bf16.mxu1 %v3682_v30  ;;  %v428_v4 = vrot.slane %v426_v54, 5  ;;  %v439_v27 = vor.u32 %v438_v17, %v434_v5  ;;  %v3787_v17 = vld [vmem:[%s3568_s30 + $0x58] sm:$0xf] }
  0x33   : > { %3025 = vmatprep.mubr.bf16.mxu0 %v3707_v49  ;;  %v492_v33 = vrot.slane %v490_v26, 5 }
  0x34   : > { %3072 = vmatpush3.bf16.msra.mxu0 %v3371_v11  ;;  %v421_v11 = vsel %vm3613_vm2, %v416_v59, %v420_v38  ;;  %v429_v22 = vor.u32 %v428_v4, %v425_v60  ;;  %v440_v37 = vrot.slane %v439_v27, 4  ;;  %v471_v59 = vshrl.u32 %v3763_v48, 16  ;;  %v3383_v4 = vld [vmem:[%s4498_s1 + $0x90] sm:$0xff]   ;;  %v3794_v27 = vld [vmem:[%s3568_s30 + $0x5c] sm:$0x1] }
  0x35   : > { %3104 = vmatpush3.bf16.msra.mxu1 %v3372_v29  ;;  %3073 = vmatprep.subr.bf16.mxu0 %v3375_v45  ;;  %v3742_v21 = vcombine.low %v411_v1, %v421_v11  ;;  %v460_v29 = vshrl.u32 %v3721_v0, 16  ;;  %v474_v60 = vshll.u32 %v3763_v48, 16  ;;  %v454_v1 = vrot.slane %v453_v44, 4 }
  0x36   : > { %3105 = vmatprep.subr.bf16.mxu1 %v3376_v51  ;;  %v430_v32 = vrot.slane %v429_v22, 4  ;;  %v484_v11 = vshrl.u32 %v3766_v50, 16  ;;  %v473_v22 = vrot.slane %v471_v59, 4  ;;  %v504_v44 = vshll.u32 %v3787_v17, 16 }
  0x37   : > { %3026 = vmatmul.mubr.bf16.gmra.mxu0 %v3742_v21  ;;  %v462_v38 = vrot.slane %v460_v29, 4  ;;  %v476_v23 = vrot.slane %v474_v60, 5  ;;  %v459_v28 = vsel %vm3613_vm2, %v454_v1, %v458_v34  ;;  %v508_v59 = vshrl.u32 %v3787_v17, 16 }
  0x38   : > { %3058 = vmatmul.mubr.bf16.gmra.mxu1 %v3688_v40  ;;  %3074 = vmatpush3.bf16.msra.mxu0 %v3375_v45  ;;  %v435_v43 = vsel %vm3613_vm2, %v430_v32, %v434_v5  ;;  %v3760_v45 = vcombine.low %v3716_v58, %v3721_v0  ;;  %v480_v5 = vshll.u32 %v3766_v50, 16  ;;  %v514_v60 = vshll.u32 %v3794_v27, 16 }
  0x39   : > { %3106 = vmatpush3.bf16.msra.mxu1 %v3376_v51  ;;  %3075 = vmatprep.subr.bf16.mxu0 %v3377_v2  ;;  %v445_v51 = vsel %vm3613_vm2, %v440_v37, %v444_v18  ;;  %v463_v54 = vor.u32 %v462_v38, %v458_v34  ;;  %v477_v32 = vor.u32 %v476_v23, %v473_v22  ;;  %v495_v37 = vshrl.u32 %v3777_v62, 16 }
  0x3a   : > { %3107 = vmatprep.subr.bf16.mxu1 %v3378_v16  ;;  %3061 = vmatprep.mubr.bf16.mxu1 %v3731_v6  ;;  %v3779_v63 = vcombine.low %v435_v43, %v445_v51  ;;  %v482_v29 = vrot.slane %v480_v5, 5  ;;  %v498_v43 = vshll.u32 %v3777_v62, 16  ;;  %v3387_v51 = vld [vmem:[%s4498_s1 + $0x88] sm:$0xff]   ;;  %v2627_v22 = vrot.slane %v3577_v12, 9 }
  0x3b   : > { %v464_v18 = vrot.slane %v463_v54, 4  ;;  %v497_v54 = vrot.slane %v495_v37, 4  ;;  %v920_v23 = vrot.slane %v918_v9, 4  ;;  %v925_v37 = vrot.slane %v3596_v24, 5 }
  0x3c   : > { %3076 = vmatpush3.bf16.msra.mxu0 %v3377_v2  ;;  %3029 = vmatprep.mubr.bf16.mxu0 %v3779_v63  ;;  %v486_v2 = vrot.slane %v484_v11, 4  ;;  %v500_v5 = vrot.slane %v498_v43, 5  ;;  %v506_v11 = vrot.slane %v504_v44, 5  ;;  %v3390_v43 = vld [vmem:[%s4498_s1 + $0xc0] sm:$0xff]   ;;  %v932_v44 = vrot.slane %v3640_v56, 5  ;;  %v3391_v56 = vld [vmem:[%s4498_s1 + $0x138] sm:$0xff]  }
  0x3d   : > { %3108 = vmatpush3.bf16.msra.mxu1 %v3378_v16  ;;  %3077 = vmatprep.subr.bf16.mxu0 %v3381_v36  ;;  %v3801_v16 = vcombine.low %v3763_v48, %v3766_v50  ;;  %v469_v31 = vsel %vm3613_vm2, %v464_v18, %v468_v39  ;;  %v478_v39 = vrot.slane %v477_v32, 4  ;;  %v3388_v18 = vld [vmem:[%s4498_s1 + $0xc8] sm:$0xff]   ;;  %v516_v32 = vrot.slane %v514_v60, 5 }
  0x3e   : > { %3109 = vmatprep.subr.bf16.mxu1 %v3382_v42  ;;  %v3806_v38 = vcombine.low %v459_v28, %v469_v31  ;;  %v487_v34 = vor.u32 %v486_v2, %v482_v29  ;;  %v501_v28 = vor.u32 %v500_v5, %v497_v54  ;;  %v3830_v2 = vcombine.low %v3777_v62, %v3787_v17 }
  0x3f   : > { %v922_v24 = vsel %vm3834_vm5, %v920_v23, %v921_v52  ;;  %v927_v14 = vrot.slane %v925_v37, 4  ;;  %v934_v60 = vrot.slane %v932_v44, 4  ;;  %v939_v5 = vrot.slane %v3661_v7, 5  ;;  %v3393_v23 = vld [vmem:[%s4498_s1 + $0x130] sm:$0xff]  }
  0x40   : > { %3062 = vmatmul.mubr.bf16.gmra.mxu1 %v3760_v45  ;;  %3078 = vmatpush3.bf16.msra.mxu0 %v3381_v36  ;;  %v488_v1 = vrot.slane %v487_v34, 4  ;;  %v483_v36 = vsel %vm3613_vm2, %v478_v39, %v482_v29  ;;  %v3389_v34 = vld [vmem:[%s4498_s1 + $0x80] sm:$0xff]   ;;  %v928_v39 = vrot.slane %v3599_v25, 5  ;;  %v2630_v7 = vrot.slane %v3654_v3, 9 }
  0x41   : > { %3110 = vmatpush3.bf16.msra.mxu1 %v3382_v42  ;;  %3030 = vmatmul.mubr.bf16.gmra.mxu0 %v3806_v38  ;;  %v510_v42 = vrot.slane %v508_v59, 4  ;;  %v2628_v59 = vrot.slane %v3591_v20, 9  ;;  %v3392_v20 = vld [vmem:[%s4498_s1 + $0x178] sm:$0xff]  }
  0x42   : > { %3079 = vmatprep.subr.bf16.mxu0 %v3383_v4  ;;  %3111 = vmatprep.subr.bf16.mxu1 %v3384_v19  ;;  %v493_v26 = vsel %vm3613_vm2, %v488_v1, %v492_v33  ;;  %v502_v33 = vrot.slane %v501_v28, 4  ;;  %v929_v1 = vsel %vm3834_vm5, %v927_v14, %v928_v39  ;;  %v2631_v28 = vrot.slane %v3691_v41, 9  ;;  %v3398_v41 = vld [vmem:[%s4498_s1 + $0x160] sm:$0xff]  }
  0x43   : > { %3065 = vmatprep.mubr.bf16.mxu1 %v3801_v16  ;;  %v3838_v12 = vcombine.low %v483_v36, %v493_v26  ;;  %v511_v31 = vor.u32 %v510_v42, %v506_v11  ;;  %v941_v42 = vrot.slane %v939_v5, 4  ;;  %v940_v3 = vsel %vm3834_vm5, %v2630_v7, %v939_v5  ;;  %v3405_v5 = vld [vmem:[%s4498_s1 + $0x148] sm:$0xff]  }
  0x44   : > { %3080 = vmatpush3.bf16.msra.mxu0 %v3383_v4  ;;  %v507_v54 = vsel %vm3613_vm2, %v502_v33, %v506_v11  ;;  %v953_v33 = vrot.slane %v3721_v0, 5  ;;  %v3397_v0 = vld [vmem:[%s4498_s1 + $0x120] sm:$0xff]   ;;  %v967_v14 = vrot.slane %v3787_v17, 5 }
  0x45   : > { %3112 = vmatpush3.bf16.msra.mxu1 %v3384_v19  ;;  %3081 = vmatprep.subr.bf16.mxu0 %v3387_v51  ;;  %v512_v4 = vrot.slane %v511_v31, 4  ;;  %v919_v19 = vsel %vm3834_vm5, %v2627_v22, %v918_v9  ;;  %v2629_v9 = vrot.slane %v3637_v55, 9  ;;  %v926_v55 = vsel %vm3834_vm5, %v2628_v59, %v925_v37  ;;  %v3395_v37 = vld [vmem:[%s4498_s1 + $0x128] sm:$0xff]   ;;  %v3964_v17 = vld [vmem:[%s3568_s30 + $0x64] sm:$0xf] }
  0x46   : > { %3113 = vmatprep.subr.bf16.mxu1 %v3388_v18  ;;  %3033 = vmatprep.mubr.bf16.mxu0 %v3838_v12  ;;  %v2651_v25 = vcombine.low %v919_v19, %v922_v24  ;;  %v3889_v36 = vcombine.low %v926_v55, %v929_v1  ;;  %v942_v22 = vrot.slane %v3664_v8, 5  ;;  %v2632_v19 = vrot.slane %v3716_v58, 9  ;;  %v3401_v1 = vld [vmem:[%s4498_s1 + $0x110] sm:$0xff]  }
  0x47   : > { %v517_v13 = vsel %vm3613_vm2, %v512_v4, %v516_v32  ;;  %v949_v32 = vrot.slane %v3704_v47, 5  ;;  %v955_v24 = vrot.slane %v953_v33, 4  ;;  %v963_v58 = vrot.slane %v3772_v57, 5  ;;  %v3402_v57 = vld [vmem:[%s4498_s1 + $0x150] sm:$0xff]  }
  0x48   : > { %3066 = vmatmul.mubr.bf16.gmra.mxu1 %v3830_v2  ;;  %3082 = vmatpush3.bf16.msra.mxu0 %v3387_v51  ;;  %v3865_v52 = vcombine.low %v507_v54, %v517_v13  ;;  %v935_v51 = vrot.slane %v3646_v61, 5  ;;  %v3394_v61 = vld [vmem:[%s4498_s1 + $0x170] sm:$0xff]   ;;  %v943_v8 = vsel %vm3834_vm5, %v941_v42, %v942_v22  ;;  %v2633_v54 = vrot.slane %v3763_v48, 9  ;;  %v3399_v48 = vld [vmem:[%s4498_s1 + $0x118] sm:$0xff]   ;;  %v3406_v42 = vld [vmem:[%s4498_s1 + $0x100] sm:$0xff]  }
  0x49   : > { %3114 = vmatpush3.bf16.msra.mxu1 %v3388_v18  ;;  %3083 = vmatprep.subr.bf16.mxu0 %v3389_v34  ;;  %v946_v18 = vrot.slane %v3701_v46, 5  ;;  %v3396_v46 = vld [vmem:[%s4498_s1 + $0x168] sm:$0xff]   ;;  %v3923_v4 = vcombine.low %v940_v3, %v943_v8  ;;  %v970_v55 = vrot.slane %v3794_v27, 5  ;;  %v3409_v22 = vld [vmem:[%s4498_s1 + $0x1f8] sm:$0xff]   ;;  %v1376_v3 = vshll.u32 %v3964_v17, 16 }
  0x4a   : > { %3115 = vmatprep.subr.bf16.mxu1 %v3390_v43  ;;  %3117 = vmatprep.mubr.bf16.mxu1 %v3631_v53  ;;  %v933_v53 = vsel %vm3834_vm5, %v2629_v9, %v932_v44  ;;  %v936_v11 = vsel %vm3834_vm5, %v934_v60, %v935_v51  ;;  %v956_v44 = vrot.slane %v3734_v15, 5  ;;  %v954_v15 = vsel %vm3834_vm5, %v2632_v19, %v953_v33  ;;  %v3404_v27 = vld [vmem:[%s4498_s1 + $0x108] sm:$0xff]  }
  0x4b   : > { %3034 = vmatmul.mubr.bf16.gmra.mxu0 %v3865_v52  ;;  %v3898_v26 = vcombine.low %v933_v53, %v936_v11  ;;  %v948_v31 = vrot.slane %v946_v18, 4  ;;  %v947_v47 = vsel %vm3834_vm5, %v2631_v28, %v946_v18  ;;  %v969_v51 = vrot.slane %v967_v14, 4  ;;  %v3407_v18 = vld [vmem:[%s4498_s1 + $0x140] sm:$0xff]   ;;  %v3412_v8 = vld [vmem:[%s4498_s1 + $0x1a8] sm:$0xff]  }
  0x4c   : > { %3084 = vmatpush3.bf16.msra.mxu0 %v3389_v34  ;;  %3085 = vmatprep.mubr.bf16.mxu0 %v2651_v25  ;;  %v957_v13 = vsel %vm3834_vm5, %v955_v24, %v956_v44  ;;  %v303_v19 = vld [vmem:[%s3568_s30 + $0x68] sm:$0x1]  ;;  %v3417_v24 = vld [vmem:[%s4498_s1 + $0x1d8] sm:$0xff]  }
  0x4d   : > { %3116 = vmatpush3.bf16.msra.mxu1 %v3390_v43  ;;  %3133 = vmatprep.subr.bf16.mxu0 %v3391_v56  ;;  %v950_v34 = vsel %vm3834_vm5, %v948_v31, %v949_v32  ;;  %v960_v43 = vrot.slane %v3766_v50, 5  ;;  %v3400_v50 = vld [vmem:[%s4498_s1 + $0x158] sm:$0xff]   ;;  %v3960_v60 = vcombine.low %v954_v15, %v957_v13  ;;  %v971_v11 = vsel %vm3834_vm5, %v969_v51, %v970_v55 }
  0x4e   : > { %3165 = vmatprep.subr.bf16.mxu1 %v3392_v20  ;;  %v3931_v39 = vcombine.low %v947_v47, %v950_v34  ;;  %v1380_v32 = vshrl.u32 %v3964_v17, 16  ;;  %v1378_v47 = vrot.slane %v1376_v3, 5  ;;  %v1578_v15 = vrot.slane %v303_v19, 5  ;;  %v3416_v13 = vld [vmem:[%s4498_s1 + $0x198] sm:$0xff]   ;;  %v3427_v3 = vld [vmem:[%s4498_s1 + $0x220] sm:$0xff]  }
  0x4f   : > { %v962_v59 = vrot.slane %v960_v43, 4  ;;  %v961_v9 = vsel %vm3834_vm5, %v2633_v54, %v960_v43  ;;  %v1575_v43 = vrot.slane %v3964_v17, 5  ;;  %v1386_v54 = vshll.u32 %v303_v19, 16 }
  0x50   : > { %3118 = vmatmul.mubr.bf16.vlgmr.msra.gmra.mxu1 %v3682_v30  ;;  %v1382_v34 = vrot.slane %v1380_v32, 4 }
  0x51   : > { %3166 = vmatpush3.bf16.msra.mxu1 %v3392_v20  ;;  %3121 = vmatprep.mubr.bf16.mxu1 %v3688_v40  ;;  %v964_v25 = vsel %vm3834_vm5, %v962_v59, %v963_v58  ;;  %v3958_v20 = vld [vmem:[%s3568_s30 + $0x60] sm:$0xf]  ;;  %v1577_v58 = vrot.slane %v1575_v43, 4 }
  0x52   : > { %3167 = vmatprep.subr.bf16.mxu1 %v3394_v61  ;;  %v1367_v28 = vshrl.u32 %v3958_v20, 16  ;;  %v1370_v31 = vshll.u32 %v3958_v20, 16  ;;  %v2717_v59 = vrot.slane %v3958_v20, 9 }
  0x53   : > { %3086 = vmatmul.mubr.bf16.vlgmr.msra.gmra.mxu0 %v3889_v36 }
  0x54   : > { %3134 = vmatpush3.bf16.msra.mxu0 %v3391_v56  ;;  %3089 = vmatprep.mubr.bf16.mxu0 %v3898_v26  ;;  %v2634_v56 = vrot.slane %v3777_v62, 9  ;;  %v3970_v62 = vcombine.low %v961_v9, %v964_v25  ;;  %v1369_v33 = vrot.slane %v1367_v28, 4  ;;  %v1388_v9 = vrot.slane %v1386_v54, 5 }
  0x55   : > { %3168 = vmatpush3.bf16.msra.mxu1 %v3394_v61  ;;  %3135 = vmatprep.subr.bf16.mxu0 %v3393_v23  ;;  %v3979_v61 = vcombine.low %v3958_v20, %v3964_v17  ;;  %v1576_v25 = vsel %vm3834_vm5, %v2717_v59, %v1575_v43  ;;  %v3418_v20 = vld [vmem:[%s4498_s1 + $0x190] sm:$0xff]   ;;  %v3421_v17 = vld [vmem:[%s4498_s1 + $0x1c8] sm:$0xff]  }
  0x56   : > { %3169 = vmatprep.subr.bf16.mxu1 %v3396_v46  ;;  %v968_v53 = vsel %vm3834_vm5, %v2634_v56, %v967_v14  ;;  %v1579_v56 = vsel %vm3834_vm5, %v1577_v58, %v1578_v15 }
  0x57   : > { %v3992_v7 = vcombine.low %v968_v53, %v971_v11  ;;  %v4062_v51 = vcombine.low %v1576_v25, %v1579_v56  ;;  %v3422_v11 = vld [vmem:[%s4498_s1 + $0x180] sm:$0xff]  }
  0x58   : > { %3122 = vmatmul.mubr.bf16.gmra.mxu1 %v3731_v6  ;;  %3136 = vmatpush3.bf16.msra.mxu0 %v3393_v23  ;;  %v3408_v23 = vld [vmem:[%s4498_s1 + $0x1b8] sm:$0xff]  }
  0x59   : > { %3170 = vmatpush3.bf16.msra.mxu1 %v3396_v46  ;;  %3137 = vmatprep.subr.bf16.mxu0 %v3395_v37  ;;  %v3411_v46 = vld [vmem:[%s4498_s1 + $0x1f0] sm:$0xff]  }
  0x5a   : > { %3171 = vmatprep.subr.bf16.mxu1 %v3398_v41  ;;  %3125 = vmatprep.mubr.bf16.mxu1 %v3760_v45 }
  0x5b   : > { %3090 = vmatmul.mubr.bf16.gmra.mxu0 %v3923_v4 }
  0x5c   : > { %3138 = vmatpush3.bf16.msra.mxu0 %v3395_v37  ;;  %3093 = vmatprep.mubr.bf16.mxu0 %v3931_v39  ;;  %v3415_v37 = vld [vmem:[%s4498_s1 + $0x1e0] sm:$0xff]  }
  0x5d   : > { %3172 = vmatpush3.bf16.msra.mxu1 %v3398_v41  ;;  %3139 = vmatprep.subr.bf16.mxu0 %v3397_v0  ;;  %v1372_v41 = vrot.slane %v1370_v31, 5 }
  0x5e   : > { %3173 = vmatprep.subr.bf16.mxu1 %v3400_v50 }
  0x5f   : > { %v1373_v44 = vor.u32 %v1372_v41, %v1369_v33 }
  0x60   : > { %3126 = vmatmul.mubr.bf16.gmra.mxu1 %v3801_v16  ;;  %3140 = vmatpush3.bf16.msra.mxu0 %v3397_v0  ;;  %v3414_v0 = vld [vmem:[%s4498_s1 + $0x1a0] sm:$0xff]  }
  0x61   : > { %3174 = vmatpush3.bf16.msra.mxu1 %v3400_v50  ;;  %3141 = vmatprep.subr.bf16.mxu0 %v3399_v48  ;;  %v1383_v50 = vor.u32 %v1382_v34, %v1378_v47  ;;  %v1374_v14 = vrot.slane %v1373_v44, 4 }
  0x62   : > { %3175 = vmatprep.subr.bf16.mxu1 %v3402_v57  ;;  %3129 = vmatprep.mubr.bf16.mxu1 %v3830_v2 }
  0x63   : > { %3094 = vmatmul.mubr.bf16.gmra.mxu0 %v3960_v60  ;;  %v1379_v55 = vsel %vm3613_vm2, %v1374_v14, %v1378_v47  ;;  %v3429_v47 = vld [vmem:[%s4498_s1 + $0x210] sm:$0xff]  }
  0x64   : > { %3142 = vmatpush3.bf16.msra.mxu0 %v3399_v48  ;;  %3097 = vmatprep.mubr.bf16.mxu0 %v3970_v62  ;;  %v3419_v48 = vld [vmem:[%s4498_s1 + $0x1d0] sm:$0xff]  }
  0x65   : > { %3176 = vmatpush3.bf16.msra.mxu1 %v3402_v57  ;;  %3143 = vmatprep.subr.bf16.mxu0 %v3401_v1  ;;  %v1384_v57 = vrot.slane %v1383_v50, 4 }
  0x66   : > { %3177 = vmatprep.subr.bf16.mxu1 %v3405_v5 }
  0x68   : > { %3130 = vmatmul.mubr.bf16.gmra.mxu1 %v3979_v61  ;;  %3144 = vmatpush3.bf16.msra.mxu0 %v3401_v1  ;;  %v1389_v1 = vsel %vm3613_vm2, %v1384_v57, %v1388_v9 }
  0x69   : > { %3178 = vmatpush3.bf16.msra.mxu1 %v3405_v5  ;;  %3145 = vmatprep.subr.bf16.mxu0 %v3404_v27  ;;  %v3420_v5 = vld [vmem:[%s4498_s1 + $0x188] sm:$0xff]   ;;  %v4075_v53 = vcombine.low %v1379_v55, %v1389_v1 }
  0x6a   : > { %3179 = vmatprep.subr.bf16.mxu1 %v3407_v18  ;;  %3181 = vmatprep.mubr.bf16.mxu1 %v3889_v36  ;;  %v3410_v36 = vld [vmem:[%s4498_s1 + $0x1b0] sm:$0xff]  }
  0x6b   : > { %3098 = vmatmul.mubr.bf16.gmra.mxu0 %v3992_v7 }
  0x6c   : > { %3146 = vmatpush3.bf16.msra.mxu0 %v3404_v27  ;;  %3149 = vmatprep.mubr.bf16.mxu0 %v3667_v10  ;;  %v3413_v10 = vld [vmem:[%s4498_s1 + $0x1e8] sm:$0xff]   ;;  %v3423_v27 = vld [vmem:[%s4498_s1 + $0x1c0] sm:$0xff]  }
  0x6d   : > { %3180 = vmatpush3.bf16.msra.mxu1 %v3407_v18  ;;  %3147 = vmatprep.subr.bf16.mxu0 %v3406_v42  ;;  %v3424_v18 = vld [vmem:[%s4498_s1 + $0x238] sm:$0xff]  }
  0x6e   : > { %3229 = vmatprep.subr.bf16.mxu1 %v3409_v22 }
  0x70   : > { %3182 = vmatmul.mubr.bf16.vlgmr.msra.gmra.mxu1 %v3898_v26  ;;  %3148 = vmatpush3.bf16.msra.mxu0 %v3406_v42  ;;  %v3425_v42 = vld [vmem:[%s4498_s1 + $0x230] sm:$0xff]  }
  0x71   : > { %3230 = vmatpush3.bf16.msra.mxu1 %v3409_v22  ;;  %3197 = vmatprep.subr.bf16.mxu0 %v3408_v23  ;;  %v4091_v22 = vld [vmem:[%s3568_s30 + $0x6c] sm:$0xf] }
  0x72   : > { %3231 = vmatprep.subr.bf16.mxu1 %v3411_v46  ;;  %3185 = vmatprep.mubr.bf16.mxu1 %v3923_v4 }
  0x73   : > { %3150 = vmatmul.mubr.bf16.vlgmr.msra.gmra.mxu0 %v3707_v49 }
  0x74   : > { %3198 = vmatpush3.bf16.msra.mxu0 %v3408_v23  ;;  %3153 = vmatprep.mubr.bf16.mxu0 %v3742_v21  ;;  %v4094_v23 = vld [vmem:[%s3568_s30 + $0x70] sm:$0xf] }
  0x75   : > { %3232 = vmatpush3.bf16.msra.mxu1 %v3411_v46  ;;  %3199 = vmatprep.subr.bf16.mxu0 %v3410_v36  ;;  %v1950_v46 = vshll.u32 %v4091_v22, 16  ;;  %v2155_v43 = vrot.slane %v4094_v23, 5 }
  0x76   : > { %3233 = vmatprep.subr.bf16.mxu1 %v3413_v10 }
  0x77   : > { %v1952_v28 = vrot.slane %v1950_v46, 5 }
  0x78   : > { %3186 = vmatmul.mubr.bf16.gmra.mxu1 %v3931_v39  ;;  %3200 = vmatpush3.bf16.msra.mxu0 %v3410_v36  ;;  %v1960_v36 = vshrl.u32 %v4094_v23, 16 }
  0x79   : > { %3234 = vmatpush3.bf16.msra.mxu1 %v3413_v10  ;;  %3201 = vmatprep.subr.bf16.mxu0 %v3412_v8  ;;  %v3426_v10 = vld [vmem:[%s4498_s1 + $0x228] sm:$0xff]  }
  0x7a   : > { %3235 = vmatprep.subr.bf16.mxu1 %v3415_v37  ;;  %3189 = vmatprep.mubr.bf16.mxu1 %v3960_v60  ;;  %v1962_v32 = vrot.slane %v1960_v36, 4 }
  0x7b   : > { %3154 = vmatmul.mubr.bf16.gmra.mxu0 %v3779_v63 }
  0x7c   : > { %3202 = vmatpush3.bf16.msra.mxu0 %v3412_v8  ;;  %3157 = vmatprep.mubr.bf16.mxu0 %v3806_v38 }
  0x7d   : > { %3236 = vmatpush3.bf16.msra.mxu1 %v3415_v37  ;;  %3203 = vmatprep.subr.bf16.mxu0 %v3414_v0 }
  0x7e   : > { %3237 = vmatprep.subr.bf16.mxu1 %v3417_v24 }
  0x80   : > { %3190 = vmatmul.mubr.bf16.gmra.mxu1 %v3970_v62  ;;  %3204 = vmatpush3.bf16.msra.mxu0 %v3414_v0 }
  0x81   : > { %3238 = vmatpush3.bf16.msra.mxu1 %v3417_v24  ;;  %3205 = vmatprep.subr.bf16.mxu0 %v3416_v13 }
  0x82   : > { %3239 = vmatprep.subr.bf16.mxu1 %v3419_v48  ;;  %3193 = vmatprep.mubr.bf16.mxu1 %v3992_v7 }
  0x83   : > { %3158 = vmatmul.mubr.bf16.gmra.mxu0 %v3838_v12 }
  0x84   : > { %3206 = vmatpush3.bf16.msra.mxu0 %v3416_v13  ;;  %3161 = vmatprep.mubr.bf16.mxu0 %v3865_v52 }
  0x85   : > { %3240 = vmatpush3.bf16.msra.mxu1 %v3419_v48  ;;  %3207 = vmatprep.subr.bf16.mxu0 %v3418_v20 }
  0x86   : > { %3241 = vmatprep.subr.bf16.mxu1 %v3421_v17 }
  0x88   : > { %3194 = vmatmul.mubr.bf16.gmra.mxu1 %v4062_v51  ;;  %3208 = vmatpush3.bf16.msra.mxu0 %v3418_v20 }
  0x89   : > { %3242 = vmatpush3.bf16.msra.mxu1 %v3421_v17  ;;  %3209 = vmatprep.subr.bf16.mxu0 %v3420_v5 }
  0x8a   : > { %3243 = vmatprep.subr.bf16.mxu1 %v3423_v27  ;;  %3245 = vmatprep.mubr.bf16.mxu1 %v3707_v49  ;;  %v1947_v49 = vshrl.u32 %v4091_v22, 16 }
  0x8b   : > { %3162 = vmatmul.mubr.bf16.gmra.mxu0 %v4075_v53 }
  0x8c   : > { %3210 = vmatpush3.bf16.msra.mxu0 %v3420_v5  ;;  %3213 = vmatprep.mubr.bf16.mxu0 %v3682_v30  ;;  %v1956_v30 = vshll.u32 %v4094_v23, 16 }
  0x8d   : > { %3244 = vmatpush3.bf16.msra.mxu1 %v3423_v27  ;;  %3211 = vmatprep.subr.bf16.mxu0 %v3422_v11 }
  0x8e   : > { %3293 = vmatprep.subr.bf16.mxu1 %v3424_v18  ;;  %v1958_v31 = vrot.slane %v1956_v30, 5 }
  0x90   : > { %3246 = vmatmul.mubr.bf16.vlgmr.msra.gmra.mxu1 %v3742_v21  ;;  %3212 = vmatpush3.bf16.msra.mxu0 %v3422_v11  ;;  %v1949_v21 = vrot.slane %v1947_v49, 4  ;;  %v1963_v8 = vor.u32 %v1962_v32, %v1958_v31 }
  0x91   : > { %3301 = vmatpush3.bf16.msra.mxu1 %v3424_v18  ;;  %3261 = vmatprep.subr.bf16.mxu0 %v3424_v18 }
  0x92   : > { %3294 = vmatprep.subr.bf16.mxu1 %v3425_v42  ;;  %3249 = vmatprep.mubr.bf16.mxu1 %v3779_v63  ;;  %v306_v63 = vld [vmem:[%s3568_s30 + $0x74] sm:$0x1]  ;;  %v1964_v41 = vrot.slane %v1963_v8, 4 }
  0x93   : > { %3214 = vmatmul.mubr.bf16.vlgmr.msra.gmra.mxu0 %v3688_v40  ;;  %v1953_v40 = vor.u32 %v1952_v28, %v1949_v21  ;;  %v1966_v37 = vshll.u32 %v306_v63, 16  ;;  %v2158_v0 = vrot.slane %v306_v63, 5 }
  0x94   : > { %3262 = vmatpush3.bf16.msra.mxu0 %v3424_v18  ;;  %3217 = vmatprep.mubr.bf16.mxu0 %v3731_v6  ;;  %v3428_v6 = vld [vmem:[%s4498_s1 + $0x218] sm:$0xff]  }
  0x95   : > { %3302 = vmatpush3.bf16.msra.mxu1 %v3425_v42  ;;  %3263 = vmatprep.subr.bf16.mxu0 %v3425_v42  ;;  %v1954_v33 = vrot.slane %v1953_v40, 4 }
  0x96   : > { %3295 = vmatprep.subr.bf16.mxu1 %v3426_v10 }
  0x98   : > { %3250 = vmatmul.mubr.bf16.gmra.mxu1 %v3806_v38  ;;  %3264 = vmatpush3.bf16.msra.mxu0 %v3425_v42  ;;  %v1968_v38 = vrot.slane %v1966_v37, 5 }
  0x99   : > { %3303 = vmatpush3.bf16.msra.mxu1 %v3426_v10  ;;  %3265 = vmatprep.subr.bf16.mxu0 %v3426_v10 }
  0x9a   : > { %3296 = vmatprep.subr.bf16.mxu1 %v3427_v3  ;;  %3253 = vmatprep.mubr.bf16.mxu1 %v3838_v12  ;;  %v1969_v12 = vsel %vm3613_vm2, %v1964_v41, %v1968_v38 }
  0x9b   : > { %3218 = vmatmul.mubr.bf16.gmra.mxu0 %v3760_v45  ;;  %v1959_v45 = vsel %vm3613_vm2, %v1954_v33, %v1958_v31 }
  0x9c   : > { %3266 = vmatpush3.bf16.msra.mxu0 %v3426_v10  ;;  %3221 = vmatprep.mubr.bf16.mxu0 %v3801_v16  ;;  %v3431_v16 = vld [vmem:[%s4498_s1 + $0x208] sm:$0xff]   ;;  %v2784_v34 = vcombine.low %v1959_v45, %v1969_v12 }
  0x9d   : > { %3304 = vmatpush3.bf16.msra.mxu1 %v3427_v3  ;;  %3267 = vmatprep.subr.bf16.mxu0 %v3427_v3 }
  0x9e   : > { %3297 = vmatprep.subr.bf16.mxu1 %v3428_v6 }
  0xa0   : > { %3254 = vmatmul.mubr.bf16.gmra.mxu1 %v3865_v52  ;;  %3268 = vmatpush3.bf16.msra.mxu0 %v3427_v3  ;;  %v2759_v52 = vcombine.low %v4091_v22, %v4094_v23 }
  0xa1   : > { %3305 = vmatpush3.bf16.msra.mxu1 %v3428_v6  ;;  %3269 = vmatprep.subr.bf16.mxu0 %v3428_v6 }
  0xa2   : > { %3298 = vmatprep.subr.bf16.mxu1 %v3429_v47  ;;  %3257 = vmatprep.mubr.bf16.mxu1 %v4075_v53 }
  0xa3   : > { %3222 = vmatmul.mubr.bf16.gmra.mxu0 %v3830_v2  ;;  %v2793_v2 = vrot.slane %v4091_v22, 9 }
  0xa4   : > { %3270 = vmatpush3.bf16.msra.mxu0 %v3428_v6  ;;  %3225 = vmatprep.mubr.bf16.mxu0 %v3979_v61  ;;  %v2157_v61 = vrot.slane %v2155_v43, 4 }
  0xa5   : > { %3306 = vmatpush3.bf16.msra.mxu1 %v3429_v47  ;;  %3271 = vmatprep.subr.bf16.mxu0 %v3429_v47  ;;  %v2156_v19 = vsel %vm3834_vm5, %v2793_v2, %v2155_v43 }
  0xa6   : > { %3299 = vmatprep.subr.bf16.mxu1 %v3431_v16 }
  0xa8   : > { %3258 = vmatmul.mubr.bf16.gmra.mxu1 %v2784_v34  ;;  %3272 = vmatpush3.bf16.msra.mxu0 %v3429_v47 }
  0xa9   : > { %3307 = vmatpush3.bf16.msra.mxu1 %v3431_v16  ;;  %3273 = vmatprep.subr.bf16.mxu0 %v3431_v16 }
  0xaa   : > { %3300 = vmatprep.subr.bf16.mxu1 %v3432_v35  ;;  %3285 = vmatprep.mubr.bf16.mxu1 %v3970_v62  ;;  %v2159_v62 = vsel %vm3834_vm5, %v2157_v61, %v2158_v0 }
  0xab   : > { %3226 = vmatmul.mubr.bf16.gmra.mxu0 %v2759_v52  ;;  %v2810_v24 = vcombine.low %v2156_v19, %v2159_v62 }
  0xac   : > { %3274 = vmatpush3.bf16.msra.mxu0 %v3431_v16  ;;  %3277 = vmatprep.mubr.bf16.mxu0 %v3898_v26 }
  0xad   : > { %3308 = vmatpush3.bf16.msra.mxu1 %v3432_v35  ;;  %3275 = vmatprep.subr.bf16.mxu0 %v3432_v35 }
  0xb0   : > { %3286 = vmatmul.mubr.bf16.vlgmr.msra.gmra.mxu1 %v3992_v7  ;;  %3276 = vmatpush3.bf16.msra.mxu0 %v3432_v35 }
  0xb1   : > { %3289 = vmatprep.mubr.bf16.mxu1 %v4062_v51 }
  0xb3   : > { %3278 = vmatmul.mubr.bf16.vlgmr.msra.gmra.mxu0 %v3923_v4 }
  0xb4   : > { %3281 = vmatprep.mubr.bf16.mxu0 %v3931_v39 }
  0xb8   : > { %3290 = vmatmul.mubr.bf16.gmra.mxu1 %v2810_v24 }
  0xbb   : > { %3282 = vmatmul.mubr.bf16.gmra.mxu0 %v3960_v60 }
  0xef   : > { %v3023_v26 = vpop.f32.mrf.mxu0 }
  0xf0   : > { %v3055_v44 = vpop.f32.mrf.mxu1 }
  0xf1   : > { %v851_v7 = vadd.f32 %v3055_v44, %v3023_v26  ;;  %v649_v50 = vpop.f32.mrf.mxu0 }
  0xf2   : > { %v842_v54 = vpop.f32.mrf.mxu1 }
  0xf3   : > { %v843_v59 = vadd.f32 %v842_v54, %v649_v50  ;;  %v3024_v58 = vpop.f32.mrf.mxu0 }
  0xf4   : > { %v3056_v15 = vpop.f32.mrf.mxu1 }
  0xf5   : > { %v854_v13 = vadd.f32 %v3056_v15, %v3024_v58  ;;  %v652_v48 = vpop.f32.mrf.mxu0 }
  0xf6   : > { %v845_v29 = vpop.f32.mrf.mxu1 }
  0xf7   : > { %v846_v14 = vadd.f32 %v845_v29, %v652_v48  ;;  %v3027_v57 = vpop.f32.mrf.mxu0 }
  0xf8   : > { %v3059_v4 = vpop.f32.mrf.mxu1 }
  0xf9   : > { %v867_v9 = vadd.f32 %v3059_v4, %v3027_v57  ;;  %v665_v25 = vpop.f32.mrf.mxu0 }
  0xfa   : > { %v858_v39 = vpop.f32.mrf.mxu1 }
  0xfb   : > { %v859_v56 = vadd.f32 %v858_v39, %v665_v25  ;;  %v3028_v20 = vpop.f32.mrf.mxu0 }
  0xfc   : > { %v3060_v60 = vpop.f32.mrf.mxu1 }
  0xfd   : > { %v870_v17 = vadd.f32 %v3060_v60, %v3028_v20  ;;  %v668_v51 = vpop.f32.mrf.mxu0 }
  0xfe   : > { %v861_v55 = vpop.f32.mrf.mxu1 }
  0xff   : > { %v862_v1 = vadd.f32 %v861_v55, %v668_v51 }
 0x100   : > { %v3063_v5 = vpop.f32.mrf.mxu1 }
 0x101   : > { %v3031_v27 = vpop.f32.mrf.mxu0 }
 0x102   : > { %v874_v53 = vpop.f32.mrf.mxu1  ;;  %v883_v11 = vadd.f32 %v3063_v5, %v3031_v27 }
 0x103   : > { %v681_v18 = vpop.f32.mrf.mxu0 }
 0x104   : > { %v3064_v42 = vpop.f32.mrf.mxu1  ;;  %v875_v22 = vadd.f32 %v874_v53, %v681_v18 }
 0x105   : > { %v3032_v23 = vpop.f32.mrf.mxu0 }
 0x106   : > { %v877_v49 = vpop.f32.mrf.mxu1  ;;  %v886_v46 = vadd.f32 %v3064_v42, %v3032_v23 }
 0x107   : > { %v684_v36 = vpop.f32.mrf.mxu0 }
 0x108   : > { %v3067_v30 = vpop.f32.mrf.mxu1  ;;  %v878_v10 = vadd.f32 %v877_v49, %v684_v36 }
 0x10a   : > { %v890_v21 = vpop.f32.mrf.mxu1 }
 0x10b   : > { %v3035_v28 = vpop.f32.mrf.mxu0 }
 0x10c   : > { %v3068_v31 = vpop.f32.mrf.mxu1  ;;  %v899_v32 = vadd.f32 %v3067_v30, %v3035_v28 }
 0x10d   : > { %v697_v3 = vpop.f32.mrf.mxu0 }
 0x10e   : > { %v893_v63 = vpop.f32.mrf.mxu1  ;;  %v891_v40 = vadd.f32 %v890_v21, %v697_v3 }
 0x10f   : > { %v3036_v8 = vpop.f32.mrf.mxu0 }
 0x110   : > { %v3119_v37 = vpop.f32.mrf.mxu1  ;;  %v902_v6 = vadd.f32 %v3068_v31, %v3036_v8 }
 0x111   : > { %v700_v33 = vpop.f32.mrf.mxu0 }
 0x112   : > { %v1287_v41 = vpop.f32.mrf.mxu1  ;;  %v4150_v38 = vadd.f32 %v893_v63, %v700_v33 }
 0x113   : > { %v3087_v47 = vpop.f32.mrf.mxu0 }
 0x114   : > { %v3120_v45 = vpop.f32.mrf.mxu1  ;;  %v1168_v12 = vadd.f32 %v3087_v47, %v851_v7 }
 0x115   : > { %v1103_v16 = vpop.f32.mrf.mxu0 }
 0x116   : > { %v1290_v34 = vpop.f32.mrf.mxu1  ;;  %v4152_v35 = vadd.f32 %v3119_v37, %v1168_v12  ;;  %v1166_v52 = vadd.f32 %v1103_v16, %v843_v59 }
 0x117   : > { %v3088_v43 = vpop.f32.mrf.mxu0 }
 0x118   : > { %v3123_v2 = vpop.f32.mrf.mxu1  ;;  %v4154_v61 = vadd.f32 %v1287_v41, %v1166_v52  ;;  %v1169_v0 = vadd.f32 %v3088_v43, %v854_v13 }
 0x119   : > { %v1106_v19 = vpop.f32.mrf.mxu0 }
 0x11a   : > { %v1303_v62 = vpop.f32.mrf.mxu1  ;;  %v4156_v24 = vadd.f32 %v3120_v45, %v1169_v0  ;;  %v1167_v26 = vadd.f32 %v1106_v19, %v846_v14 }
 0x11b   : > { %v3091_v44 = vpop.f32.mrf.mxu0 }
 0x11c   : > { %v3124_v50 = vpop.f32.mrf.mxu1  ;;  %v4158_v54 = vadd.f32 %v1290_v34, %v1167_v26  ;;  %v1172_v7 = vadd.f32 %v3091_v44, %v867_v9 }
 0x11d   : > { %v1119_v58 = vpop.f32.mrf.mxu0 }
 0x11e   : > { %v1306_v15 = vpop.f32.mrf.mxu1  ;;  %v4160_v48 = vadd.f32 %v3123_v2, %v1172_v7  ;;  %v1170_v59 = vadd.f32 %v1119_v58, %v859_v56 }
 0x11f   : > { %v3092_v29 = vpop.f32.mrf.mxu0 }
 0x120   : > { %v3127_v57 = vpop.f32.mrf.mxu1  ;;  %v4162_v4 = vadd.f32 %v1303_v62, %v1170_v59  ;;  %v1173_v13 = vadd.f32 %v3092_v29, %v870_v17 }
 0x121   : > { %v1122_v25 = vpop.f32.mrf.mxu0 }
 0x122   : > { %v1319_v39 = vpop.f32.mrf.mxu1  ;;  %v4164_v20 = vadd.f32 %v3124_v50, %v1173_v13  ;;  %v1171_v14 = vadd.f32 %v1122_v25, %v862_v1 }
 0x123   : > { %v3095_v60 = vpop.f32.mrf.mxu0 }
 0x124   : > { %v3128_v51 = vpop.f32.mrf.mxu1  ;;  %v4166_v55 = vadd.f32 %v1306_v15, %v1171_v14  ;;  %v1176_v9 = vadd.f32 %v3095_v60, %v883_v11 }
 0x125   : > { %v1135_v5 = vpop.f32.mrf.mxu0 }
 0x126   : > { %v1322_v27 = vpop.f32.mrf.mxu1  ;;  %v4168_v53 = vadd.f32 %v3127_v57, %v1176_v9  ;;  %v1174_v56 = vadd.f32 %v1135_v5, %v875_v22 }
 0x127   : > { %v3096_v18 = vpop.f32.mrf.mxu0 }
 0x128   : > { %v3131_v42 = vpop.f32.mrf.mxu1  ;;  %v4170_v23 = vadd.f32 %v1319_v39, %v1174_v56  ;;  %v1177_v17 = vadd.f32 %v3096_v18, %v886_v46 }
 0x129   : > { %v1138_v49 = vpop.f32.mrf.mxu0 }
 0x12a   : > { %v1335_v36 = vpop.f32.mrf.mxu1  ;;  %v4172_v30 = vadd.f32 %v3128_v51, %v1177_v17  ;;  %v1175_v1 = vadd.f32 %v1138_v49, %v878_v10 }
 0x12b   : > { %v3099_v21 = vpop.f32.mrf.mxu0 }
 0x12c   : > { %v3132_v28 = vpop.f32.mrf.mxu1  ;;  %v4174_v31 = vadd.f32 %v1322_v27, %v1175_v1  ;;  %v1180_v11 = vadd.f32 %v3099_v21, %v899_v32 }
 0x12d   : > { %v1151_v3 = vpop.f32.mrf.mxu0 }
 0x12e   : > { %v1338_v63 = vpop.f32.mrf.mxu1  ;;  %v4176_v8 = vadd.f32 %v3131_v42, %v1180_v11  ;;  %v1178_v22 = vadd.f32 %v1151_v3, %v891_v40 }
 0x12f   : > { %v3100_v37 = vpop.f32.mrf.mxu0 }
 0x130   : > { %v4178_v33 = vpop.f32.mrf.mxu1  ;;  %v4180_v41 = vadd.f32 %v1335_v36, %v1178_v22  ;;  %v1181_v46 = vadd.f32 %v3100_v37, %v902_v6 }
 0x131   : > { %v1154_v47 = vpop.f32.mrf.mxu0 }
 0x132   : > { %v4182_v45 = vpop.f32.mrf.mxu1  ;;  %v4184_v10 = vadd.f32 %v3132_v28, %v1181_v46  ;;  %v1179_v12 = vadd.f32 %v1154_v47, %v4150_v38  ;;  %v4283_v47 = vld [vmem:[%s263_s7 + $0x8] sm:$0xff]  }
 0x133   : > { %v4187_v16 = vpop.f32.mrf.mxu0 }
 0x134   : > { %v4189_v32 = vpop.f32.mrf.mxu1  ;;  %v4191_v34 = vadd.f32 %v1338_v63, %v1179_v12  ;;  %v4285_v12 = vld [vmem:[%s263_s7 + $0x28] sm:$0xff]  }
 0x135   : > { %v4193_v40 = vpop.f32.mrf.mxu0 }
 0x136   : > { %v4195_v52 = vpop.f32.mrf.mxu1 }
 0x137   : > { %v4197_v43 = vpop.f32.mrf.mxu0 }
 0x138   : > { %v4199_v6 = vpop.f32.mrf.mxu1 }
 0x139   : > { %v4201_v2 = vpop.f32.mrf.mxu0 }
 0x13a   : > { %v4203_v0 = vpop.f32.mrf.mxu1 }
 0x13b   : > { %v4205_v38 = vpop.f32.mrf.mxu0 }
 0x13c   : > { %v4207_v19 = vpop.f32.mrf.mxu1 }
 0x13d   : > { %v4209_v62 = vpop.f32.mrf.mxu0 }
 0x13e   : > { %v4211_v26 = vpop.f32.mrf.mxu1 }
 0x13f   : > { %v4213_v44 = vpop.f32.mrf.mxu0 }
 0x140   : > { %v4215_v50 = vpop.f32.mrf.mxu1 }
 0x141   : > { %v4217_v7 = vpop.f32.mrf.mxu0 }
 0x142   : > { %v4219_v58 = vpop.f32.mrf.mxu1 }
 0x143   : > { %v3159_v15 = vpop.f32.mrf.mxu0 }
 0x144   : > { %v4221_v59 = vpop.f32.mrf.mxu1 }
 0x145   : > { %v4223_v29 = vpop.f32.mrf.mxu0 }
 0x146   : > { %v4225_v57 = vpop.f32.mrf.mxu1 }
 0x147   : > { %v4227_v13 = vpop.f32.mrf.mxu0 }
 0x148   : > { %v4229_v25 = vpop.f32.mrf.mxu1 }
 0x149   : > { %v4232_v39 = vpop.f32.mrf.mxu0 }
 0x14a   : > { %v4234_v14 = vpop.f32.mrf.mxu1 }
 0x14b   : > { %4508 = vst [vmem:[#allocation2_spill] sm:$0xff] %v4234_v14  ;;  %v4236_v60 = vpop.f32.mrf.mxu0 }
 0x14c   : > { %v4238_v51 = vpop.f32.mrf.mxu1 }
 0x14d   : > { %4509 = vst [vmem:[#allocation3_spill] sm:$0xff] %v4238_v51  ;;  %v4240_v9 = vpop.f32.mrf.mxu0  ;;  %v4306_v51 = vld [vmem:[%s263_s7 + $0x10] sm:$0xff]  }
 0x14e   : > { %v4242_v5 = vpop.f32.mrf.mxu1 }
 0x14f   : > { %4510 = vst [vmem:[#allocation4_spill] sm:$0xff] %v4242_v5  ;;  %v4244_v27 = vpop.f32.mrf.mxu0 }
 0x150   : > { %v4246_v56 = vpop.f32.mrf.mxu1 }
 0x151   : > { %4511 = vst [vmem:[#allocation5_spill] sm:$0xff] %v4246_v56  ;;  %v4248_v18 = vpop.f32.mrf.mxu0 }
 0x152   : > { %v4250_v42 = vpop.f32.mrf.mxu1 }
 0x153   : > { %4512 = vst [vmem:[#allocation6_spill] sm:$0xff] %v4250_v42  ;;  %v4253_v17 = vpop.f32.mrf.mxu0 }
 0x154   : > { %v4255_v49 = vpop.f32.mrf.mxu1 }
 0x155   : > { %4513 = vst [vmem:[#allocation7_spill] sm:$0xff] %v4255_v49  ;;  %v4257_v36 = vpop.f32.mrf.mxu0  ;;  %v4293_v49 = vld [vmem:[%s263_s7 + $0x20] sm:$0xff]  }
 0x156   : > { %v4259_v1 = vpop.f32.mrf.mxu1 }
 0x157   : > { %4514 = vst [vmem:[#allocation8_spill] sm:$0xff] %v4259_v1  ;;  %v4263_v21 = vpop.f32.mrf.mxu0 }
 0x158   : > { %4515 = vst [vmem:[#allocation9_spill] sm:$0xff] %v4263_v21  ;;  %v4265_v28 = vpop.f32.mrf.mxu1  ;;  %v4312_v21 = vld [vmem:[%s263_s7 + $0x30] sm:$0xff]  }
 0x159   : > { %4516 = vst [vmem:[#allocation10_spill] sm:$0xff] %v4265_v28  ;;  %v4268_v11 = vpop.f32.mrf.mxu0  ;;  %v4287_v28 = vld [vmem:[%s263_s7] sm:$0xff]  }
 0x15a   : > { %4517 = vst [vmem:[#allocation11_spill] sm:$0xff] %v4268_v11  ;;  %v4270_v3 = vpop.f32.mrf.mxu1  ;;  %4523 = vst [vmem:[#allocation17_spill] sm:$0xff] %v4287_v28 }
 0x15b   : > { %4518 = vst [vmem:[#allocation12_spill] sm:$0xff] %v4270_v3  ;;  %v4272_v63 = vpop.f32.mrf.mxu0 }
 0x15c   : > { %4519 = vst [vmem:[#allocation13_spill] sm:$0xff] %v4272_v63  ;;  %v4274_v22 = vpop.f32.mrf.mxu1  ;;  %v4304_v63 = vld [vmem:[%s263_s7 + $0x38] sm:$0xff]  }
 0x15d   : > { %4520 = vst [vmem:[#allocation14_spill] sm:$0xff] %v4274_v22  ;;  %v4279_v37 = vpop.f32.mrf.mxu0  ;;  %v4295_v22 = vld [vmem:[%s263_s7 + $0x18] sm:$0xff]   ;;  %v2852_v11 = vunpack.c.l.bf16 %v4304_v63 }
 0x15e   : > { %4521 = vst [vmem:[#allocation15_spill] sm:$0xff] %v4279_v37  ;;  %v4281_v46 = vpop.f32.mrf.mxu1  ;;  %v1556_v37 = vadd.f32 %v4193_v40, %v4154_v61  ;;  %v1562_v61 = vadd.f32 %v4205_v38, %v4160_v48  ;;  %v1563_v38 = vadd.f32 %v4213_v44, %v4164_v20  ;;  %v1568_v44 = vadd.f32 %v4240_v9, %v4180_v41 }
 0x15f   : > { %4522 = vst [vmem:[#allocation16_spill] sm:$0xff] %v4281_v46  ;;  %v4289_v1 = vpop.f32.mrf.mxu0  ;;  %v1558_v46 = vadd.f32 %v4187_v16, %v4152_v35  ;;  %v1557_v35 = vadd.f32 %v4201_v2, %v4158_v54  ;;  %v2849_v54 = vunpack.c.h.bf16 %v4312_v21 }
 0x160   : > { %4524 = vst [vmem:[#allocation18_spill] sm:$0xff] %v4289_v1  ;;  %v4291_v3 = vpop.f32.mrf.mxu1  ;;  %v2848_v1 = vunpack.c.l.bf16 %v4312_v21  ;;  %v1746_v48 = vadd.f32 %v4182_v45, %v1556_v37  ;;  %v1752_v20 = vadd.f32 %v4199_v6, %v1562_v61 }
 0x161   : > { %4525 = vst [vmem:[#allocation19_spill] sm:$0xff] %v4291_v3  ;;  %v4297_v42 = vpop.f32.mrf.mxu0  ;;  %v1559_v3 = vadd.f32 %v4197_v43, %v4156_v24  ;;  %v1560_v24 = vadd.f32 %v4209_v62, %v4162_v4  ;;  %v2853_v43 = vunpack.c.h.bf16 %v4304_v63  ;;  %v1748_v2 = vadd.f32 %v4178_v33, %v1558_v46 }
 0x162   : > { %4526 = vst [vmem:[#allocation20_spill] sm:$0xff] %v4297_v42  ;;  %v4299_v56 = vpop.f32.mrf.mxu1  ;;  %v1566_v42 = vadd.f32 %v3159_v15, %v4168_v53  ;;  %v1564_v53 = vadd.f32 %v4223_v29, %v4170_v23  ;;  %v1561_v15 = vadd.f32 %v4217_v7, %v4166_v55  ;;  %v1567_v62 = vadd.f32 %v4227_v13, %v4172_v30 }
 0x163   : > { %4527 = vst [vmem:[#allocation21_spill] sm:$0xff] %v4299_v56  ;;  %v3223_v5 = vpop.f32.mrf.mxu0  ;;  %v1749_v4 = vadd.f32 %v4189_v32, %v1559_v3  ;;  %v1565_v33 = vadd.f32 %v4232_v39, %v4174_v31  ;;  %v1747_v45 = vadd.f32 %v4195_v52, %v1557_v35  ;;  %v1570_v55 = vadd.f32 %v4236_v60, %v4176_v8  ;;  %v4532_v46 = vld [vmem:[#allocation13_spill] sm:$0xff] }
 0x164   : > { %v4318_v56 = vpop.f32.mrf.mxu1  ;;  %v1756_v23 = vadd.f32 %v4215_v50, %v1566_v42  ;;  %v1750_v50 = vadd.f32 %v4203_v0, %v1560_v24  ;;  %v1754_v30 = vadd.f32 %v4219_v58, %v1564_v53  ;;  %v1571_v31 = vadd.f32 %v4244_v27, %v4184_v10  ;;  %v4529_v27 = vld [vmem:[#allocation9_spill] sm:$0xff]  ;;  %v4530_v42 = vld [vmem:[#allocation11_spill] sm:$0xff] }
 0x165   : > { %v1899_v16 = vpop.f32.mrf.mxu0  ;;  %v1753_v52 = vadd.f32 %v4207_v19, %v1563_v38  ;;  %v1751_v6 = vadd.f32 %v4211_v26, %v1561_v15  ;;  %v1569_v8 = vadd.f32 %v4248_v18, %v4191_v34  ;;  %v1932_v41 = vadd.f32 %v4253_v17, %v1748_v2  ;;  %v4531_v17 = vld [vmem:[#allocation3_spill] sm:$0xff]  ;;  %v4536_v53 = vld [vmem:[#allocation5_spill] sm:$0xff] }
 0x166   : > { %v4331_v40 = vpop.f32.mrf.mxu1  ;;  %v1940_v29 = vadd.f32 %v3223_v5, %v1756_v23  ;;  %v1757_v60 = vadd.f32 %v4221_v59, %v1567_v62  ;;  %v1755_v0 = vadd.f32 %v4225_v57, %v1565_v33  ;;  %v1930_v58 = vadd.f32 %v4257_v36, %v1746_v48  ;;  %v4528_v5 = vld [vmem:[#allocation2_spill] sm:$0xff]  ;;  %v4533_v59 = vld [vmem:[#allocation15_spill] sm:$0xff]  ;;  %v4535_v36 = vld [vmem:[#allocation4_spill] sm:$0xff] }
 0x167   : > { %v3224_v14 = vpop.f32.mrf.mxu0  ;;  %v1938_v9 = vadd.f32 %v1899_v16, %v1754_v30  ;;  %v1760_v10 = vadd.f32 %v4229_v25, %v1570_v55  ;;  %v1758_v19 = vadd.f32 %v4528_v5, %v1568_v44  ;;  %v1933_v26 = vadd.f32 %v4529_v27, %v1749_v4  ;;  %v4537_v2 = vld [vmem:[#allocation18_spill] sm:$0xff]  ;;  %v4541_v30 = vld [vmem:[#allocation7_spill] sm:$0xff] }
 0x168   : > { %v4347_v28 = vpop.f32.mrf.mxu1  ;;  %v1931_v3 = vadd.f32 %v4530_v42, %v1747_v45  ;;  %v1761_v37 = vadd.f32 %v4531_v17, %v1571_v31  ;;  %v1936_v35 = vadd.f32 %v4532_v46, %v1752_v20  ;;  %v1934_v61 = vadd.f32 %v4533_v59, %v1750_v50  ;;  %v4534_v57 = vld [vmem:[#allocation19_spill] sm:$0xff]  ;;  %v4389_v4 = vld [vmem:[%s4499_s2] ss:$0 sm:$0xff]  ;;  %v4544_v42 = vld [vmem:[#allocation12_spill] sm:$0xff] }
 0x169   : > { %v1902_v7 = vpop.f32.mrf.mxu0  ;;  %v2146_v24 = vadd.f32 %v4534_v57, %v1940_v29  ;;  %v1759_v16 = vadd.f32 %v4535_v36, %v1569_v8  ;;  %v2138_v25 = vadd.f32 %v4536_v53, %v1932_v41  ;;  %v1937_v48 = vadd.f32 %v4537_v2, %v1753_v52  ;;  %v4538_v62 = vld [vmem:[#allocation6_spill] sm:$0xff]  ;;  %v4539_v45 = vld [vmem:[#allocation20_spill] sm:$0xff] }
 0x16a   : > { %v4361_v32 = vpop.f32.mrf.mxu1  ;;  %v1941_v38 = vadd.f32 %v3224_v14, %v1757_v60  ;;  %v2136_v33 = vadd.f32 %v4538_v62, %v1930_v58  ;;  %v1935_v20 = vadd.f32 %v4539_v45, %v1751_v6  ;;  %v4540_v55 = vld [vmem:[#allocation21_spill] sm:$0xff]  ;;  %v2139_v31 = vadd.f32 %v4541_v30, %v1933_v26  ;;  %v4542_v29 = vld [vmem:[#allocation8_spill] sm:$0xff]  ;;  %v4543_v5 = vld [vmem:[#allocation10_spill] sm:$0xff] }
 0x16b   : > { %v3227_v13 = vpop.f32.mrf.mxu0  ;;  %v2144_v44 = vadd.f32 %v4540_v55, %v1938_v9  ;;  %v2137_v52 = vadd.f32 %v4542_v29, %v1931_v3  ;;  %v1939_v14 = vadd.f32 %v1902_v7, %v1755_v0  ;;  %v2142_v27 = vadd.f32 %v4543_v5, %v1936_v35  ;;  %v4545_v46 = vld [vmem:[#allocation14_spill] sm:$0xff]  ;;  %v4546_v0 = vld [vmem:[#allocation16_spill] sm:$0xff]  ;;  %v4551_v5 = vld [vmem:[#allocation17_spill] sm:$0xff] }
 0x16c   : > { %v3260_v39 = vpop.f32.mrf.mxu1  ;;  %v1944_v8 = vadd.f32 %v3227_v13, %v1760_v10  ;;  %v4398_v17 = vadd.f32 %v4544_v42, %v1934_v61  ;;  %v4403_v9 = vadd.f32 %v4545_v46, %v1937_v48  ;;  %v2147_v26 = vadd.f32 %v4318_v56, %v1941_v38 }
 0x16d   : > { %v1915_v34 = vpop.f32.mrf.mxu0  ;;  %v4407_v10 = vadd.f32 %v4546_v0, %v1935_v20  ;;  %v4547_v61 = vunpack.c.l.bf16 %v4285_v12  ;;  %v2145_v36 = vadd.f32 %v4331_v40, %v1939_v14  ;;  %v4548_v38 = vunpack.c.l.bf16 %v4293_v49 }
 0x16e   : > { %v2124_v18 = vpop.f32.mrf.mxu1  ;;  %v1942_v59 = vadd.f32 %v1915_v34, %v1758_v19  ;;  %v2150_v53 = vadd.f32 %v4347_v28, %v1944_v8  ;;  %v4549_v20 = vunpack.c.l.bf16 %v4283_v47  ;;  %v4550_v29 = vunpack.c.h.bf16 %v4285_v12 }
 0x16f   : > { %v3228_v15 = vpop.f32.mrf.mxu0  ;;  %v4552_v42 = vunpack.c.l.bf16 %v4551_v5  ;;  %v4554_v0 = vunpack.c.h.bf16 %v4283_v47  ;;  %v4555_v47 = vunpack.c.h.bf16 %v4551_v5 }
 0x170   : > { %v3287_v23 = vpop.f32.mrf.mxu1  ;;  %v1945_v3 = vadd.f32 %v3228_v15, %v1761_v37  ;;  %v2148_v40 = vadd.f32 %v4361_v32, %v1942_v59 }
 0x171   : > { %v2336_v50 = vadd.f32 %v3287_v23, %v2146_v24  ;;  %v1918_v41 = vpop.f32.mrf.mxu0 }
 0x172   : > { %v2295_v60 = vpop.f32.mrf.mxu1  ;;  %v1943_v2 = vadd.f32 %v1918_v41, %v1759_v16  ;;  %v2151_v28 = vadd.f32 %v3260_v39, %v1945_v3 }
 0x173   : > { %v2359_v58 = vadd.f32 %v4389_v4, %v2336_v50  ;;  %v2334_v6 = vadd.f32 %v2295_v60, %v2144_v44  ;;  %v3279_v7 = vpop.f32.mrf.mxu0 }
 0x174   : > { %v3288_v13 = vpop.f32.mrf.mxu1  ;;  %v2328_v35 = vadd.f32 %v3279_v7, %v2138_v25  ;;  %v2149_v30 = vadd.f32 %v2124_v18, %v1943_v2  ;;  %v4553_v18 = vunpack.c.h.bf16 %v4293_v49 }
 0x175   : > { %v2407_v57 = vadd.f32 %v4547_v61, %v2359_v58  ;;  %v2357_v24 = vadd.f32 %v4389_v4, %v2334_v6  ;;  %v2263_v56 = vpop.f32.mrf.mxu0  ;;  %v2337_v19 = vadd.f32 %v3288_v13, %v2147_v26 }
 0x176   : > { %v2298_v34 = vpop.f32.mrf.mxu1  ;;  %v2351_v37 = vadd.f32 %v4389_v4, %v2328_v35  ;;  %v2326_v48 = vadd.f32 %v2263_v56, %v2136_v33 }
 0x177   : > { %v2423_v25 = vmax.f32 %v2407_v57, 0.0  ;;  %v2405_v15 = vadd.f32 %v4548_v38, %v2357_v24  ;;  %v3280_v16 = vpop.f32.mrf.mxu0  ;;  %v2360_v23 = vadd.f32 %v4389_v4, %v2337_v19  ;;  %v2335_v62 = vadd.f32 %v2298_v34, %v2145_v36 }
 0x178   : > { %v3291_v45 = vpop.f32.mrf.mxu1  ;;  %v2399_v55 = vadd.f32 %v4549_v20, %v2351_v37  ;;  %v2349_v44 = vadd.f32 %v4389_v4, %v2326_v48  ;;  %v2329_v33 = vadd.f32 %v3280_v16, %v2139_v31 }
 0x179   : > { %2439 = vst [vmem:[%s4417_s13 + $0x50] sm:$0xff] %v2423_v25  ;;  %v2421_v50 = vmax.f32 %v2405_v15, 0.0  ;;  %v2408_v14 = vadd.f32 %v4550_v29, %v2360_v23  ;;  %v2266_v32 = vpop.f32.mrf.mxu0  ;;  %v2358_v39 = vadd.f32 %v4389_v4, %v2335_v62  ;;  %v2340_v8 = vadd.f32 %v3291_v45, %v2150_v53 }
 0x17a   : > { %v2311_v41 = vpop.f32.mrf.mxu1  ;;  %v2415_v60 = vmax.f32 %v2399_v55, 0.0  ;;  %v2397_v58 = vadd.f32 %v4552_v42, %v2349_v44  ;;  %v2352_v6 = vadd.f32 %v4389_v4, %v2329_v33  ;;  %v2327_v46 = vadd.f32 %v2266_v32, %v2137_v52 }
 0x17b   : > { %2437 = vst [vmem:[%s4417_s13 + $0x40] sm:$0xff] %v2421_v50  ;;  %v2424_v31 = vmax.f32 %v2408_v14, 0.0  ;;  %v2406_v12 = vadd.f32 %v4553_v18, %v2358_v39  ;;  %v3283_v26 = vpop.f32.mrf.mxu0  ;;  %v2363_v59 = vadd.f32 %v4389_v4, %v2340_v8  ;;  %v2338_v3 = vadd.f32 %v2311_v41, %v2148_v40 }
 0x17c   : > { %v3292_v7 = vpop.f32.mrf.mxu1  ;;  %2431 = vst [vmem:[%s4417_s13 + $0x10] sm:$0xff] %v2415_v60  ;;  %v2413_v13 = vmax.f32 %v2397_v58, 0.0  ;;  %v2400_v35 = vadd.f32 %v4554_v0, %v2352_v6  ;;  %v2350_v61 = vadd.f32 %v4389_v4, %v2327_v46  ;;  %v2332_v57 = vadd.f32 %v3283_v26, %v2142_v27 }
 0x17d   : > { %2440 = vst [vmem:[%s4417_s13 + $0x58] sm:$0xff] %v2424_v31  ;;  %v2422_v52 = vmax.f32 %v2406_v12, 0.0  ;;  %v2411_v49 = vadd.f32 %v2852_v11, %v2363_v59  ;;  %v2279_v24 = vpop.f32.mrf.mxu0  ;;  %v2361_v36 = vadd.f32 %v4389_v4, %v2338_v3  ;;  %v2341_v53 = vadd.f32 %v3292_v7, %v2151_v28 }
 0x17e   : > { %v2314_v2 = vpop.f32.mrf.mxu1  ;;  %2429 = vst [vmem:[%s4417_s13] sm:$0xff] %v2413_v13  ;;  %v2416_v56 = vmax.f32 %v2400_v35, 0.0  ;;  %v2398_v19 = vadd.f32 %v4555_v47, %v2350_v61  ;;  %v2355_v34 = vadd.f32 %v4389_v4, %v2332_v57  ;;  %v2330_v27 = vadd.f32 %v2279_v24, %v4398_v17 }
 0x17f   : > { %2438 = vst [vmem:[%s4417_s13 + $0x48] sm:$0xff] %v2422_v52  ;;  %v2427_v37 = vmax.f32 %v2411_v49, 0.0  ;;  %v2409_v11 = vadd.f32 %v2848_v1, %v2361_v36  ;;  %v3284_v25 = vpop.f32.mrf.mxu0  ;;  %v2364_v48 = vadd.f32 %v4389_v4, %v2341_v53  ;;  %v2339_v38 = vadd.f32 %v2314_v2, %v2149_v30 }
 0x180   : > { %2432 = vst [vmem:[%s4417_s13 + $0x18] sm:$0xff] %v2416_v56  ;;  %v2414_v15 = vmax.f32 %v2398_v19, 0.0  ;;  %v4556_v40 = vunpack.c.l.bf16 %v4295_v22  ;;  %v2353_v16 = vadd.f32 %v4389_v4, %v2330_v27  ;;  %v2333_v17 = vadd.f32 %v3284_v25, %v4403_v9 }
 0x181   : > { %2443 = vst [vmem:[%s4417_s13 + $0x70] sm:$0xff] %v2427_v37  ;;  %v2425_v23 = vmax.f32 %v2409_v11, 0.0  ;;  %v2412_v1 = vadd.f32 %v2853_v43, %v2364_v48  ;;  %v2282_v62 = vpop.f32.mrf.mxu0  ;;  %v2833_v45 = vunpack.c.h.bf16 %v4306_v51  ;;  %v2362_v20 = vadd.f32 %v4389_v4, %v2339_v38 }
 0x182   : > { %v2403_v28 = vadd.f32 %v4556_v40, %v2355_v34  ;;  %2430 = vst [vmem:[%s4417_s13 + $0x8] sm:$0xff] %v2414_v15  ;;  %v4557_v44 = vunpack.c.l.bf16 %v4306_v51  ;;  %v2356_v9 = vadd.f32 %v4389_v4, %v2333_v17  ;;  %v2331_v33 = vadd.f32 %v2282_v62, %v4407_v10 }
 0x183   : > { %2441 = vst [vmem:[%s4417_s13 + $0x60] sm:$0xff] %v2425_v23  ;;  %v2428_v63 = vmax.f32 %v2412_v1, 0.0  ;;  %v2410_v43 = vadd.f32 %v2849_v54, %v2362_v20  ;;  %v4558_v29 = vunpack.c.h.bf16 %v4295_v22 }
 0x184   : > { %v2419_v55 = vmax.f32 %v2403_v28, 0.0  ;;  %v2401_v50 = vadd.f32 %v4557_v44, %v2353_v16  ;;  %v2354_v51 = vadd.f32 %v4389_v4, %v2331_v33 }
 0x185   : > { %v2404_v14 = vadd.f32 %v4558_v29, %v2356_v9  ;;  %2444 = vst [vmem:[%s4417_s13 + $0x78] sm:$0xff] %v2428_v63  ;;  %v2426_v32 = vmax.f32 %v2410_v43, 0.0 }
 0x186   : > { %2435 = vst [vmem:[%s4417_s13 + $0x30] sm:$0xff] %v2419_v55  ;;  %v2417_v30 = vmax.f32 %v2401_v50, 0.0  ;;  %v2402_v8 = vadd.f32 %v2833_v45, %v2354_v51 }
 0x187   : > { %v2420_v39 = vmax.f32 %v2404_v14, 0.0  ;;  %2442 = vst [vmem:[%s4417_s13 + $0x68] sm:$0xff] %v2426_v32 }
 0x188   : > { %2433 = vst [vmem:[%s4417_s13 + $0x20] sm:$0xff] %v2417_v30  ;;  %v2418_v10 = vmax.f32 %v2402_v8, 0.0 }
 0x189   : > { %2436 = vst [vmem:[%s4417_s13 + $0x38] sm:$0xff] %v2420_v39 }
 0x18a   : > { %2434 = vst [vmem:[%s4417_s13 + $0x28] sm:$0xff] %v2418_v10 }
 0x18b PF: > { %s14_s19 = sadd.s32 1, %s3471_s19   ;;  %s4559_s15 = smov %s3463_s17 }
 0x18c   : > { %p11_p8 = scmp.ge.s32.totalorder %s14_s19, 6   ;;  %s4560_s16 = smov %s3467_s18 }
 0x18d   : > { %s4561_s17 = smov %s4564_s20  ;;  %s4562_s18 = smov %s4568_s21 }
 0x18e   :  { %13 = sbr.rel (!%p11_p8) target bundleno = 3 (0x3), region = 77 }

</bundles_post_ra>
